<compile_context>
chip_gen: v7x
topology: tpu7x:2x2x1
jax: 0.10.0
libtpu: 0.0.40
codegen_flags: <defaults>
</compile_context>

<pallas_src>
import jax
import jax.numpy as jnp
from jax.experimental import pallas as pl
from jax.experimental.pallas import tpu as pltpu

LEAKY_SLOPE = 0.01   # F.leaky_relu default negative_slope
BN_EPS = 1e-5        # nn.BatchNorm1d default eps

TILE_N = 128         # node-row tile (128-aligned: works on v5e/v6e/v7x)
TILE_E = 512         # edge-row tile for the edge MLP


def _round_up(x, m):
    return ((x + m - 1) // m) * m


def _cparams():
    return pltpu.CompilerParams(
        dimension_semantics=("parallel",),
        vmem_limit_bytes=48 * 1024 * 1024,
    )


# ----------------------------------------------------------------------------
# Pallas kernels
# ----------------------------------------------------------------------------
def gcn_layer_kernel(a_ref, x_ref, w_ref, scale_ref, shift_ref, o_ref):
    """One GCN layer for a row-tile of nodes.

    (A_row_block @ X) @ W  ->  folded BatchNorm1d(eval) scale/shift  ->  LeakyReLU.
    bf16 MXU operands with f32 accumulation; elementwise math in f32; bf16 output.
    """
    ax = jnp.dot(a_ref[...], x_ref[...], preferred_element_type=jnp.float32)
    h = jnp.dot(ax.astype(jnp.bfloat16), w_ref[...],
                preferred_element_type=jnp.float32)
    hn = h * scale_ref[...] + shift_ref[...]
    o_ref[...] = jnp.where(hn >= 0.0, hn, LEAKY_SLOPE * hn).astype(o_ref.dtype)


def gcn3_proj_kernel(a_ref, x_ref, w_ref, scale_ref, shift_ref,
                     wsrc_ref, wdst_ref, h_ref, psrc_ref, pdst_ref):
    """Fused third GCN layer + edge-MLP first layer pushed to node space.

    h = LeakyReLU(BN((A_row_block @ X) @ W3));  P_src = h @ W1[:512];  P_dst = h @ W1[512:].
    h stays resident in VMEM for the two projection matmuls.
    """
    ax = jnp.dot(a_ref[...], x_ref[...], preferred_element_type=jnp.float32)
    h = jnp.dot(ax.astype(jnp.bfloat16), w_ref[...],
                preferred_element_type=jnp.float32)
    hn = h * scale_ref[...] + shift_ref[...]
    hn = jnp.where(hn >= 0.0, hn, LEAKY_SLOPE * hn)
    h_ref[...] = hn                                   # f32 node embeddings (returned)
    hb = hn.astype(jnp.bfloat16)
    psrc_ref[...] = jnp.dot(hb, wsrc_ref[...],
                            preferred_element_type=jnp.float32).astype(psrc_ref.dtype)
    pdst_ref[...] = jnp.dot(hb, wdst_ref[...],
                            preferred_element_type=jnp.float32).astype(pdst_ref.dtype)


def edge_mlp_kernel(gsrc_ref, gdst_ref, b1_ref, w2_ref, b2_ref, w3_ref, b3_ref, o_ref):
    """Per-edge tail of the edge predictor.

    h1 = relu(P_src[src] + P_dst[dst] + b1); h2 = relu(h1 @ W2 + b2);
    logit = sum(h2 * w3_row) + b3; sigmoid.
    """
    h1 = gsrc_ref[...].astype(jnp.float32) + gdst_ref[...].astype(jnp.float32) + b1_ref[...]
    h1 = jnp.maximum(h1, 0.0)
    h2 = jnp.dot(h1.astype(jnp.bfloat16), w2_ref[...],
                 preferred_element_type=jnp.float32) + b2_ref[...]
    h2 = jnp.maximum(h2, 0.0)
    # Final Linear(128, 1): VPU multiply + XLU lane reduction (avoids a 1-wide MXU matmul).
    logits = jnp.sum(h2 * w3_ref[...], axis=-1, keepdims=True) + b3_ref[...]
    o_ref[...] = jax.nn.sigmoid(logits)


# ----------------------------------------------------------------------------
# pallas_call wrappers
# ----------------------------------------------------------------------------
def gcn_layer(a_bf16, x_bf16, w_bf16, scale, shift, *, tile_n=TILE_N):
    n_pad = a_bf16.shape[0]
    c_in = x_bf16.shape[1]
    c_out = w_bf16.shape[1]
    return pl.pallas_call(
        gcn_layer_kernel,
        out_shape=jax.ShapeDtypeStruct((n_pad, c_out), jnp.bfloat16),
        grid_spec=pltpu.PrefetchScalarGridSpec(
            num_scalar_prefetch=0,
            grid=(n_pad // tile_n,),
            in_specs=[
                pl.BlockSpec((tile_n, n_pad), lambda i: (i, 0)),   # A_hat row block
                pl.BlockSpec((n_pad, c_in), lambda i: (0, 0)),     # X (full, bf16)
                pl.BlockSpec((c_in, c_out), lambda i: (0, 0)),     # W (full, bf16)
                pl.BlockSpec((1, c_out), lambda i: (0, 0)),        # folded BN scale
                pl.BlockSpec((1, c_out), lambda i: (0, 0)),        # folded BN shift
            ],
            out_specs=pl.BlockSpec((tile_n, c_out), lambda i: (i, 0)),
        ),
        compiler_params=_cparams(),
    )(a_bf16, x_bf16, w_bf16, scale, shift)


def gcn3_proj(a_bf16, x_bf16, w_bf16, scale, shift, wsrc_bf16, wdst_bf16, *, tile_n=TILE_N):
    n_pad = a_bf16.shape[0]
    c_in = x_bf16.shape[1]
    c_out = w_bf16.shape[1]
    c_proj = wsrc_bf16.shape[1]
    return pl.pallas_call(
        gcn3_proj_kernel,
        out_shape=(jax.ShapeDtypeStruct((n_pad, c_out), jnp.float32),
                   jax.ShapeDtypeStruct((n_pad, c_proj), jnp.bfloat16),
                   jax.ShapeDtypeStruct((n_pad, c_proj), jnp.bfloat16)),
        grid_spec=pltpu.PrefetchScalarGridSpec(
            num_scalar_prefetch=0,
            grid=(n_pad // tile_n,),
            in_specs=[
                pl.BlockSpec((tile_n, n_pad), lambda i: (i, 0)),   # A_hat row block
                pl.BlockSpec((n_pad, c_in), lambda i: (0, 0)),     # X (full, bf16)
                pl.BlockSpec((c_in, c_out), lambda i: (0, 0)),     # W3 (bf16)
                pl.BlockSpec((1, c_out), lambda i: (0, 0)),        # folded BN scale
                pl.BlockSpec((1, c_out), lambda i: (0, 0)),        # folded BN shift
                pl.BlockSpec((c_out, c_proj), lambda i: (0, 0)),   # W1[:512]  (bf16)
                pl.BlockSpec((c_out, c_proj), lambda i: (0, 0)),   # W1[512:]  (bf16)
            ],
            out_specs=[pl.BlockSpec((tile_n, c_out), lambda i: (i, 0)),
                       pl.BlockSpec((tile_n, c_proj), lambda i: (i, 0)),
                       pl.BlockSpec((tile_n, c_proj), lambda i: (i, 0))],
        ),
        compiler_params=_cparams(),
    )(a_bf16, x_bf16, w_bf16, scale, shift, wsrc_bf16, wdst_bf16)


def edge_predictor(gsrc, gdst, b1, w2_bf16, b2, w3_row, b3, *, tile_e=TILE_E):
    e_pad, c1 = gsrc.shape
    c2 = w2_bf16.shape[1]
    return pl.pallas_call(
        edge_mlp_kernel,
        out_shape=jax.ShapeDtypeStruct((e_pad, 1), jnp.float32),
        grid_spec=pltpu.PrefetchScalarGridSpec(
            num_scalar_prefetch=0,
            grid=(e_pad // tile_e,),
            in_specs=[
                pl.BlockSpec((tile_e, c1), lambda i: (i, 0)),   # gathered P_src rows (bf16)
                pl.BlockSpec((tile_e, c1), lambda i: (i, 0)),   # gathered P_dst rows (bf16)
                pl.BlockSpec((1, c1), lambda i: (0, 0)),        # b1
                pl.BlockSpec((c1, c2), lambda i: (0, 0)),       # W2 (bf16)
                pl.BlockSpec((1, c2), lambda i: (0, 0)),        # b2
                pl.BlockSpec((1, c2), lambda i: (0, 0)),        # w3 row
                pl.BlockSpec((1, 1), lambda i: (0, 0)),         # b3
            ],
            out_specs=pl.BlockSpec((tile_e, 1), lambda i: (i, 0)),
        ),
        compiler_params=_cparams(),
    )(gsrc, gdst, b1, w2_bf16, b2, w3_row, b3)


# ----------------------------------------------------------------------------
# Plain-JAX glue
# ----------------------------------------------------------------------------
def build_gcn_agg_matrix(edge_index, num_nodes):
    """Dense aggregation matrix for GCNConv(add_self_loops=True, gcn_norm, aggr='mean').

    out[i] = mean_{edges j->i (incl. self-loop)}  deg(j)^-1/2 * deg(i)^-1/2 * xW[j]
    """
    src = edge_index[0]
    dst = edge_index[1]
    loop = jnp.arange(num_nodes, dtype=src.dtype)
    src = jnp.concatenate([src, loop])
    dst = jnp.concatenate([dst, loop])
    ones = jnp.ones_like(src, dtype=jnp.float32)
    deg = jnp.zeros((num_nodes,), jnp.float32).at[dst].add(ones)  # in-degree (with self loops)
    deg_inv_sqrt = jnp.where(deg > 0, 1.0 / jnp.sqrt(jnp.maximum(deg, 1.0)), 0.0)
    norm = deg_inv_sqrt[src] * deg_inv_sqrt[dst]
    # 'mean' aggregation divides the summed messages at target i by its incoming count
    vals = norm / jnp.maximum(deg[dst], 1.0)
    a_hat = jnp.zeros((num_nodes, num_nodes), jnp.float32).at[dst, src].add(vals)
    return a_hat


def init_params(key, num_features):
    dims = [(num_features, 128), (128, 256), (256, 512)]
    params = {}
    keys = jax.random.split(key, 16)
    ki = 0
    for li, (cin, cout) in enumerate(dims, start=1):
        params[f"w{li}"] = jax.random.normal(keys[ki], (cin, cout), jnp.float32) * 0.05; ki += 1
        params[f"b{li}"] = jax.random.normal(keys[ki], (1, cout), jnp.float32) * 0.05; ki += 1
        # BatchNorm1d defaults: gamma=1, beta=0, running_mean=0, running_var=1
        params[f"gamma{li}"] = jnp.ones((1, cout), jnp.float32)
        params[f"beta{li}"] = jnp.zeros((1, cout), jnp.float32)
        params[f"mean{li}"] = jnp.zeros((1, cout), jnp.float32)
        params[f"var{li}"] = jnp.ones((1, cout), jnp.float32)
    # edge predictor: Linear(1024,256) -> Linear(256,128) -> Linear(128,1)
    for name, (cin, cout) in (("e1", (1024, 256)), ("e2", (256, 128)), ("e3", (128, 1))):
        params[f"w_{name}"] = jax.random.normal(keys[ki], (cin, cout), jnp.float32) * 0.05; ki += 1
        params[f"b_{name}"] = jax.random.normal(keys[ki], (1, cout), jnp.float32) * 0.05; ki += 1
    return params


def gnn_forward(params, x, edge_index):
    n = x.shape[0]
    n_pad = _round_up(n, TILE_N)

    # Dense normalized aggregation matrix, zero-padded to the node tile and cast to bf16
    # (halves its DMA footprint and VMEM pressure; MXU-native format).
    a_hat = build_gcn_agg_matrix(edge_index, n)
    a_bf16 = jnp.pad(a_hat, ((0, n_pad - n), (0, n_pad - n))).astype(jnp.bfloat16)

    def fold_bn(li):
        # Fold conv bias + BatchNorm1d(eval) into one per-channel scale/shift (hoisted here,
        # so the kernel does a single FMA per element).
        inv_std = jax.lax.rsqrt(params[f"var{li}"] + BN_EPS)
        scale = params[f"gamma{li}"] * inv_std
        shift = (params[f"b{li}"] - params[f"mean{li}"]) * scale + params[f"beta{li}"]
        return scale, shift

    # Padded rows never leak: their A_hat columns are zero.
    h = jnp.pad(x, ((0, n_pad - n), (0, 0))).astype(jnp.bfloat16)
    for li in (1, 2):
        scale, shift = fold_bn(li)
        h = gcn_layer(a_bf16, h, params[f"w{li}"].astype(jnp.bfloat16), scale, shift)
        # dropout1 / dropout2 are identity in inference mode

    # Fused layer 3 + edge-predictor first layer pushed to node space:
    #   concat([h[src], h[dst]]) @ W1 == (h @ W1[:512])[src] + (h @ W1[512:])[dst]
    scale3, shift3 = fold_bn(3)
    w_e1 = params["w_e1"]
    h, p_src, p_dst = gcn3_proj(a_bf16, h, params["w3"].astype(jnp.bfloat16),
                                scale3, shift3,
                                w_e1[:512].astype(jnp.bfloat16),
                                w_e1[512:].astype(jnp.bfloat16))

    src, dst = edge_index[0], edge_index[1]
    e = src.shape[0]
    e_pad = _round_up(e, TILE_E)
    src_p = jnp.pad(src, (0, e_pad - e))
    dst_p = jnp.pad(dst, (0, e_pad - e))
    gsrc = p_src[src_p]   # (E_pad, 256) bf16 gather — plain-JAX glue
    gdst = p_dst[dst_p]   # (E_pad, 256) bf16

    pred = edge_predictor(gsrc, gdst,
                          params["b_e1"],
                          params["w_e2"].astype(jnp.bfloat16), params["b_e2"],
                          params["w_e3"].T,            # (1, 128) row vector
                          params["b_e3"])
    return h[:n], pred[:e]


# ----------------------------------------------------------------------------
# Main
# ----------------------------------------------------------------------------
if __name__ == "__main__":
    key = jax.random.PRNGKey(0)
    k_x, k_e, k_p = jax.random.split(key, 3)

    num_features = 16
    num_nodes = 64
    num_edges = 128

    x = jax.random.normal(k_x, (num_nodes, num_features), jnp.float32)
    edge_index = jax.random.randint(k_e, (2, num_edges), 0, num_nodes, jnp.int32)

    params = init_params(k_p, num_features)

    node_emb, edge_pred = jax.jit(gnn_forward)(params, x, edge_index)
    node_emb = jax.block_until_ready(node_emb)
    edge_pred = jax.block_until_ready(edge_pred)

    assert node_emb.shape == (num_nodes, 512)
    assert edge_pred.shape == (num_edges, 1)
    assert bool(jnp.all(jnp.isfinite(node_emb)))
    assert bool(jnp.all((edge_pred >= 0.0) & (edge_pred <= 1.0)))
    print("KERNEL_OK")
</pallas_src>

<mosaic_0001>
module attributes {stable_mosaic.version = 11 : i64} {
  func.func private @main(%arg0: i32) attributes {dimension_semantics = [#tpu.dimension_semantics<core_parallel>], iteration_bounds = array<i64: 2>, tpu.core_type = #tpu.core_type<sc_scalar_subcore>, window_params = []} {
    return
  }
}

module attributes {stable_mosaic.version = 11 : i64} {
  func.func private @main(%arg0: i32) attributes {dimension_semantics = [#tpu.dimension_semantics<core_parallel>], iteration_bounds = array<i64: 2>, tpu.core_type = #tpu.core_type<sc_scalar_subcore>, window_params = []} {
    return
  }
}

module attributes {stable_mosaic.version = 11 : i64} {
  func.func @gcn_layer_kernel(%arg0: i32, %arg1: memref<128x128xbf16, #tpu.memory_space<vmem>>, %arg2: memref<128x16xbf16, #tpu.memory_space<vmem>>, %arg3: memref<16x128xbf16, #tpu.memory_space<vmem>>, %arg4: memref<1x128xf32, #tpu.memory_space<vmem>>, %arg5: memref<1x128xf32, #tpu.memory_space<vmem>>, %arg6: memref<128x128xbf16, #tpu.memory_space<vmem>>) attributes {dimension_semantics = [#tpu.dimension_semantics<parallel>], iteration_bounds = array<i64: 1>, scalar_prefetch = 0 : i64, scratch_operands = 0 : i64, tpu.core_type = #tpu.core_type<tc>, window_params = [{transform_indices = @transform_0, window_bounds = array<i64: 128, 128>}, {pipeline_mode = #tpu.pipeline_mode<synchronous>, transform_indices = @transform_1, window_bounds = array<i64: 128, 16>}, {pipeline_mode = #tpu.pipeline_mode<synchronous>, transform_indices = @transform_2, window_bounds = array<i64: 16, 128>}, {pipeline_mode = #tpu.pipeline_mode<synchronous>, transform_indices = @transform_3, window_bounds = array<i64: 1, 128>}, {pipeline_mode = #tpu.pipeline_mode<synchronous>, transform_indices = @transform_4, window_bounds = array<i64: 1, 128>}, {transform_indices = @transform_5, window_bounds = array<i64: 128, 128>}]} {
    %c0 = arith.constant 0 : index
    %c0_0 = arith.constant 0 : index
    %0 = vector.load %arg1[%c0, %c0_0] : memref<128x128xbf16, #tpu.memory_space<vmem>>, vector<128x128xbf16>
    %c0_1 = arith.constant 0 : index
    %c0_2 = arith.constant 0 : index
    %1 = vector.load %arg2[%c0_1, %c0_2] : memref<128x16xbf16, #tpu.memory_space<vmem>>, vector<128x16xbf16>
    %cst = arith.constant dense<0.000000e+00> : vector<128x16xf32>
    %2 = tpu.matmul %0, %1, %cst {dimension_numbers = #tpu.dot_dimension_numbers<[1], [0], [0], [1], [0, 0, 1, 1], [], []>} : vector<128x128xbf16>, vector<128x16xbf16>, vector<128x16xf32> -> vector<128x16xf32>
    %3 = arith.truncf %2 : vector<128x16xf32> to vector<128x16xbf16>
    %c0_3 = arith.constant 0 : index
    %c0_4 = arith.constant 0 : index
    %4 = vector.load %arg3[%c0_3, %c0_4] : memref<16x128xbf16, #tpu.memory_space<vmem>>, vector<16x128xbf16>
    %cst_5 = arith.constant dense<0.000000e+00> : vector<128x128xf32>
    %5 = tpu.matmul %3, %4, %cst_5 {dimension_numbers = #tpu.dot_dimension_numbers<[1], [0], [0], [1], [0, 0, 1, 1], [], []>} : vector<128x16xbf16>, vector<16x128xbf16>, vector<128x128xf32> -> vector<128x128xf32>
    %c0_6 = arith.constant 0 : index
    %c0_7 = arith.constant 0 : index
    %6 = vector.load %arg4[%c0_6, %c0_7] : memref<1x128xf32, #tpu.memory_space<vmem>>, vector<1x128xf32>
    %7 = vector.broadcast %6 : vector<1x128xf32> to vector<128x128xf32>
    %8 = arith.mulf %5, %7 : vector<128x128xf32>
    %c0_8 = arith.constant 0 : index
    %c0_9 = arith.constant 0 : index
    %9 = vector.load %arg5[%c0_8, %c0_9] : memref<1x128xf32, #tpu.memory_space<vmem>>, vector<1x128xf32>
    %10 = vector.broadcast %9 : vector<1x128xf32> to vector<128x128xf32>
    %11 = arith.addf %8, %10 : vector<128x128xf32>
    %cst_10 = arith.constant 0.000000e+00 : f32
    %12 = vector.broadcast %cst_10 : f32 to vector<128x128xf32>
    %13 = arith.cmpf oge, %11, %12 : vector<128x128xf32>
    %cst_11 = arith.constant 0.00999999977 : f32
    %14 = vector.broadcast %cst_11 : f32 to vector<128x128xf32>
    %15 = arith.mulf %14, %11 : vector<128x128xf32>
    %16 = arith.select %13, %11, %15 : vector<128x128xi1>, vector<128x128xf32>
    %17 = arith.truncf %16 : vector<128x128xf32> to vector<128x128xbf16>
    %c0_12 = arith.constant 0 : index
    %c0_13 = arith.constant 0 : index
    %18 = vector.load %arg6[%c0_12, %c0_13] : memref<128x128xbf16, #tpu.memory_space<vmem>>, vector<128x128xbf16>
    tpu.vector_store %arg6[%c0_12, %c0_13], %17 {strides = array<i32>} : memref<128x128xbf16, #tpu.memory_space<vmem>>, vector<128x128xbf16>,
    return
  }
  func.func @transform_0(%arg0: i32) -> (i32, i32) {
    %c0_i32 = arith.constant 0 : i32
    %c0_i32_0 = arith.constant 0 : i32
    return %arg0, %c0_i32 : i32, i32
  }
  func.func @transform_1(%arg0: i32) -> (i32, i32) {
    %c0_i32 = arith.constant 0 : i32
    %c0_i32_0 = arith.constant 0 : i32
    %c0_i32_1 = arith.constant 0 : i32
    return %c0_i32, %c0_i32_0 : i32, i32
  }
  func.func @transform_2(%arg0: i32) -> (i32, i32) {
    %c0_i32 = arith.constant 0 : i32
    %c0_i32_0 = arith.constant 0 : i32
    %c0_i32_1 = arith.constant 0 : i32
    return %c0_i32, %c0_i32_0 : i32, i32
  }
  func.func @transform_3(%arg0: i32) -> (i32, i32) {
    %c0_i32 = arith.constant 0 : i32
    %c0_i32_0 = arith.constant 0 : i32
    %c0_i32_1 = arith.constant 0 : i32
    return %c0_i32, %c0_i32_0 : i32, i32
  }
  func.func @transform_4(%arg0: i32) -> (i32, i32) {
    %c0_i32 = arith.constant 0 : i32
    %c0_i32_0 = arith.constant 0 : i32
    %c0_i32_1 = arith.constant 0 : i32
    return %c0_i32, %c0_i32_0 : i32, i32
  }
  func.func @transform_5(%arg0: i32) -> (i32, i32) {
    %c0_i32 = arith.constant 0 : i32
    %c0_i32_0 = arith.constant 0 : i32
    return %arg0, %c0_i32 : i32, i32
  }
}

module attributes {stable_mosaic.version = 11 : i64} {
  func.func @gcn_layer_kernel(%arg0: i32, %arg1: memref<128x128xbf16, #tpu.memory_space<vmem>>, %arg2: memref<128x128xbf16, #tpu.memory_space<vmem>>, %arg3: memref<128x256xbf16, #tpu.memory_space<vmem>>, %arg4: memref<1x256xf32, #tpu.memory_space<vmem>>, %arg5: memref<1x256xf32, #tpu.memory_space<vmem>>, %arg6: memref<128x256xbf16, #tpu.memory_space<vmem>>) attributes {dimension_semantics = [#tpu.dimension_semantics<parallel>], iteration_bounds = array<i64: 1>, scalar_prefetch = 0 : i64, scratch_operands = 0 : i64, tpu.core_type = #tpu.core_type<tc>, window_params = [{transform_indices = @transform_0, window_bounds = array<i64: 128, 128>}, {pipeline_mode = #tpu.pipeline_mode<synchronous>, transform_indices = @transform_1, window_bounds = array<i64: 128, 128>}, {pipeline_mode = #tpu.pipeline_mode<synchronous>, transform_indices = @transform_2, window_bounds = array<i64: 128, 256>}, {pipeline_mode = #tpu.pipeline_mode<synchronous>, transform_indices = @transform_3, window_bounds = array<i64: 1, 256>}, {pipeline_mode = #tpu.pipeline_mode<synchronous>, transform_indices = @transform_4, window_bounds = array<i64: 1, 256>}, {transform_indices = @transform_5, window_bounds = array<i64: 128, 256>}]} {
    %c0 = arith.constant 0 : index
    %c0_0 = arith.constant 0 : index
    %0 = vector.load %arg1[%c0, %c0_0] : memref<128x128xbf16, #tpu.memory_space<vmem>>, vector<128x128xbf16>
    %c0_1 = arith.constant 0 : index
    %c0_2 = arith.constant 0 : index
    %1 = vector.load %arg2[%c0_1, %c0_2] : memref<128x128xbf16, #tpu.memory_space<vmem>>, vector<128x128xbf16>
    %cst = arith.constant dense<0.000000e+00> : vector<128x128xf32>
    %2 = tpu.matmul %0, %1, %cst {dimension_numbers = #tpu.dot_dimension_numbers<[1], [0], [0], [1], [0, 0, 1, 1], [], []>} : vector<128x128xbf16>, vector<128x128xbf16>, vector<128x128xf32> -> vector<128x128xf32>
    %3 = arith.truncf %2 : vector<128x128xf32> to vector<128x128xbf16>
    %c0_3 = arith.constant 0 : index
    %c0_4 = arith.constant 0 : index
    %4 = vector.load %arg3[%c0_3, %c0_4] : memref<128x256xbf16, #tpu.memory_space<vmem>>, vector<128x256xbf16>
    %cst_5 = arith.constant dense<0.000000e+00> : vector<128x256xf32>
    %5 = tpu.matmul %3, %4, %cst_5 {dimension_numbers = #tpu.dot_dimension_numbers<[1], [0], [0], [1], [0, 0, 1, 1], [], []>} : vector<128x128xbf16>, vector<128x256xbf16>, vector<128x256xf32> -> vector<128x256xf32>
    %c0_6 = arith.constant 0 : index
    %c0_7 = arith.constant 0 : index
    %6 = vector.load %arg4[%c0_6, %c0_7] : memref<1x256xf32, #tpu.memory_space<vmem>>, vector<1x256xf32>
    %7 = vector.broadcast %6 : vector<1x256xf32> to vector<128x256xf32>
    %8 = arith.mulf %5, %7 : vector<128x256xf32>
    %c0_8 = arith.constant 0 : index
    %c0_9 = arith.constant 0 : index
    %9 = vector.load %arg5[%c0_8, %c0_9] : memref<1x256xf32, #tpu.memory_space<vmem>>, vector<1x256xf32>
    %10 = vector.broadcast %9 : vector<1x256xf32> to vector<128x256xf32>
    %11 = arith.addf %8, %10 : vector<128x256xf32>
    %cst_10 = arith.constant 0.000000e+00 : f32
    %12 = vector.broadcast %cst_10 : f32 to vector<128x256xf32>
    %13 = arith.cmpf oge, %11, %12 : vector<128x256xf32>
    %cst_11 = arith.constant 0.00999999977 : f32
    %14 = vector.broadcast %cst_11 : f32 to vector<128x256xf32>
    %15 = arith.mulf %14, %11 : vector<128x256xf32>
    %16 = arith.select %13, %11, %15 : vector<128x256xi1>, vector<128x256xf32>
    %17 = arith.truncf %16 : vector<128x256xf32> to vector<128x256xbf16>
    %c0_12 = arith.constant 0 : index
    %c0_13 = arith.constant 0 : index
    %18 = vector.load %arg6[%c0_12, %c0_13] : memref<128x256xbf16, #tpu.memory_space<vmem>>, vector<128x256xbf16>
    tpu.vector_store %arg6[%c0_12, %c0_13], %17 {strides = array<i32>} : memref<128x256xbf16, #tpu.memory_space<vmem>>, vector<128x256xbf16>,
    return
  }
  func.func @transform_0(%arg0: i32) -> (i32, i32) {
    %c0_i32 = arith.constant 0 : i32
    %c0_i32_0 = arith.constant 0 : i32
    return %arg0, %c0_i32 : i32, i32
  }
  func.func @transform_1(%arg0: i32) -> (i32, i32) {
    %c0_i32 = arith.constant 0 : i32
    %c0_i32_0 = arith.constant 0 : i32
    %c0_i32_1 = arith.constant 0 : i32
    return %c0_i32, %c0_i32_0 : i32, i32
  }
  func.func @transform_2(%arg0: i32) -> (i32, i32) {
    %c0_i32 = arith.constant 0 : i32
    %c0_i32_0 = arith.constant 0 : i32
    %c0_i32_1 = arith.constant 0 : i32
    return %c0_i32, %c0_i32_0 : i32, i32
  }
  func.func @transform_3(%arg0: i32) -> (i32, i32) {
    %c0_i32 = arith.constant 0 : i32
    %c0_i32_0 = arith.constant 0 : i32
    %c0_i32_1 = arith.constant 0 : i32
    return %c0_i32, %c0_i32_0 : i32, i32
  }
  func.func @transform_4(%arg0: i32) -> (i32, i32) {
    %c0_i32 = arith.constant 0 : i32
    %c0_i32_0 = arith.constant 0 : i32
    %c0_i32_1 = arith.constant 0 : i32
    return %c0_i32, %c0_i32_0 : i32, i32
  }
  func.func @transform_5(%arg0: i32) -> (i32, i32) {
    %c0_i32 = arith.constant 0 : i32
    %c0_i32_0 = arith.constant 0 : i32
    return %arg0, %c0_i32 : i32, i32
  }
}

module attributes {stable_mosaic.version = 11 : i64} {
  func.func @gcn3_proj_kernel(%arg0: i32, %arg1: memref<128x128xbf16, #tpu.memory_space<vmem>>, %arg2: memref<128x256xbf16, #tpu.memory_space<vmem>>, %arg3: memref<256x512xbf16, #tpu.memory_space<vmem>>, %arg4: memref<1x512xf32, #tpu.memory_space<vmem>>, %arg5: memref<1x512xf32, #tpu.memory_space<vmem>>, %arg6: memref<512x256xbf16, #tpu.memory_space<vmem>>, %arg7: memref<512x256xbf16, #tpu.memory_space<vmem>>, %arg8: memref<128x512xf32, #tpu.memory_space<vmem>>, %arg9: memref<128x256xbf16, #tpu.memory_space<vmem>>, %arg10: memref<128x256xbf16, #tpu.memory_space<vmem>>) attributes {dimension_semantics = [#tpu.dimension_semantics<parallel>], iteration_bounds = array<i64: 1>, scalar_prefetch = 0 : i64, scratch_operands = 0 : i64, tpu.core_type = #tpu.core_type<tc>, window_params = [{transform_indices = @transform_0, window_bounds = array<i64: 128, 128>}, {pipeline_mode = #tpu.pipeline_mode<synchronous>, transform_indices = @transform_1, window_bounds = array<i64: 128, 256>}, {pipeline_mode = #tpu.pipeline_mode<synchronous>, transform_indices = @transform_2, window_bounds = array<i64: 256, 512>}, {pipeline_mode = #tpu.pipeline_mode<synchronous>, transform_indices = @transform_3, window_bounds = array<i64: 1, 512>}, {pipeline_mode = #tpu.pipeline_mode<synchronous>, transform_indices = @transform_4, window_bounds = array<i64: 1, 512>}, {pipeline_mode = #tpu.pipeline_mode<synchronous>, transform_indices = @transform_5, window_bounds = array<i64: 512, 256>}, {pipeline_mode = #tpu.pipeline_mode<synchronous>, transform_indices = @transform_6, window_bounds = array<i64: 512, 256>}, {transform_indices = @transform_7, window_bounds = array<i64: 128, 512>}, {transform_indices = @transform_8, window_bounds = array<i64: 128, 256>}, {transform_indices = @transform_9, window_bounds = array<i64: 128, 256>}]} {
    %c0 = arith.constant 0 : index
    %c0_0 = arith.constant 0 : index
    %0 = vector.load %arg1[%c0, %c0_0] : memref<128x128xbf16, #tpu.memory_space<vmem>>, vector<128x128xbf16>
    %c0_1 = arith.constant 0 : index
    %c0_2 = arith.constant 0 : index
    %1 = vector.load %arg2[%c0_1, %c0_2] : memref<128x256xbf16, #tpu.memory_space<vmem>>, vector<128x256xbf16>
    %cst = arith.constant dense<0.000000e+00> : vector<128x256xf32>
    %2 = tpu.matmul %0, %1, %cst {dimension_numbers = #tpu.dot_dimension_numbers<[1], [0], [0], [1], [0, 0, 1, 1], [], []>} : vector<128x128xbf16>, vector<128x256xbf16>, vector<128x256xf32> -> vector<128x256xf32>
    %3 = arith.truncf %2 : vector<128x256xf32> to vector<128x256xbf16>
    %c0_3 = arith.constant 0 : index
    %c0_4 = arith.constant 0 : index
    %4 = vector.load %arg3[%c0_3, %c0_4] : memref<256x512xbf16, #tpu.memory_space<vmem>>, vector<256x512xbf16>
    %cst_5 = arith.constant dense<0.000000e+00> : vector<128x512xf32>
    %5 = tpu.matmul %3, %4, %cst_5 {dimension_numbers = #tpu.dot_dimension_numbers<[1], [0], [0], [1], [0, 0, 1, 1], [], []>} : vector<128x256xbf16>, vector<256x512xbf16>, vector<128x512xf32> -> vector<128x512xf32>
    %c0_6 = arith.constant 0 : index
    %c0_7 = arith.constant 0 : index
    %6 = vector.load %arg4[%c0_6, %c0_7] : memref<1x512xf32, #tpu.memory_space<vmem>>, vector<1x512xf32>
    %7 = vector.broadcast %6 : vector<1x512xf32> to vector<128x512xf32>
    %8 = arith.mulf %5, %7 : vector<128x512xf32>
    %c0_8 = arith.constant 0 : index
    %c0_9 = arith.constant 0 : index
    %9 = vector.load %arg5[%c0_8, %c0_9] : memref<1x512xf32, #tpu.memory_space<vmem>>, vector<1x512xf32>
    %10 = vector.broadcast %9 : vector<1x512xf32> to vector<128x512xf32>
    %11 = arith.addf %8, %10 : vector<128x512xf32>
    %cst_10 = arith.constant 0.000000e+00 : f32
    %12 = vector.broadcast %cst_10 : f32 to vector<128x512xf32>
    %13 = arith.cmpf oge, %11, %12 : vector<128x512xf32>
    %cst_11 = arith.constant 0.00999999977 : f32
    %14 = vector.broadcast %cst_11 : f32 to vector<128x512xf32>
    %15 = arith.mulf %14, %11 : vector<128x512xf32>
    %16 = arith.select %13, %11, %15 : vector<128x512xi1>, vector<128x512xf32>
    %c0_12 = arith.constant 0 : index
    %c0_13 = arith.constant 0 : index
    %17 = vector.load %arg8[%c0_12, %c0_13] : memref<128x512xf32, #tpu.memory_space<vmem>>, vector<128x512xf32>
    tpu.vector_store %arg8[%c0_12, %c0_13], %16 {strides = array<i32>} : memref<128x512xf32, #tpu.memory_space<vmem>>, vector<128x512xf32>,
    %18 = arith.truncf %16 : vector<128x512xf32> to vector<128x512xbf16>
    %c0_14 = arith.constant 0 : index
    %c0_15 = arith.constant 0 : index
    %19 = vector.load %arg6[%c0_14, %c0_15] : memref<512x256xbf16, #tpu.memory_space<vmem>>, vector<512x256xbf16>
    %cst_16 = arith.constant dense<0.000000e+00> : vector<128x256xf32>
    %20 = tpu.matmul %18, %19, %cst_16 {dimension_numbers = #tpu.dot_dimension_numbers<[1], [0], [0], [1], [0, 0, 1, 1], [], []>} : vector<128x512xbf16>, vector<512x256xbf16>, vector<128x256xf32> -> vector<128x256xf32>
    %21 = arith.truncf %20 : vector<128x256xf32> to vector<128x256xbf16>
    %c0_17 = arith.constant 0 : index
    %c0_18 = arith.constant 0 : index
    %22 = vector.load %arg9[%c0_17, %c0_18] : memref<128x256xbf16, #tpu.memory_space<vmem>>, vector<128x256xbf16>
    tpu.vector_store %arg9[%c0_17, %c0_18], %21 {strides = array<i32>} : memref<128x256xbf16, #tpu.memory_space<vmem>>, vector<128x256xbf16>,
    %c0_19 = arith.constant 0 : index
    %c0_20 = arith.constant 0 : index
    %23 = vector.load %arg7[%c0_19, %c0_20] : memref<512x256xbf16, #tpu.memory_space<vmem>>, vector<512x256xbf16>
    %cst_21 = arith.constant dense<0.000000e+00> : vector<128x256xf32>
    %24 = tpu.matmul %18, %23, %cst_21 {dimension_numbers = #tpu.dot_dimension_numbers<[1], [0], [0], [1], [0, 0, 1, 1], [], []>} : vector<128x512xbf16>, vector<512x256xbf16>, vector<128x256xf32> -> vector<128x256xf32>
    %25 = arith.truncf %24 : vector<128x256xf32> to vector<128x256xbf16>
    %c0_22 = arith.constant 0 : index
    %c0_23 = arith.constant 0 : index
    %26 = vector.load %arg10[%c0_22, %c0_23] : memref<128x256xbf16, #tpu.memory_space<vmem>>, vector<128x256xbf16>
    tpu.vector_store %arg10[%c0_22, %c0_23], %25 {strides = array<i32>} : memref<128x256xbf16, #tpu.memory_space<vmem>>, vector<128x256xbf16>,
    return
  }
  func.func @transform_0(%arg0: i32) -> (i32, i32) {
    %c0_i32 = arith.constant 0 : i32
    %c0_i32_0 = arith.constant 0 : i32
    return %arg0, %c0_i32 : i32, i32
  }
  func.func @transform_1(%arg0: i32) -> (i32, i32) {
    %c0_i32 = arith.constant 0 : i32
    %c0_i32_0 = arith.constant 0 : i32
    %c0_i32_1 = arith.constant 0 : i32
    return %c0_i32, %c0_i32_0 : i32, i32
  }
  func.func @transform_2(%arg0: i32) -> (i32, i32) {
    %c0_i32 = arith.constant 0 : i32
    %c0_i32_0 = arith.constant 0 : i32
    %c0_i32_1 = arith.constant 0 : i32
    return %c0_i32, %c0_i32_0 : i32, i32
  }
  func.func @transform_3(%arg0: i32) -> (i32, i32) {
    %c0_i32 = arith.constant 0 : i32
    %c0_i32_0 = arith.constant 0 : i32
    %c0_i32_1 = arith.constant 0 : i32
    return %c0_i32, %c0_i32_0 : i32, i32
  }
  func.func @transform_4(%arg0: i32) -> (i32, i32) {
    %c0_i32 = arith.constant 0 : i32
    %c0_i32_0 = arith.constant 0 : i32
    %c0_i32_1 = arith.constant 0 : i32
    return %c0_i32, %c0_i32_0 : i32, i32
  }
  func.func @transform_5(%arg0: i32) -> (i32, i32) {
    %c0_i32 = arith.constant 0 : i32
    %c0_i32_0 = arith.constant 0 : i32
    %c0_i32_1 = arith.constant 0 : i32
    return %c0_i32, %c0_i32_0 : i32, i32
  }
  func.func @transform_6(%arg0: i32) -> (i32, i32) {
    %c0_i32 = arith.constant 0 : i32
    %c0_i32_0 = arith.constant 0 : i32
    %c0_i32_1 = arith.constant 0 : i32
    return %c0_i32, %c0_i32_0 : i32, i32
  }
  func.func @transform_7(%arg0: i32) -> (i32, i32) {
    %c0_i32 = arith.constant 0 : i32
    %c0_i32_0 = arith.constant 0 : i32
    return %arg0, %c0_i32 : i32, i32
  }
  func.func @transform_8(%arg0: i32) -> (i32, i32) {
    %c0_i32 = arith.constant 0 : i32
    %c0_i32_0 = arith.constant 0 : i32
    return %arg0, %c0_i32 : i32, i32
  }
  func.func @transform_9(%arg0: i32) -> (i32, i32) {
    %c0_i32 = arith.constant 0 : i32
    %c0_i32_0 = arith.constant 0 : i32
    return %arg0, %c0_i32 : i32, i32
  }
}

module attributes {stable_mosaic.version = 11 : i64} {
  func.func @edge_mlp_kernel(%arg0: i32, %arg1: memref<512x256xbf16, #tpu.memory_space<vmem>>, %arg2: memref<512x256xbf16, #tpu.memory_space<vmem>>, %arg3: memref<1x256xf32, #tpu.memory_space<vmem>>, %arg4: memref<256x128xbf16, #tpu.memory_space<vmem>>, %arg5: memref<1x128xf32, #tpu.memory_space<vmem>>, %arg6: memref<1x128xf32, #tpu.memory_space<vmem>>, %arg7: memref<1x1xf32, #tpu.memory_space<vmem>>, %arg8: memref<512x1xf32, #tpu.memory_space<vmem>>) attributes {dimension_semantics = [#tpu.dimension_semantics<parallel>], iteration_bounds = array<i64: 1>, scalar_prefetch = 0 : i64, scratch_operands = 0 : i64, tpu.core_type = #tpu.core_type<tc>, window_params = [{transform_indices = @transform_0, window_bounds = array<i64: 512, 256>}, {transform_indices = @transform_1, window_bounds = array<i64: 512, 256>}, {pipeline_mode = #tpu.pipeline_mode<synchronous>, transform_indices = @transform_2, window_bounds = array<i64: 1, 256>}, {pipeline_mode = #tpu.pipeline_mode<synchronous>, transform_indices = @transform_3, window_bounds = array<i64: 256, 128>}, {pipeline_mode = #tpu.pipeline_mode<synchronous>, transform_indices = @transform_4, window_bounds = array<i64: 1, 128>}, {pipeline_mode = #tpu.pipeline_mode<synchronous>, transform_indices = @transform_5, window_bounds = array<i64: 1, 128>}, {pipeline_mode = #tpu.pipeline_mode<synchronous>, transform_indices = @transform_6, window_bounds = array<i64: 1, 1>}, {transform_indices = @transform_7, window_bounds = array<i64: 512, 1>}]} {
    %c0 = arith.constant 0 : index
    %c0_0 = arith.constant 0 : index
    %0 = vector.load %arg1[%c0, %c0_0] : memref<512x256xbf16, #tpu.memory_space<vmem>>, vector<512x256xbf16>
    %1 = arith.extf %0 : vector<512x256xbf16> to vector<512x256xf32>
    %c0_1 = arith.constant 0 : index
    %c0_2 = arith.constant 0 : index
    %2 = vector.load %arg2[%c0_1, %c0_2] : memref<512x256xbf16, #tpu.memory_space<vmem>>, vector<512x256xbf16>
    %3 = arith.extf %2 : vector<512x256xbf16> to vector<512x256xf32>
    %4 = arith.addf %1, %3 : vector<512x256xf32>
    %c0_3 = arith.constant 0 : index
    %c0_4 = arith.constant 0 : index
    %5 = vector.load %arg3[%c0_3, %c0_4] : memref<1x256xf32, #tpu.memory_space<vmem>>, vector<1x256xf32>
    %6 = vector.broadcast %5 : vector<1x256xf32> to vector<512x256xf32>
    %7 = arith.addf %4, %6 : vector<512x256xf32>
    %cst = arith.constant 0.000000e+00 : f32
    %8 = vector.broadcast %cst : f32 to vector<512x256xf32>
    %9 = arith.maximumf %7, %8 : vector<512x256xf32>
    %10 = arith.truncf %9 : vector<512x256xf32> to vector<512x256xbf16>
    %c0_5 = arith.constant 0 : index
    %c0_6 = arith.constant 0 : index
    %11 = vector.load %arg4[%c0_5, %c0_6] : memref<256x128xbf16, #tpu.memory_space<vmem>>, vector<256x128xbf16>
    %cst_7 = arith.constant dense<0.000000e+00> : vector<512x128xf32>
    %12 = tpu.matmul %10, %11, %cst_7 {dimension_numbers = #tpu.dot_dimension_numbers<[1], [0], [0], [1], [0, 0, 1, 1], [], []>} : vector<512x256xbf16>, vector<256x128xbf16>, vector<512x128xf32> -> vector<512x128xf32>
    %c0_8 = arith.constant 0 : index
    %c0_9 = arith.constant 0 : index
    %13 = vector.load %arg5[%c0_8, %c0_9] : memref<1x128xf32, #tpu.memory_space<vmem>>, vector<1x128xf32>
    %14 = vector.broadcast %13 : vector<1x128xf32> to vector<512x128xf32>
    %15 = arith.addf %12, %14 : vector<512x128xf32>
    %cst_10 = arith.constant 0.000000e+00 : f32
    %16 = vector.broadcast %cst_10 : f32 to vector<512x128xf32>
    %17 = arith.maximumf %15, %16 : vector<512x128xf32>
    %c0_11 = arith.constant 0 : index
    %c0_12 = arith.constant 0 : index
    %18 = vector.load %arg6[%c0_11, %c0_12] : memref<1x128xf32, #tpu.memory_space<vmem>>, vector<1x128xf32>
    %19 = vector.broadcast %18 : vector<1x128xf32> to vector<512x128xf32>
    %20 = arith.mulf %17, %19 : vector<512x128xf32>
    %cst_13 = arith.constant dense<0.000000e+00> : vector<512xf32>
    %21 = vector.multi_reduction <add>, %20, %cst_13 [1] : vector<512x128xf32> to vector<512xf32>
    %22 = vector.shape_cast %21 : vector<512xf32> to vector<512x1xf32>
    %c0_14 = arith.constant 0 : index
    %c0_15 = arith.constant 0 : index
    %23 = vector.load %arg7[%c0_14, %c0_15] : memref<1x1xf32, #tpu.memory_space<vmem>>, vector<1x1xf32>
    %24 = vector.broadcast %23 : vector<1x1xf32> to vector<512x1xf32>
    %25 = arith.addf %22, %24 : vector<512x1xf32>
    %26 = arith.negf %25 : vector<512x1xf32>
    %27 = math.exp %26 : vector<512x1xf32>
    %cst_16 = arith.constant 1.000000e+00 : f32
    %28 = vector.broadcast %cst_16 : f32 to vector<512x1xf32>
    %29 = arith.addf %28, %27 : vector<512x1xf32>
    %30 = arith.divf %28, %29 : vector<512x1xf32>
    %c0_17 = arith.constant 0 : index
    %c0_18 = arith.constant 0 : index
    %31 = vector.load %arg8[%c0_17, %c0_18] : memref<512x1xf32, #tpu.memory_space<vmem>>, vector<512x1xf32>
    tpu.vector_store %arg8[%c0_17, %c0_18], %30 {strides = array<i32>} : memref<512x1xf32, #tpu.memory_space<vmem>>, vector<512x1xf32>,
    return
  }
  func.func @transform_0(%arg0: i32) -> (i32, i32) {
    %c0_i32 = arith.constant 0 : i32
    %c0_i32_0 = arith.constant 0 : i32
    return %arg0, %c0_i32 : i32, i32
  }
  func.func @transform_1(%arg0: i32) -> (i32, i32) {
    %c0_i32 = arith.constant 0 : i32
    %c0_i32_0 = arith.constant 0 : i32
    return %arg0, %c0_i32 : i32, i32
  }
  func.func @transform_2(%arg0: i32) -> (i32, i32) {
    %c0_i32 = arith.constant 0 : i32
    %c0_i32_0 = arith.constant 0 : i32
    %c0_i32_1 = arith.constant 0 : i32
    return %c0_i32, %c0_i32_0 : i32, i32
  }
  func.func @transform_3(%arg0: i32) -> (i32, i32) {
    %c0_i32 = arith.constant 0 : i32
    %c0_i32_0 = arith.constant 0 : i32
    %c0_i32_1 = arith.constant 0 : i32
    return %c0_i32, %c0_i32_0 : i32, i32
  }
  func.func @transform_4(%arg0: i32) -> (i32, i32) {
    %c0_i32 = arith.constant 0 : i32
    %c0_i32_0 = arith.constant 0 : i32
    %c0_i32_1 = arith.constant 0 : i32
    return %c0_i32, %c0_i32_0 : i32, i32
  }
  func.func @transform_5(%arg0: i32) -> (i32, i32) {
    %c0_i32 = arith.constant 0 : i32
    %c0_i32_0 = arith.constant 0 : i32
    %c0_i32_1 = arith.constant 0 : i32
    return %c0_i32, %c0_i32_0 : i32, i32
  }
  func.func @transform_6(%arg0: i32) -> (i32, i32) {
    %c0_i32 = arith.constant 0 : i32
    %c0_i32_0 = arith.constant 0 : i32
    %c0_i32_1 = arith.constant 0 : i32
    return %c0_i32, %c0_i32_0 : i32, i32
  }
  func.func @transform_7(%arg0: i32) -> (i32, i32) {
    %c0_i32 = arith.constant 0 : i32
    %c0_i32_0 = arith.constant 0 : i32
    return %arg0, %c0_i32 : i32, i32
  }
}

</mosaic_0001>

<bundles_post_ra>
// kernel: gnn_forward.4
= control target key start
LH: loop header
LB: loop body
LE: loop exit
PB: predicated region body
PF: predicated region fallthrough
CT: control target
= control target key end

     0   :  { %vm262_vm0 = vcmask 130048   ;;  %s915_s1 = inlined_call_operand.vmem [shape: bf16[128,16], index: 1, kind: input, shape index: {}]   ;;  %s916_s0 = inlined_call_operand.vmem [shape: bf16[128,128], index: 0, kind: input, shape index: {}]   ;;  %s917_s2 = inlined_call_operand.vmem [shape: bf16[16,128], index: 2, kind: input, shape index: {}]   ;;  %s918_s3 = inlined_call_operand.vmem [shape: f32[1,128], index: 3, kind: input, shape index: {}]   ;;  %s919_s4 = inlined_call_operand.vmem [shape: f32[1,128], index: 4, kind: input, shape index: {}]   ;;  %s920_s5 = inlined_call_operand.vmem [shape: bf16[128,128], index: 5, kind: output, shape index: {}]  }
   0x1   :  { %v743_v0 = vld [vmem:[%s915_s1] sm:$0xff]   ;;  %v744_v1 = vld [vmem:[%s915_s1 + $0x8] sm:$0xff]   ;;  %v745_v2 = vld [vmem:[%s915_s1 + $0x10] sm:$0xff]  }
   0x2   :  { %693 = vmatprep.subr.bf16.mxu0 %v743_v0  ;;  %v746_v3 = vld [vmem:[%s915_s1 + $0x18] sm:$0xff]   ;;  %v751_v4 = vld [vmem:[%s916_s0] sm:$0xff]   ;;  %v748_v6 = vld [vmem:[%s915_s1 + $0x28] sm:$0xff]  }
   0x3   :  { %694 = vmatpush3.bf16.msra.mxu0 %v743_v0  ;;  %709 = vmatprep.mubr.bf16.mxu0 %v751_v4  ;;  %v747_v5 = vld [vmem:[%s915_s1 + $0x20] sm:$0xff]   ;;  %v749_v7 = vld [vmem:[%s915_s1 + $0x30] sm:$0xff]   ;;  %v750_v8 = vld [vmem:[%s915_s1 + $0x38] sm:$0xff]  }
   0x4   :  { %695 = vmatprep.subr.bf16.mxu0 %v744_v1  ;;  %v752_v9 = vld [vmem:[%s916_s0 + $0x8] sm:$0xff]   ;;  %v753_v10 = vld [vmem:[%s916_s0 + $0x10] sm:$0xff]   ;;  %v754_v11 = vld [vmem:[%s916_s0 + $0x18] sm:$0xff]  }
   0x5   :  { %v755_v12 = vld [vmem:[%s916_s0 + $0x20] sm:$0xff]   ;;  %v756_v13 = vld [vmem:[%s916_s0 + $0x28] sm:$0xff]   ;;  %v757_v14 = vld [vmem:[%s916_s0 + $0x30] sm:$0xff]  }
   0x6   :  { %v758_v15 = vld [vmem:[%s916_s0 + $0x38] sm:$0xff]   ;;  %v759_v16 = vld [vmem:[%s917_s2] sm:$0xff]  }
   0x7   :  { %696 = vmatpush3.bf16.msra.mxu0 %v744_v1  ;;  %725 = vmatprep.subr.bf16.mxu1 %v759_v16  ;;  %v852_v41 = vld [vmem:[%s918_s3] ss:$0 sm:$0xff] }
   0x8   :  { %697 = vmatprep.subr.bf16.mxu0 %v745_v2  ;;  %726 = vmatpush3.bf16.msra.mxu1 %v759_v16  ;;  %v857_v43 = vld [vmem:[%s919_s4] ss:$0 sm:$0xff] }
   0xb   :  { %698 = vmatpush3.bf16.msra.mxu0 %v745_v2 }
   0xc   :  { %699 = vmatprep.subr.bf16.mxu0 %v746_v3 }
   0xf   :  { %700 = vmatpush3.bf16.msra.mxu0 %v746_v3 }
  0x10   :  { %701 = vmatprep.subr.bf16.mxu0 %v747_v5 }
  0x13   :  { %702 = vmatpush3.bf16.msra.mxu0 %v747_v5 }
  0x14   :  { %703 = vmatprep.subr.bf16.mxu0 %v748_v6 }
  0x17   :  { %704 = vmatpush3.bf16.msra.mxu0 %v748_v6 }
  0x18   :  { %705 = vmatprep.subr.bf16.mxu0 %v749_v7 }
  0x1b   :  { %706 = vmatpush3.bf16.msra.mxu0 %v749_v7 }
  0x1c   :  { %707 = vmatprep.subr.bf16.mxu0 %v750_v8 }
  0x1f   :  { %708 = vmatpush3.bf16.msra.mxu0 %v750_v8 }
  0x22   :  { %710 = vmatmul.mubr.bf16.vlgmr.msra.gmra.mrb[0].mxu0 %v752_v9 }
  0x23   :  { %713 = vmatprep.mubr.bf16.mxu0 %v753_v10 }
  0x2a   :  { %714 = vmatmul.mubr.bf16.gmra.mrb[4].mxu0 %v754_v11 }
  0x2b   :  { %717 = vmatprep.mubr.bf16.mxu0 %v755_v12 }
  0x32   :  { %718 = vmatmul.mubr.bf16.gmra.mrb[8].mxu0 %v756_v13 }
  0x33   :  { %721 = vmatprep.mubr.bf16.mxu0 %v757_v14 }
  0x3a   :  { %722 = vmatmul.mubr.bf16.gmra.mrb[12].mxu0 %v758_v15 }
  0xf5   :  { %v711_v17 = vpop.f32.mrb[0].mxu0 }
  0xf6   :  { %v183_v18 = vpop.f32.mrb[1].mxu0 }
  0xf7   :  { %v712_v19 = vpop.f32.mrb[2].mxu0 }
  0xf8   :  { %v247_v20 = vpack.c.bf16 %v712_v19, %v711_v17  ;;  %v186_v21 = vpop.f32.mrb[3].mxu0 }
  0xf9   :  { %v246_v22 = vpack.c.bf16 %v186_v21, %v183_v18 }
  0xfb   :  { %727 = vmatprep.mubr.msk.bf16.mxu1 %vm262_vm0, %v246_v22 }
  0xfc   :  { %728 = vmatmul.mubr.msk.bf16.vlgmr.msra.gmra.mrb[0].mxu1 %vm262_vm0, %v247_v20 }
  0xfd   :  { %v715_v23 = vpop.f32.mrb[4].mxu0 }
  0xfe   :  { %v199_v24 = vpop.f32.mrb[5].mxu0 }
  0xff   :  { %v716_v25 = vpop.f32.mrb[6].mxu0 }
 0x100   :  { %v249_v26 = vpack.c.bf16 %v716_v25, %v715_v23  ;;  %v202_v27 = vpop.f32.mrb[7].mxu0 }
 0x101   :  { %v248_v28 = vpack.c.bf16 %v202_v27, %v199_v24 }
 0x103   :  { %731 = vmatprep.mubr.msk.bf16.mxu1 %vm262_vm0, %v248_v28 }
 0x104   :  { %732 = vmatmul.mubr.msk.bf16.gmra.mrb[4].mxu1 %vm262_vm0, %v249_v26 }
 0x105   :  { %v719_v29 = vpop.f32.mrb[8].mxu0 }
 0x106   :  { %v215_v30 = vpop.f32.mrb[9].mxu0 }
 0x107   :  { %v720_v31 = vpop.f32.mrb[10].mxu0 }
 0x108   :  { %v251_v32 = vpack.c.bf16 %v720_v31, %v719_v29  ;;  %v218_v33 = vpop.f32.mrb[11].mxu0 }
 0x109   :  { %v250_v34 = vpack.c.bf16 %v218_v33, %v215_v30 }
 0x10b   :  { %735 = vmatprep.mubr.msk.bf16.mxu1 %vm262_vm0, %v250_v34 }
 0x10c   :  { %736 = vmatmul.mubr.msk.bf16.gmra.mrb[8].mxu1 %vm262_vm0, %v251_v32 }
 0x10d   :  { %v723_v35 = vpop.f32.mrb[12].mxu0 }
 0x10e   :  { %v231_v36 = vpop.f32.mrb[13].mxu0 }
 0x10f   :  { %v724_v37 = vpop.f32.mrb[14].mxu0 }
 0x110   :  { %v253_v38 = vpack.c.bf16 %v724_v37, %v723_v35  ;;  %v234_v39 = vpop.f32.mrb[15].mxu0 }
 0x111   :  { %v252_v40 = vpack.c.bf16 %v234_v39, %v231_v36 }
 0x113   :  { %739 = vmatprep.mubr.msk.bf16.mxu1 %vm262_vm0, %v252_v40 }
 0x114   :  { %740 = vmatmul.mubr.msk.bf16.gmra.mrb[12].mxu1 %vm262_vm0, %v253_v38 }
 0x1cf   :  { %v729_v42 = vpop.f32.mrb[0].mxu1 }
 0x1d0   :  { %v393_v44 = vmul.f32 %v729_v42, %v852_v41  ;;  %v321_v45 = vpop.f32.mrb[1].mxu1 }
 0x1d1   :  { %v391_v46 = vmul.f32 %v852_v41, %v321_v45  ;;  %v730_v47 = vpop.f32.mrb[2].mxu1 }
 0x1d2   :  { %v416_v48 = vadd.f32 %v857_v43, %v393_v44  ;;  %v394_v49 = vmul.f32 %v730_v47, %v852_v41  ;;  %v324_v50 = vpop.f32.mrb[3].mxu1 }
 0x1d3   :  { %v414_v51 = vadd.f32 %v857_v43, %v391_v46  ;;  %v392_v52 = vmul.f32 %v852_v41, %v324_v50 }
 0x1d4   :  { %v448_v53 = vmul.f32 0.01, %v416_v48  ;;  %v417_v54 = vadd.f32 %v857_v43, %v394_v49  ;;  %vm432_vm1 = vcmp.ge.f32.partialorder %v416_v48, 0.0 }
 0x1d5   :  { %v446_v55 = vmul.f32 0.01, %v414_v51  ;;  %v415_v56 = vadd.f32 %v857_v43, %v392_v52  ;;  %vm430_vm2 = vcmp.ge.f32.partialorder %v414_v51, 0.0 }
 0x1d6   :  { %vm433_vm3 = vcmp.ge.f32.partialorder %v417_v54, 0.0  ;;  %v449_v57 = vmul.f32 0.01, %v417_v54  ;;  %v464_v60 = vsel %vm432_vm1, %v416_v48, %v448_v53 }
 0x1d7   :  { %vm431_vm4 = vcmp.ge.f32.partialorder %v415_v56, 0.0  ;;  %v447_v58 = vmul.f32 0.01, %v415_v56  ;;  %v733_v59 = vpop.f32.mrb[4].mxu1  ;;  %v462_v0 = vsel %vm430_vm2, %v414_v51, %v446_v55 }
 0x1d8   :  { %v465_v61 = vsel %vm433_vm3, %v417_v54, %v449_v57  ;;  %v397_v62 = vmul.f32 %v733_v59, %v852_v41  ;;  %v337_v63 = vpop.f32.mrb[5].mxu1 }
 0x1d9   :  { %v629_v1 = vpack.c.bf16 %v465_v61, %v464_v60  ;;  %v463_v2 = vsel %vm431_vm4, %v415_v56, %v447_v58  ;;  %v395_v3 = vmul.f32 %v852_v41, %v337_v63  ;;  %v734_v4 = vpop.f32.mrb[6].mxu1 }
 0x1da   :  { %v624_v5 = vpack.c.bf16 %v463_v2, %v462_v0  ;;  %v420_v6 = vadd.f32 %v857_v43, %v397_v62  ;;  %v398_v7 = vmul.f32 %v734_v4, %v852_v41  ;;  %v340_v8 = vpop.f32.mrb[7].mxu1 }
 0x1db   :  { %661 = vst [vmem:[%s920_s5 + $0x8] sm:$0xff] %v629_v1   ;;  %v418_v9 = vadd.f32 %v857_v43, %v395_v3  ;;  %v396_v10 = vmul.f32 %v852_v41, %v340_v8 }
 0x1dc   :  { %625 = vst [vmem:[%s920_s5] sm:$0xff] %v624_v5   ;;  %v452_v11 = vmul.f32 0.01, %v420_v6  ;;  %v421_v12 = vadd.f32 %v857_v43, %v398_v7  ;;  %vm436_vm5 = vcmp.ge.f32.partialorder %v420_v6, 0.0 }
 0x1dd   :  { %v450_v13 = vmul.f32 0.01, %v418_v9  ;;  %v419_v14 = vadd.f32 %v857_v43, %v396_v10  ;;  %vm434_vm6 = vcmp.ge.f32.partialorder %v418_v9, 0.0 }
 0x1de   :  { %vm437_vm7 = vcmp.ge.f32.partialorder %v421_v12, 0.0  ;;  %v453_v15 = vmul.f32 0.01, %v421_v12  ;;  %v468_v18 = vsel %vm436_vm5, %v420_v6, %v452_v11 }
 0x1df   :  { %vm435_vm8 = vcmp.ge.f32.partialorder %v419_v14, 0.0  ;;  %v451_v16 = vmul.f32 0.01, %v419_v14  ;;  %v737_v17 = vpop.f32.mrb[8].mxu1  ;;  %v466_v22 = vsel %vm434_vm6, %v418_v9, %v450_v13 }
 0x1e0   :  { %v469_v19 = vsel %vm437_vm7, %v421_v12, %v453_v15  ;;  %v401_v20 = vmul.f32 %v737_v17, %v852_v41  ;;  %v353_v21 = vpop.f32.mrb[9].mxu1 }
 0x1e1   :  { %v639_v23 = vpack.c.bf16 %v469_v19, %v468_v18  ;;  %v467_v24 = vsel %vm435_vm8, %v419_v14, %v451_v16  ;;  %v399_v25 = vmul.f32 %v852_v41, %v353_v21  ;;  %v738_v26 = vpop.f32.mrb[10].mxu1 }
 0x1e2   :  { %v634_v27 = vpack.c.bf16 %v467_v24, %v466_v22  ;;  %v424_v28 = vadd.f32 %v857_v43, %v401_v20  ;;  %v402_v29 = vmul.f32 %v738_v26, %v852_v41  ;;  %v356_v30 = vpop.f32.mrb[11].mxu1 }
 0x1e3   :  { %663 = vst [vmem:[%s920_s5 + $0x18] sm:$0xff] %v639_v23   ;;  %v422_v31 = vadd.f32 %v857_v43, %v399_v25  ;;  %v400_v32 = vmul.f32 %v852_v41, %v356_v30 }
 0x1e4   :  { %662 = vst [vmem:[%s920_s5 + $0x10] sm:$0xff] %v634_v27   ;;  %v456_v33 = vmul.f32 0.01, %v424_v28  ;;  %v425_v34 = vadd.f32 %v857_v43, %v402_v29  ;;  %vm440_vm9 = vcmp.ge.f32.partialorder %v424_v28, 0.0 }
 0x1e5   :  { %v454_v35 = vmul.f32 0.01, %v422_v31  ;;  %v423_v36 = vadd.f32 %v857_v43, %v400_v32  ;;  %vm438_vm10 = vcmp.ge.f32.partialorder %v422_v31, 0.0 }
 0x1e6   :  { %vm441_vm11 = vcmp.ge.f32.partialorder %v425_v34, 0.0  ;;  %v457_v37 = vmul.f32 0.01, %v425_v34  ;;  %v472_v40 = vsel %vm440_vm9, %v424_v28, %v456_v33 }
 0x1e7   :  { %vm439_vm12 = vcmp.ge.f32.partialorder %v423_v36, 0.0  ;;  %v455_v38 = vmul.f32 0.01, %v423_v36  ;;  %v741_v39 = vpop.f32.mrb[12].mxu1  ;;  %v470_v46 = vsel %vm438_vm10, %v422_v31, %v454_v35 }
 0x1e8   :  { %v473_v42 = vsel %vm441_vm11, %v425_v34, %v457_v37  ;;  %v405_v44 = vmul.f32 %v741_v39, %v852_v41  ;;  %v369_v45 = vpop.f32.mrb[13].mxu1 }
 0x1e9   :  { %v649_v47 = vpack.c.bf16 %v473_v42, %v472_v40  ;;  %v471_v48 = vsel %vm439_vm12, %v423_v36, %v455_v38  ;;  %v403_v49 = vmul.f32 %v852_v41, %v369_v45  ;;  %v742_v50 = vpop.f32.mrb[14].mxu1 }
 0x1ea   :  { %v644_v51 = vpack.c.bf16 %v471_v48, %v470_v46  ;;  %v428_v52 = vadd.f32 %v857_v43, %v405_v44  ;;  %v406_v53 = vmul.f32 %v742_v50, %v852_v41  ;;  %v372_v54 = vpop.f32.mrb[15].mxu1 }
 0x1eb   :  { %665 = vst [vmem:[%s920_s5 + $0x28] sm:$0xff] %v649_v47   ;;  %v426_v55 = vadd.f32 %v857_v43, %v403_v49  ;;  %v404_v56 = vmul.f32 %v852_v41, %v372_v54 }
 0x1ec   :  { %664 = vst [vmem:[%s920_s5 + $0x20] sm:$0xff] %v644_v51   ;;  %v460_v57 = vmul.f32 0.01, %v428_v52  ;;  %v429_v58 = vadd.f32 %v857_v43, %v406_v53  ;;  %vm444_vm13 = vcmp.ge.f32.partialorder %v428_v52, 0.0 }
 0x1ed   :  { %v458_v59 = vmul.f32 0.01, %v426_v55  ;;  %v427_v60 = vadd.f32 %v857_v43, %v404_v56  ;;  %vm442_vm14 = vcmp.ge.f32.partialorder %v426_v55, 0.0 }
 0x1ee   :  { %vm445_vm15 = vcmp.ge.f32.partialorder %v429_v58, 0.0  ;;  %v461_v61 = vmul.f32 0.01, %v429_v58  ;;  %v476_v63 = vsel %vm444_vm13, %v428_v52, %v460_v57 }
 0x1ef   :  { %vm443_vm0 = vcmp.ge.f32.partialorder %v427_v60, 0.0  ;;  %v459_v62 = vmul.f32 0.01, %v427_v60  ;;  %v474_v1 = vsel %vm442_vm14, %v426_v55, %v458_v59 }
 0x1f0   :  { %v477_v0 = vsel %vm445_vm15, %v429_v58, %v461_v61 }
 0x1f1   :  { %v659_v41 = vpack.c.bf16 %v477_v0, %v476_v63  ;;  %v475_v2 = vsel %vm443_vm0, %v427_v60, %v459_v62 }
 0x1f2   :  { %v654_v3 = vpack.c.bf16 %v475_v2, %v474_v1 }
 0x1f3   :  { %667 = vst [vmem:[%s920_s5 + $0x38] sm:$0xff] %v659_v41  }
 0x1f4   :  { %666 = vst [vmem:[%s920_s5 + $0x30] sm:$0xff] %v654_v3  }

// kernel: gnn_forward.5
= control target key start
LH: loop header
LB: loop body
LE: loop exit
PB: predicated region body
PF: predicated region fallthrough
CT: control target
= control target key end

     0   :  { %v932_v32 = vmov 0   ;;  %v465_v57 = vlaneseq  ;;  %s1185_s1 = inlined_call_operand.vmem [shape: bf16[128,128], index: 1, kind: input, shape index: {}]   ;;  %s1186_s0 = inlined_call_operand.vmem [shape: bf16[128,128], index: 0, kind: input, shape index: {}]   ;;  %s1187_s2 = inlined_call_operand.vmem [shape: bf16[128,256], index: 2, kind: input, shape index: {}]   ;;  %s1188_s3 = inlined_call_operand.vmem [shape: f32[1,256], index: 3, kind: input, shape index: {}]   ;;  %s1189_s4 = inlined_call_operand.vmem [shape: f32[1,256], index: 4, kind: input, shape index: {}]   ;;  %s1190_s5 = inlined_call_operand.vmem [shape: bf16[128,256], index: 5, kind: output, shape index: {}]  }
   0x1   :  { %v892_v0 = vld [vmem:[%s1185_s1] sm:$0xff]   ;;  %v893_v1 = vld [vmem:[%s1185_s1 + $0x8] sm:$0xff]   ;;  %v894_v2 = vld [vmem:[%s1185_s1 + $0x10] sm:$0xff]   ;;  %402 = vmatprep.mubr.bf16.mxu1 %v932_v32 }
   0x2   :  { %843 = vmatprep.subr.bf16.mxu0 %v892_v0  ;;  %v895_v3 = vld [vmem:[%s1185_s1 + $0x18] sm:$0xff]   ;;  %v900_v4 = vld [vmem:[%s1186_s0] sm:$0xff]   ;;  %v897_v6 = vld [vmem:[%s1185_s1 + $0x28] sm:$0xff]   ;;  %v466_v58 = vshrl.u32 %v465_v57, 7 }
   0x3   :  { %844 = vmatpush3.bf16.msra.mxu0 %v892_v0  ;;  %859 = vmatprep.mubr.bf16.mxu0 %v900_v4  ;;  %v896_v5 = vld [vmem:[%s1185_s1 + $0x20] sm:$0xff]   ;;  %v913_v9 = vld [vmem:[%s1187_s2 + $0x14] ss:$8 sps:$4 sm:$0xff]   ;;  %v911_v11 = vld [vmem:[%s1187_s2 + $0x10] ss:$8 sps:$4 sm:$0xff]  }
   0x4   :  { %845 = vmatprep.subr.bf16.mxu0 %v893_v1  ;;  %v910_v7 = vld [vmem:[%s1187_s2 + $0x4] ss:$8 sps:$4 sm:$0xff]   ;;  %v908_v8 = vld [vmem:[%s1187_s2] ss:$8 sps:$4 sm:$0xff]   ;;  %v898_v10 = vld [vmem:[%s1185_s1 + $0x30] sm:$0xff]   ;;  %v467_v59 = vsub.s32 0, %v466_v58 }
   0x5   :  { %875 = vmatprep.subr.bf16.mxu1 %v910_v7  ;;  %v916_v12 = vld [vmem:[%s1187_s2 + $0x24] ss:$8 sps:$4 sm:$0xff]   ;;  %v899_v13 = vld [vmem:[%s1185_s1 + $0x38] sm:$0xff]   ;;  %v914_v14 = vld [vmem:[%s1187_s2 + $0x20] ss:$8 sps:$4 sm:$0xff]   ;;  %v471_v61 = vsub.s32 1, %v466_v58 }
   0x6   :  { %883 = vmatpush1.bf16.msra.mxu1 %v908_v8  ;;  %v919_v15 = vld [vmem:[%s1187_s2 + $0x34] ss:$8 sps:$4 sm:$0xff]   ;;  %v901_v16 = vld [vmem:[%s1186_s0 + $0x8] sm:$0xff]   ;;  %v917_v17 = vld [vmem:[%s1187_s2 + $0x30] ss:$8 sps:$4 sm:$0xff]  }
   0x7   :  { %846 = vmatpush3.bf16.msra.mxu0 %v893_v1  ;;  %876 = vmatprep.subr.bf16.mxu1 %v913_v9  ;;  %v902_v18 = vld [vmem:[%s1186_s0 + $0x10] sm:$0xff]   ;;  %v922_v19 = vld [vmem:[%s1187_s2 + $0x44] ss:$8 sps:$4 sm:$0xff]   ;;  %v920_v20 = vld [vmem:[%s1187_s2 + $0x40] ss:$8 sps:$4 sm:$0xff]  }
   0x8   :  { %847 = vmatprep.subr.bf16.mxu0 %v894_v2  ;;  %v925_v21 = vld [vmem:[%s1187_s2 + $0x54] ss:$8 sps:$4 sm:$0xff]   ;;  %v923_v23 = vld [vmem:[%s1187_s2 + $0x50] ss:$8 sps:$4 sm:$0xff]   ;;  %v904_v24 = vld [vmem:[%s1186_s0 + $0x20] sm:$0xff]  }
   0x9   :  { %v903_v22 = vld [vmem:[%s1186_s0 + $0x18] sm:$0xff]   ;;  %v928_v25 = vld [vmem:[%s1187_s2 + $0x64] ss:$8 sps:$4 sm:$0xff]   ;;  %v926_v26 = vld [vmem:[%s1187_s2 + $0x60] ss:$8 sps:$4 sm:$0xff]  }
   0xa   :  { %884 = vmatpush1.bf16.msra.mxu1 %v911_v11  ;;  %v905_v27 = vld [vmem:[%s1186_s0 + $0x28] sm:$0xff]   ;;  %v906_v28 = vld [vmem:[%s1186_s0 + $0x30] sm:$0xff]   ;;  %v907_v29 = vld [vmem:[%s1186_s0 + $0x38] sm:$0xff]  }
   0xb   :  { %848 = vmatpush3.bf16.msra.mxu0 %v894_v2  ;;  %877 = vmatprep.subr.bf16.mxu1 %v916_v12  ;;  %v931_v30 = vld [vmem:[%s1187_s2 + $0x74] ss:$8 sps:$4 sm:$0xff]   ;;  %v929_v31 = vld [vmem:[%s1187_s2 + $0x70] ss:$8 sps:$4 sm:$0xff]   ;;  %v463_v60 = vld [vmem:[%s1188_s3] sm:$0x3] }
   0xc   :  { %849 = vmatprep.subr.bf16.mxu0 %v895_v3  ;;  %v507_v62 = vld [vmem:[%s1189_s4] sm:$0x3]  ;;  %v1065_v63 = vrot.slane %v463_v60, %v467_v59  ;;  %v1067_v0 = vrot.slane %v463_v60, %v471_v61 }
   0xd   :  { %v1069_v1 = vrot.slane %v507_v62, %v467_v59 }
   0xe   :  { %885 = vmatpush1.bf16.msra.mxu1 %v914_v14 }
   0xf   :  { %850 = vmatpush3.bf16.msra.mxu0 %v895_v3  ;;  %878 = vmatprep.subr.bf16.mxu1 %v919_v15  ;;  %v1071_v3 = vrot.slane %v507_v62, %v471_v61 }
  0x10   :  { %851 = vmatprep.subr.bf16.mxu0 %v896_v5 }
  0x12   :  { %886 = vmatpush1.bf16.msra.mxu1 %v917_v17 }
  0x13   :  { %852 = vmatpush3.bf16.msra.mxu0 %v896_v5  ;;  %879 = vmatprep.subr.bf16.mxu1 %v922_v19 }
  0x14   :  { %853 = vmatprep.subr.bf16.mxu0 %v897_v6 }
  0x16   :  { %887 = vmatpush1.bf16.msra.mxu1 %v920_v20 }
  0x17   :  { %854 = vmatpush3.bf16.msra.mxu0 %v897_v6  ;;  %880 = vmatprep.subr.bf16.mxu1 %v925_v21 }
  0x18   :  { %855 = vmatprep.subr.bf16.mxu0 %v898_v10 }
  0x1a   :  { %888 = vmatpush1.bf16.msra.mxu1 %v923_v23 }
  0x1b   :  { %856 = vmatpush3.bf16.msra.mxu0 %v898_v10  ;;  %881 = vmatprep.subr.bf16.mxu1 %v928_v25 }
  0x1c   :  { %857 = vmatprep.subr.bf16.mxu0 %v899_v13 }
  0x1e   :  { %889 = vmatpush1.bf16.msra.mxu1 %v926_v26 }
  0x1f   :  { %858 = vmatpush3.bf16.msra.mxu0 %v899_v13  ;;  %882 = vmatprep.subr.bf16.mxu1 %v931_v30 }
  0x20   :  { %350 = vmatprep.subr.bf16.mxu0 %v910_v7 }
  0x22   :  { %860 = vmatmul.mubr.bf16.vlgmr.msra.gmra.mrb[0].mxu0 %v901_v16  ;;  %890 = vmatpush1.bf16.msra.mxu1 %v929_v31 }
  0x23   :  { %863 = vmatprep.mubr.bf16.mxu0 %v902_v18  ;;  %351 = vmatpush1.bf16.msra.mxu0 %v908_v8 }
  0x24   :  { %352 = vmatprep.subr.bf16.mxu0 %v913_v9 }
  0x27   :  { %353 = vmatpush1.bf16.msra.mxu0 %v911_v11 }
  0x28   :  { %354 = vmatprep.subr.bf16.mxu0 %v916_v12 }
  0x2a   :  { %864 = vmatmul.mubr.bf16.gmra.mrb[4].mxu0 %v903_v22 }
  0x2b   :  { %867 = vmatprep.mubr.bf16.mxu0 %v904_v24  ;;  %355 = vmatpush1.bf16.msra.mxu0 %v914_v14 }
  0x2c   :  { %356 = vmatprep.subr.bf16.mxu0 %v919_v15 }
  0x2f   :  { %357 = vmatpush1.bf16.msra.mxu0 %v917_v17 }
  0x30   :  { %358 = vmatprep.subr.bf16.mxu0 %v922_v19 }
  0x32   :  { %868 = vmatmul.mubr.bf16.gmra.mrb[8].mxu0 %v905_v27 }
  0x33   :  { %871 = vmatprep.mubr.bf16.mxu0 %v906_v28  ;;  %359 = vmatpush1.bf16.msra.mxu0 %v920_v20 }
  0x34   :  { %360 = vmatprep.subr.bf16.mxu0 %v925_v21 }
  0x37   :  { %361 = vmatpush1.bf16.msra.mxu0 %v923_v23 }
  0x38   :  { %362 = vmatprep.subr.bf16.mxu0 %v928_v25 }
  0x3a   :  { %872 = vmatmul.mubr.bf16.gmra.mrb[12].mxu0 %v907_v29 }
  0x3b   :  { %363 = vmatpush1.bf16.msra.mxu0 %v926_v26  ;;  %382 = vmatprep.mubr.bf16.mxu0 %v932_v32 }
  0x3c   :  { %364 = vmatprep.subr.bf16.mxu0 %v931_v30 }
  0x3f   :  { %365 = vmatpush1.bf16.msra.mxu0 %v929_v31 }
  0xf5   :  { %v861_v33 = vpop.f32.mrb[0].mxu0 }
  0xf6   :  { %v183_v34 = vpop.f32.mrb[1].mxu0 }
  0xf7   :  { %v862_v35 = vpop.f32.mrb[2].mxu0 }
  0xf8   :  { %v247_v36 = vpack.c.bf16 %v862_v35, %v861_v33  ;;  %v186_v37 = vpop.f32.mrb[3].mxu0 }
  0xf9   :  { %v246_v38 = vpack.c.bf16 %v186_v37, %v183_v34 }
  0xfb   :  { %383 = vmatmul.mubr.bf16.vlgmr.msra.gmra.mrb[16].mxu0 %v246_v38 }
  0xfc   :  { %392 = vmatprep.mubr.bf16.mxu0 %v932_v32 }
  0xfd   :  { %v865_v39 = vpop.f32.mrb[4].mxu0 }
  0xfe   :  { %v199_v40 = vpop.f32.mrb[5].mxu0 }
  0xff   :  { %v866_v41 = vpop.f32.mrb[6].mxu0 }
 0x100   :  { %v249_v42 = vpack.c.bf16 %v866_v41, %v865_v39  ;;  %v202_v43 = vpop.f32.mrb[7].mxu0 }
 0x101   :  { %v248_v44 = vpack.c.bf16 %v202_v43, %v199_v40 }
 0x103   :  { %393 = vmatmul.mubr.bf16.gmra.mrb[20].mxu0 %v247_v36  ;;  %403 = vmatmul.mubr.bf16.vlgmr.msra.gmra.mrb[0].mxu1 %v248_v44 }
 0x104   :  { %412 = vmatprep.mubr.bf16.mxu1 %v932_v32 }
 0x105   :  { %v869_v45 = vpop.f32.mrb[8].mxu0 }
 0x106   :  { %v215_v46 = vpop.f32.mrb[9].mxu0 }
 0x107   :  { %v870_v47 = vpop.f32.mrb[10].mxu0 }
 0x108   :  { %v251_v48 = vpack.c.bf16 %v870_v47, %v869_v45  ;;  %v218_v49 = vpop.f32.mrb[11].mxu0 }
 0x109   :  { %v250_v50 = vpack.c.bf16 %v218_v49, %v215_v46 }
 0x10b   :  { %413 = vmatmul.mubr.bf16.gmra.mrb[4].mxu1 %v249_v42 }
 0x10c   :  { %422 = vmatprep.mubr.bf16.mxu1 %v932_v32 }
 0x10d   :  { %v873_v51 = vpop.f32.mrb[12].mxu0 }
 0x10e   :  { %v231_v52 = vpop.f32.mrb[13].mxu0 }
 0x10f   :  { %v874_v53 = vpop.f32.mrb[14].mxu0 }
 0x110   :  { %v253_v54 = vpack.c.bf16 %v874_v53, %v873_v51  ;;  %v234_v55 = vpop.f32.mrb[15].mxu0 }
 0x111   :  { %v252_v56 = vpack.c.bf16 %v234_v55, %v231_v52 }
 0x113   :  { %423 = vmatmul.mubr.bf16.gmra.mrb[8].mxu1 %v250_v50 }
 0x114   :  { %432 = vmatprep.mubr.bf16.mxu1 %v932_v32 }
 0x11b   :  { %433 = vmatmul.mubr.bf16.gmra.mrb[12].mxu1 %v251_v48 }
 0x11c   :  { %442 = vmatprep.mubr.bf16.mxu1 %v932_v32 }
 0x123   :  { %443 = vmatmul.mubr.bf16.gmra.mrb[16].mxu1 %v252_v56 }
 0x124   :  { %452 = vmatprep.mubr.bf16.mxu1 %v932_v32 }
 0x12b   :  { %453 = vmatmul.mubr.bf16.gmra.mrb[20].mxu1 %v253_v54 }
 0x1ce   :  { %v384_v2 = vpop.f32.mrb[16].mxu0 }
 0x1cf   :  { %v475_v4 = vmul.f32 %v1065_v63, %v384_v2  ;;  %v386_v5 = vpop.f32.mrb[17].mxu0 }
 0x1d0   :  { %v476_v6 = vmul.f32 %v1067_v0, %v386_v5  ;;  %v388_v7 = vpop.f32.mrb[18].mxu0 }
 0x1d1   :  { %v519_v8 = vadd.f32 %v1069_v1, %v475_v4  ;;  %v477_v9 = vmul.f32 %v1065_v63, %v388_v7  ;;  %v390_v10 = vpop.f32.mrb[19].mxu0 }
 0x1d2   :  { %v520_v11 = vadd.f32 %v1071_v3, %v476_v6  ;;  %v478_v12 = vmul.f32 %v1067_v0, %v390_v10 }
 0x1d3   :  { %vm551_vm0 = vcmp.ge.f32.partialorder %v519_v8, 0.0  ;;  %v583_v13 = vmul.f32 0.01, %v519_v8  ;;  %v521_v14 = vadd.f32 %v1069_v1, %v477_v9 }
 0x1d4   :  { %vm552_vm1 = vcmp.ge.f32.partialorder %v520_v11, 0.0  ;;  %v584_v15 = vmul.f32 0.01, %v520_v11  ;;  %v522_v16 = vadd.f32 %v1071_v3, %v478_v12 }
 0x1d5   :  { %v615_v17 = vsel %vm551_vm0, %v519_v8, %v583_v13  ;;  %vm553_vm2 = vcmp.ge.f32.partialorder %v521_v14, 0.0  ;;  %v585_v18 = vmul.f32 0.01, %v521_v14 }
 0x1d6   :  { %v616_v19 = vsel %vm552_vm1, %v520_v11, %v584_v15  ;;  %vm554_vm3 = vcmp.ge.f32.partialorder %v522_v16, 0.0  ;;  %v586_v20 = vmul.f32 0.01, %v522_v16  ;;  %v394_v21 = vpop.f32.mrb[20].mxu0  ;;  %v404_v22 = vpop.f32.mrb[0].mxu1 }
 0x1d7   :  { %v811_v23 = vpack.c.bf16 %v616_v19, %v615_v17  ;;  %v617_v24 = vsel %vm553_vm2, %v521_v14, %v585_v18  ;;  %v479_v25 = vmul.f32 %v1065_v63, %v394_v21  ;;  %v483_v26 = vmul.f32 %v1065_v63, %v404_v22  ;;  %v396_v27 = vpop.f32.mrb[21].mxu0  ;;  %v406_v28 = vpop.f32.mrb[1].mxu1 }
 0x1d8   :  { %v618_v29 = vsel %vm554_vm3, %v522_v16, %v586_v20  ;;  %v480_v30 = vmul.f32 %v1067_v0, %v396_v27  ;;  %v484_v31 = vmul.f32 %v1067_v0, %v406_v28  ;;  %v398_v32 = vpop.f32.mrb[22].mxu0  ;;  %v408_v33 = vpop.f32.mrb[2].mxu1 }
 0x1d9   :  { %743 = vst [vmem:[%s1190_s5] sm:$0xff] %v811_v23  ;;  %v812_v34 = vpack.c.bf16 %v618_v29, %v617_v24  ;;  %v523_v35 = vadd.f32 %v1069_v1, %v479_v25  ;;  %v527_v36 = vadd.f32 %v1069_v1, %v483_v26  ;;  %v481_v37 = vmul.f32 %v1065_v63, %v398_v32  ;;  %v400_v38 = vpop.f32.mrb[23].mxu0  ;;  %v410_v39 = vpop.f32.mrb[3].mxu1 }
 0x1da   :  { %v524_v40 = vadd.f32 %v1071_v3, %v480_v30  ;;  %v528_v41 = vadd.f32 %v1071_v3, %v484_v31  ;;  %v485_v42 = vmul.f32 %v1065_v63, %v408_v33  ;;  %v482_v43 = vmul.f32 %v1067_v0, %v400_v38 }
 0x1db   :  { %744 = vst [vmem:[%s1190_s5 + $0x8] sm:$0xff] %v812_v34  ;;  %vm555_vm4 = vcmp.ge.f32.partialorder %v523_v35, 0.0  ;;  %v587_v44 = vmul.f32 0.01, %v523_v35  ;;  %vm559_vm5 = vcmp.ge.f32.partialorder %v527_v36, 0.0  ;;  %v525_v50 = vadd.f32 %v1069_v1, %v481_v37 }
 0x1dc   :  { %v591_v45 = vmul.f32 0.01, %v527_v36  ;;  %vm556_vm6 = vcmp.ge.f32.partialorder %v524_v40, 0.0  ;;  %v588_v46 = vmul.f32 0.01, %v524_v40  ;;  %vm560_vm7 = vcmp.ge.f32.partialorder %v528_v41, 0.0 }
 0x1dd   :  { %v592_v47 = vmul.f32 0.01, %v528_v41  ;;  %v619_v48 = vsel %vm555_vm4, %v523_v35, %v587_v44  ;;  %v529_v51 = vadd.f32 %v1069_v1, %v485_v42  ;;  %v526_v54 = vadd.f32 %v1071_v3, %v482_v43 }
 0x1de   :  { %v623_v49 = vsel %vm559_vm5, %v527_v36, %v591_v45  ;;  %v620_v52 = vsel %vm556_vm6, %v524_v40, %v588_v46  ;;  %v486_v55 = vmul.f32 %v1067_v0, %v410_v39  ;;  %v414_v56 = vpop.f32.mrb[4].mxu1  ;;  %vm557_vm8 = vcmp.ge.f32.partialorder %v525_v50, 0.0 }
 0x1df   :  { %v624_v53 = vsel %vm560_vm7, %v528_v41, %v592_v47  ;;  %v813_v57 = vpack.c.bf16 %v620_v52, %v619_v48  ;;  %v589_v59 = vmul.f32 0.01, %v525_v50  ;;  %v416_v60 = vpop.f32.mrb[5].mxu1  ;;  %vm561_vm9 = vcmp.ge.f32.partialorder %v529_v51, 0.0 }
 0x1e0   :  { %v815_v58 = vpack.c.bf16 %v624_v53, %v623_v49  ;;  %v593_v61 = vmul.f32 0.01, %v529_v51  ;;  %vm558_vm10 = vcmp.ge.f32.partialorder %v526_v54, 0.0  ;;  %v590_v62 = vmul.f32 0.01, %v526_v54  ;;  %v418_v7 = vpop.f32.mrb[6].mxu1 }
 0x1e1   :  { %745 = vst [vmem:[%s1190_s5 + $0x10] sm:$0xff] %v813_v57  ;;  %v621_v2 = vsel %vm557_vm8, %v525_v50, %v589_v59  ;;  %v530_v4 = vadd.f32 %v1071_v3, %v486_v55  ;;  %v487_v5 = vmul.f32 %v1065_v63, %v414_v56  ;;  %v488_v6 = vmul.f32 %v1067_v0, %v416_v60  ;;  %v420_v11 = vpop.f32.mrb[7].mxu1 }
 0x1e2   :  { %747 = vst [vmem:[%s1190_s5 + $0x20] sm:$0xff] %v815_v58  ;;  %v625_v8 = vsel %vm561_vm9, %v529_v51, %v593_v61  ;;  %v622_v9 = vsel %vm558_vm10, %v526_v54, %v590_v62  ;;  %v489_v10 = vmul.f32 %v1065_v63, %v418_v7  ;;  %v490_v17 = vmul.f32 %v1067_v0, %v420_v11 }
 0x1e3   :  { %v814_v12 = vpack.c.bf16 %v622_v9, %v621_v2  ;;  %vm562_vm11 = vcmp.ge.f32.partialorder %v530_v4, 0.0  ;;  %v594_v13 = vmul.f32 0.01, %v530_v4  ;;  %v531_v14 = vadd.f32 %v1069_v1, %v487_v5 }
 0x1e4   :  { %v532_v15 = vadd.f32 %v1071_v3, %v488_v6  ;;  %v533_v16 = vadd.f32 %v1069_v1, %v489_v10  ;;  %v534_v25 = vadd.f32 %v1071_v3, %v490_v17 }
 0x1e5   :  { %746 = vst [vmem:[%s1190_s5 + $0x18] sm:$0xff] %v814_v12  ;;  %v626_v18 = vsel %vm562_vm11, %v530_v4, %v594_v13  ;;  %vm563_vm12 = vcmp.ge.f32.partialorder %v531_v14, 0.0  ;;  %v595_v19 = vmul.f32 0.01, %v531_v14 }
 0x1e6   :  { %v816_v20 = vpack.c.bf16 %v626_v18, %v625_v8  ;;  %vm564_vm13 = vcmp.ge.f32.partialorder %v532_v15, 0.0  ;;  %v596_v21 = vmul.f32 0.01, %v532_v15  ;;  %vm565_vm14 = vcmp.ge.f32.partialorder %v533_v16, 0.0  ;;  %v424_v22 = vpop.f32.mrb[8].mxu1 }
 0x1e7   :  { %v627_v23 = vsel %vm563_vm12, %v531_v14, %v595_v19  ;;  %v597_v24 = vmul.f32 0.01, %v533_v16  ;;  %v491_v26 = vmul.f32 %v1065_v63, %v424_v22  ;;  %v426_v27 = vpop.f32.mrb[9].mxu1  ;;  %vm566_vm15 = vcmp.ge.f32.partialorder %v534_v25, 0.0 }
 0x1e8   :  { %748 = vst [vmem:[%s1190_s5 + $0x28] sm:$0xff] %v816_v20  ;;  %v628_v28 = vsel %vm564_vm13, %v532_v15, %v596_v21  ;;  %v492_v29 = vmul.f32 %v1067_v0, %v426_v27  ;;  %v428_v30 = vpop.f32.mrb[10].mxu1  ;;  %v598_v33 = vmul.f32 0.01, %v534_v25 }
 0x1e9   :  { %v817_v31 = vpack.c.bf16 %v628_v28, %v627_v23  ;;  %v629_v32 = vsel %vm565_vm14, %v533_v16, %v597_v24  ;;  %v430_v34 = vpop.f32.mrb[11].mxu1  ;;  %v535_v35 = vadd.f32 %v1069_v1, %v491_v26  ;;  %v493_v37 = vmul.f32 %v1065_v63, %v428_v30 }
 0x1ea   :  { %v536_v36 = vadd.f32 %v1071_v3, %v492_v29  ;;  %v494_v38 = vmul.f32 %v1067_v0, %v430_v34  ;;  %v630_v39 = vsel %vm566_vm15, %v534_v25, %v598_v33 }
 0x1eb   :  { %749 = vst [vmem:[%s1190_s5 + $0x30] sm:$0xff] %v817_v31  ;;  %v818_v40 = vpack.c.bf16 %v630_v39, %v629_v32  ;;  %vm567_vm0 = vcmp.ge.f32.partialorder %v535_v35, 0.0  ;;  %v599_v41 = vmul.f32 0.01, %v535_v35  ;;  %v537_v43 = vadd.f32 %v1069_v1, %v493_v37 }
 0x1ec   :  { %vm568_vm1 = vcmp.ge.f32.partialorder %v536_v36, 0.0  ;;  %v600_v42 = vmul.f32 0.01, %v536_v36  ;;  %v538_v44 = vadd.f32 %v1071_v3, %v494_v38 }
 0x1ed   :  { %750 = vst [vmem:[%s1190_s5 + $0x38] sm:$0xff] %v818_v40  ;;  %v631_v45 = vsel %vm567_vm0, %v535_v35, %v599_v41  ;;  %vm569_vm2 = vcmp.ge.f32.partialorder %v537_v43, 0.0  ;;  %v601_v48 = vmul.f32 0.01, %v537_v43 }
 0x1ee   :  { %v434_v46 = vpop.f32.mrb[12].mxu1  ;;  %v632_v47 = vsel %vm568_vm1, %v536_v36, %v600_v42  ;;  %vm570_vm3 = vcmp.ge.f32.partialorder %v538_v44, 0.0  ;;  %v602_v51 = vmul.f32 0.01, %v538_v44 }
 0x1ef   :  { %v436_v49 = vpop.f32.mrb[13].mxu1  ;;  %v819_v50 = vpack.c.bf16 %v632_v47, %v631_v45  ;;  %v495_v52 = vmul.f32 %v1065_v63, %v434_v46  ;;  %v633_v55 = vsel %vm569_vm2, %v537_v43, %v601_v48 }
 0x1f0   :  { %v496_v53 = vmul.f32 %v1067_v0, %v436_v49  ;;  %v438_v54 = vpop.f32.mrb[14].mxu1  ;;  %v634_v58 = vsel %vm570_vm3, %v538_v44, %v602_v51 }
 0x1f1   :  { %v497_v56 = vmul.f32 %v1065_v63, %v438_v54  ;;  %v440_v57 = vpop.f32.mrb[15].mxu1  ;;  %751 = vst [vmem:[%s1190_s5 + $0x40] sm:$0xff] %v819_v50  ;;  %v539_v59 = vadd.f32 %v1069_v1, %v495_v52  ;;  %v820_v62 = vpack.c.bf16 %v634_v58, %v633_v55 }
 0x1f2   :  { %v540_v60 = vadd.f32 %v1071_v3, %v496_v53  ;;  %v498_v61 = vmul.f32 %v1067_v0, %v440_v57 }
 0x1f3   :  { %v541_v2 = vadd.f32 %v1069_v1, %v497_v56  ;;  %vm571_vm4 = vcmp.ge.f32.partialorder %v539_v59, 0.0  ;;  %v603_v4 = vmul.f32 0.01, %v539_v59  ;;  %752 = vst [vmem:[%s1190_s5 + $0x48] sm:$0xff] %v820_v62 }
 0x1f4   :  { %vm572_vm5 = vcmp.ge.f32.partialorder %v540_v60, 0.0  ;;  %v604_v5 = vmul.f32 0.01, %v540_v60  ;;  %v542_v7 = vadd.f32 %v1071_v3, %v498_v61 }
 0x1f5   :  { %vm573_vm6 = vcmp.ge.f32.partialorder %v541_v2, 0.0  ;;  %v605_v6 = vmul.f32 0.01, %v541_v2  ;;  %v635_v8 = vsel %vm571_vm4, %v539_v59, %v603_v4 }
 0x1f6   :  { %v636_v9 = vsel %vm572_vm5, %v540_v60, %v604_v5  ;;  %v444_v10 = vpop.f32.mrb[16].mxu1  ;;  %vm574_vm7 = vcmp.ge.f32.partialorder %v542_v7, 0.0  ;;  %v606_v13 = vmul.f32 0.01, %v542_v7 }
 0x1f7   :  { %v821_v11 = vpack.c.bf16 %v636_v9, %v635_v8  ;;  %v637_v12 = vsel %vm573_vm6, %v541_v2, %v605_v6  ;;  %v446_v14 = vpop.f32.mrb[17].mxu1  ;;  %v499_v15 = vmul.f32 %v1065_v63, %v444_v10 }
 0x1f8   :  { %v500_v16 = vmul.f32 %v1067_v0, %v446_v14  ;;  %v448_v17 = vpop.f32.mrb[18].mxu1  ;;  %v638_v18 = vsel %vm574_vm7, %v542_v7, %v606_v13 }
 0x1f9   :  { %753 = vst [vmem:[%s1190_s5 + $0x50] sm:$0xff] %v821_v11  ;;  %v501_v19 = vmul.f32 %v1065_v63, %v448_v17  ;;  %v450_v20 = vpop.f32.mrb[19].mxu1  ;;  %v822_v21 = vpack.c.bf16 %v638_v18, %v637_v12  ;;  %v543_v22 = vadd.f32 %v1069_v1, %v499_v15 }
 0x1fa   :  { %v544_v23 = vadd.f32 %v1071_v3, %v500_v16  ;;  %v502_v24 = vmul.f32 %v1067_v0, %v450_v20 }
 0x1fb   :  { %v545_v25 = vadd.f32 %v1069_v1, %v501_v19  ;;  %754 = vst [vmem:[%s1190_s5 + $0x58] sm:$0xff] %v822_v21  ;;  %vm575_vm8 = vcmp.ge.f32.partialorder %v543_v22, 0.0  ;;  %v607_v26 = vmul.f32 0.01, %v543_v22 }
 0x1fc   :  { %vm576_vm9 = vcmp.ge.f32.partialorder %v544_v23, 0.0  ;;  %v608_v27 = vmul.f32 0.01, %v544_v23  ;;  %v546_v29 = vadd.f32 %v1071_v3, %v502_v24 }
 0x1fd   :  { %vm577_vm10 = vcmp.ge.f32.partialorder %v545_v25, 0.0  ;;  %v609_v28 = vmul.f32 0.01, %v545_v25  ;;  %v639_v30 = vsel %vm575_vm8, %v543_v22, %v607_v26 }
 0x1fe   :  { %v640_v31 = vsel %vm576_vm9, %v544_v23, %v608_v27  ;;  %v454_v32 = vpop.f32.mrb[20].mxu1  ;;  %vm578_vm11 = vcmp.ge.f32.partialorder %v546_v29, 0.0  ;;  %v610_v35 = vmul.f32 0.01, %v546_v29 }
 0x1ff   :  { %v823_v33 = vpack.c.bf16 %v640_v31, %v639_v30  ;;  %v641_v34 = vsel %vm577_vm10, %v545_v25, %v609_v28  ;;  %v456_v36 = vpop.f32.mrb[21].mxu1  ;;  %v503_v37 = vmul.f32 %v1065_v63, %v454_v32 }
 0x200   :  { %v504_v38 = vmul.f32 %v1067_v0, %v456_v36  ;;  %v458_v39 = vpop.f32.mrb[22].mxu1  ;;  %v642_v40 = vsel %vm578_vm11, %v546_v29, %v610_v35 }
 0x201   :  { %755 = vst [vmem:[%s1190_s5 + $0x60] sm:$0xff] %v823_v33  ;;  %v505_v41 = vmul.f32 %v1065_v63, %v458_v39  ;;  %v460_v42 = vpop.f32.mrb[23].mxu1  ;;  %v824_v43 = vpack.c.bf16 %v642_v40, %v641_v34  ;;  %v547_v44 = vadd.f32 %v1069_v1, %v503_v37 }
 0x202   :  { %v548_v45 = vadd.f32 %v1071_v3, %v504_v38  ;;  %v506_v46 = vmul.f32 %v1067_v0, %v460_v42 }
 0x203   :  { %v549_v47 = vadd.f32 %v1069_v1, %v505_v41  ;;  %756 = vst [vmem:[%s1190_s5 + $0x68] sm:$0xff] %v824_v43  ;;  %vm579_vm12 = vcmp.ge.f32.partialorder %v547_v44, 0.0  ;;  %v611_v48 = vmul.f32 0.01, %v547_v44 }
 0x204   :  { %vm580_vm13 = vcmp.ge.f32.partialorder %v548_v45, 0.0  ;;  %v612_v49 = vmul.f32 0.01, %v548_v45  ;;  %v550_v50 = vadd.f32 %v1071_v3, %v506_v46 }
 0x205   :  { %vm581_vm14 = vcmp.ge.f32.partialorder %v549_v47, 0.0  ;;  %v613_v63 = vmul.f32 0.01, %v549_v47  ;;  %v643_v51 = vsel %vm579_vm12, %v547_v44, %v611_v48 }
 0x206   :  { %v644_v52 = vsel %vm580_vm13, %v548_v45, %v612_v49  ;;  %vm582_vm15 = vcmp.ge.f32.partialorder %v550_v50, 0.0  ;;  %v614_v0 = vmul.f32 0.01, %v550_v50 }
 0x207   :  { %v825_v53 = vpack.c.bf16 %v644_v52, %v643_v51  ;;  %v645_v54 = vsel %vm581_vm14, %v549_v47, %v613_v63 }
 0x208   :  { %v646_v1 = vsel %vm582_vm15, %v550_v50, %v614_v0 }
 0x209   :  { %757 = vst [vmem:[%s1190_s5 + $0x70] sm:$0xff] %v825_v53  ;;  %v826_v55 = vpack.c.bf16 %v646_v1, %v645_v54 }
 0x20b   :  { %758 = vst [vmem:[%s1190_s5 + $0x78] sm:$0xff] %v826_v55 }

// kernel: gnn_forward.6
= control target key start
LH: loop header
LB: loop body
LE: loop exit
PB: predicated region body
PF: predicated region fallthrough
CT: control target
= control target key end

     0   :  { %v3549_v1 = vmov 0   ;;  %s5443_s1 = inlined_call_operand.vmem [shape: bf16[128,256], index: 1, kind: input, shape index: {}]   ;;  %s5444_s0 = inlined_call_operand.vmem [shape: bf16[128,128], index: 0, kind: input, shape index: {}]   ;;  %s5445_s2 = inlined_call_operand.vmem [shape: bf16[256,512], index: 2, kind: input, shape index: {}]   ;;  %s5446_s5 = inlined_call_operand.vmem [shape: bf16[512,256], index: 5, kind: input, shape index: {}]   ;;  %s5447_s6 = inlined_call_operand.vmem [shape: bf16[512,256], index: 6, kind: input, shape index: {}]   ;;  %s5448_s3 = inlined_call_operand.vmem [shape: f32[1,512], index: 3, kind: input, shape index: {}]   ;;  %s5449_s4 = inlined_call_operand.vmem [shape: f32[1,512], index: 4, kind: input, shape index: {}]   ;;  %s5450_s7 = inlined_call_operand.vmem [shape: f32[128,512], index: 7, kind: output, shape index: {0}]   ;;  %s5451_s8 = inlined_call_operand.vmem [shape: bf16[128,256], index: 8, kind: output, shape index: {1}]   ;;  %s5452_s9 = inlined_call_operand.vmem [shape: bf16[128,256], index: 9, kind: output, shape index: {2}]  }
   0x1   :  { %v3222_v0 = vld [vmem:[%s5443_s1 + $0x4] ss:$8 sps:$4 sm:$0xff]   ;;  %222 = vmatprep.mubr.bf16.mxu0 %v3549_v1  ;;  %v3224_v2 = vld [vmem:[%s5443_s1] ss:$8 sps:$4 sm:$0xff]   ;;  %v3225_v3 = vld [vmem:[%s5443_s1 + $0x14] ss:$8 sps:$4 sm:$0xff]  }
   0x2   :  { %190 = vmatprep.subr.bf16.mxu0 %v3222_v0  ;;  %v3227_v4 = vld [vmem:[%s5443_s1 + $0x10] ss:$8 sps:$4 sm:$0xff]   ;;  %v3228_v5 = vld [vmem:[%s5443_s1 + $0x24] ss:$8 sps:$4 sm:$0xff]   ;;  %v3230_v6 = vld [vmem:[%s5443_s1 + $0x20] ss:$8 sps:$4 sm:$0xff]  }
   0x3   :  { %191 = vmatpush1.bf16.msra.mxu0 %v3224_v2  ;;  %v3231_v7 = vld [vmem:[%s5443_s1 + $0x34] ss:$8 sps:$4 sm:$0xff]   ;;  %v3233_v8 = vld [vmem:[%s5443_s1 + $0x30] ss:$8 sps:$4 sm:$0xff]   ;;  %v3234_v9 = vld [vmem:[%s5443_s1 + $0x44] ss:$8 sps:$4 sm:$0xff]  }
   0x4   :  { %192 = vmatprep.subr.bf16.mxu0 %v3225_v3  ;;  %v3236_v10 = vld [vmem:[%s5443_s1 + $0x40] ss:$8 sps:$4 sm:$0xff]   ;;  %v3237_v11 = vld [vmem:[%s5443_s1 + $0x54] ss:$8 sps:$4 sm:$0xff]   ;;  %v3239_v12 = vld [vmem:[%s5443_s1 + $0x50] ss:$8 sps:$4 sm:$0xff]  }
   0x5   :  { %v3254_v13 = vld [vmem:[%s5445_s2 + $0x4] ss:$16 sps:$4 sm:$0xff]   ;;  %v3259_v15 = vld [vmem:[%s5445_s2] ss:$16 sps:$4 sm:$0xff]   ;;  %v3258_v23 = vld [vmem:[%s5445_s2 + $0xc] ss:$16 sps:$4 sm:$0xff]  }
   0x6   :  { %v3240_v14 = vld [vmem:[%s5443_s1 + $0x64] ss:$8 sps:$4 sm:$0xff]   ;;  %703 = vmatprep.subr.bf16.mxu1 %v3254_v13  ;;  %v3242_v17 = vld [vmem:[%s5443_s1 + $0x60] ss:$8 sps:$4 sm:$0xff]   ;;  %v3243_v18 = vld [vmem:[%s5443_s1 + $0x74] ss:$8 sps:$4 sm:$0xff]  }
   0x7   :  { %193 = vmatpush1.bf16.msra.mxu0 %v3227_v4  ;;  %v3260_v16 = vld [vmem:[%s5445_s2 + $0x24] ss:$16 sps:$4 sm:$0xff]   ;;  %704 = vmatpush1.bf16.msra.mxu1 %v3259_v15  ;;  %v3265_v19 = vld [vmem:[%s5445_s2 + $0x20] ss:$16 sps:$4 sm:$0xff]   ;;  %v3256_v26 = vld [vmem:[%s5445_s2 + $0x8] ss:$16 sps:$4 sm:$0xff]  }
   0x8   :  { %194 = vmatprep.subr.bf16.mxu0 %v3228_v5  ;;  %705 = vmatprep.subr.bf16.mxu1 %v3260_v16  ;;  %v3266_v20 = vld [vmem:[%s5445_s2 + $0x44] ss:$16 sps:$4 sm:$0xff]   ;;  %v3245_v21 = vld [vmem:[%s5443_s1 + $0x70] ss:$8 sps:$4 sm:$0xff]   ;;  %v3264_v27 = vld [vmem:[%s5445_s2 + $0x2c] ss:$16 sps:$4 sm:$0xff]  }
   0x9   :  { %v3271_v22 = vld [vmem:[%s5445_s2 + $0x40] ss:$16 sps:$4 sm:$0xff]   ;;  %v3272_v24 = vld [vmem:[%s5445_s2 + $0x64] ss:$16 sps:$4 sm:$0xff]   ;;  %v3262_v30 = vld [vmem:[%s5445_s2 + $0x28] ss:$16 sps:$4 sm:$0xff]  }
   0xa   :  { %v3246_v25 = vld [vmem:[%s5444_s0] sm:$0xff]   ;;  %v3270_v31 = vld [vmem:[%s5445_s2 + $0x4c] ss:$16 sps:$4 sm:$0xff]   ;;  %v3268_v35 = vld [vmem:[%s5445_s2 + $0x48] ss:$16 sps:$4 sm:$0xff]  }
   0xb   :  { %195 = vmatpush1.bf16.msra.mxu0 %v3230_v6  ;;  %706 = vmatpush1.bf16.msra.mxu1 %v3265_v19  ;;  %v3277_v28 = vld [vmem:[%s5445_s2 + $0x60] ss:$16 sps:$4 sm:$0xff]   ;;  %v3278_v29 = vld [vmem:[%s5445_s2 + $0x84] ss:$16 sps:$4 sm:$0xff]   ;;  %v3247_v34 = vld [vmem:[%s5444_s0 + $0x8] sm:$0xff]  }
   0xc   :  { %196 = vmatprep.subr.bf16.mxu0 %v3231_v7  ;;  %707 = vmatprep.subr.bf16.mxu1 %v3266_v20  ;;  %v3283_v32 = vld [vmem:[%s5445_s2 + $0x80] ss:$16 sps:$4 sm:$0xff]   ;;  %v3284_v33 = vld [vmem:[%s5445_s2 + $0xa4] ss:$16 sps:$4 sm:$0xff]   ;;  %v3276_v36 = vld [vmem:[%s5445_s2 + $0x6c] ss:$16 sps:$4 sm:$0xff]  }
   0xd   :  { %v3289_v37 = vld [vmem:[%s5445_s2 + $0xa0] ss:$16 sps:$4 sm:$0xff]   ;;  %v3290_v38 = vld [vmem:[%s5445_s2 + $0xc4] ss:$16 sps:$4 sm:$0xff]   ;;  %v3274_v39 = vld [vmem:[%s5445_s2 + $0x68] ss:$16 sps:$4 sm:$0xff]  }
   0xe   :  { %v3282_v40 = vld [vmem:[%s5445_s2 + $0x8c] ss:$16 sps:$4 sm:$0xff]   ;;  %v3295_v41 = vld [vmem:[%s5445_s2 + $0xc0] ss:$16 sps:$4 sm:$0xff]   ;;  %v3296_v42 = vld [vmem:[%s5445_s2 + $0xe4] ss:$16 sps:$4 sm:$0xff]  }
   0xf   :  { %197 = vmatpush1.bf16.msra.mxu0 %v3233_v8  ;;  %708 = vmatpush1.bf16.msra.mxu1 %v3271_v22  ;;  %v3248_v43 = vld [vmem:[%s5444_s0 + $0x10] sm:$0xff]   ;;  %v3280_v44 = vld [vmem:[%s5445_s2 + $0x88] ss:$16 sps:$4 sm:$0xff]   ;;  %v3288_v45 = vld [vmem:[%s5445_s2 + $0xac] ss:$16 sps:$4 sm:$0xff]  }
  0x10   :  { %198 = vmatprep.subr.bf16.mxu0 %v3234_v9  ;;  %709 = vmatprep.subr.bf16.mxu1 %v3272_v24  ;;  %v3301_v46 = vld [vmem:[%s5445_s2 + $0xe0] ss:$16 sps:$4 sm:$0xff]   ;;  %v3302_v47 = vld [vmem:[%s5445_s2 + $0x104] ss:$16 sps:$4 sm:$0xff]   ;;  %v3286_v48 = vld [vmem:[%s5445_s2 + $0xa8] ss:$16 sps:$4 sm:$0xff]  }
  0x11   :  { %v3294_v49 = vld [vmem:[%s5445_s2 + $0xcc] ss:$16 sps:$4 sm:$0xff]   ;;  %v3307_v50 = vld [vmem:[%s5445_s2 + $0x100] ss:$16 sps:$4 sm:$0xff]   ;;  %v3308_v51 = vld [vmem:[%s5445_s2 + $0x124] ss:$16 sps:$4 sm:$0xff]  }
  0x12   :  { %v3249_v52 = vld [vmem:[%s5444_s0 + $0x18] sm:$0xff]   ;;  %v3313_v55 = vld [vmem:[%s5445_s2 + $0x120] ss:$16 sps:$4 sm:$0xff]   ;;  %v3314_v56 = vld [vmem:[%s5445_s2 + $0x144] ss:$16 sps:$4 sm:$0xff]  }
  0x13   :  { %199 = vmatpush1.bf16.msra.mxu0 %v3236_v10  ;;  %710 = vmatpush1.bf16.msra.mxu1 %v3277_v28  ;;  %v3292_v53 = vld [vmem:[%s5445_s2 + $0xc8] ss:$16 sps:$4 sm:$0xff]   ;;  %v3300_v54 = vld [vmem:[%s5445_s2 + $0xec] ss:$16 sps:$4 sm:$0xff]   ;;  %v3319_v59 = vld [vmem:[%s5445_s2 + $0x140] ss:$16 sps:$4 sm:$0xff]  }
  0x14   :  { %200 = vmatprep.subr.bf16.mxu0 %v3237_v11  ;;  %711 = vmatprep.subr.bf16.mxu1 %v3278_v29  ;;  %v3298_v57 = vld [vmem:[%s5445_s2 + $0xe8] ss:$16 sps:$4 sm:$0xff]   ;;  %v3306_v58 = vld [vmem:[%s5445_s2 + $0x10c] ss:$16 sps:$4 sm:$0xff]   ;;  %v3320_v60 = vld [vmem:[%s5445_s2 + $0x164] ss:$16 sps:$4 sm:$0xff]  }
  0x15   :  { %v3250_v61 = vld [vmem:[%s5444_s0 + $0x20] sm:$0xff]   ;;  %v3304_v62 = vld [vmem:[%s5445_s2 + $0x108] ss:$16 sps:$4 sm:$0xff]   ;;  %v3312_v63 = vld [vmem:[%s5445_s2 + $0x12c] ss:$16 sps:$4 sm:$0xff]  }
  0x16   :  { %v3325_v0 = vld [vmem:[%s5445_s2 + $0x160] ss:$16 sps:$4 sm:$0xff]   ;;  %v3326_v2 = vld [vmem:[%s5445_s2 + $0x184] ss:$16 sps:$4 sm:$0xff]   ;;  %v3310_v3 = vld [vmem:[%s5445_s2 + $0x128] ss:$16 sps:$4 sm:$0xff]  }
  0x17   :  { %201 = vmatpush1.bf16.msra.mxu0 %v3239_v12  ;;  %712 = vmatpush1.bf16.msra.mxu1 %v3283_v32  ;;  %v3318_v4 = vld [vmem:[%s5445_s2 + $0x14c] ss:$16 sps:$4 sm:$0xff]   ;;  %v3331_v5 = vld [vmem:[%s5445_s2 + $0x180] ss:$16 sps:$4 sm:$0xff]   ;;  %v3332_v6 = vld [vmem:[%s5445_s2 + $0x1a4] ss:$16 sps:$4 sm:$0xff]  }
  0x18   :  { %202 = vmatprep.subr.bf16.mxu0 %v3240_v14  ;;  %713 = vmatprep.subr.bf16.mxu1 %v3284_v33  ;;  %v3251_v7 = vld [vmem:[%s5444_s0 + $0x28] sm:$0xff]   ;;  %v3337_v10 = vld [vmem:[%s5445_s2 + $0x1a0] ss:$16 sps:$4 sm:$0xff]   ;;  %v3338_v11 = vld [vmem:[%s5445_s2 + $0x1c4] ss:$16 sps:$4 sm:$0xff]  }
  0x19   :  { %v3316_v8 = vld [vmem:[%s5445_s2 + $0x148] ss:$16 sps:$4 sm:$0xff]   ;;  %v3324_v9 = vld [vmem:[%s5445_s2 + $0x16c] ss:$16 sps:$4 sm:$0xff]   ;;  %v3252_v14 = vld [vmem:[%s5444_s0 + $0x30] sm:$0xff]  }
  0x1a   :  { %v3322_v12 = vld [vmem:[%s5445_s2 + $0x168] ss:$16 sps:$4 sm:$0xff]   ;;  %v3330_v13 = vld [vmem:[%s5445_s2 + $0x18c] ss:$16 sps:$4 sm:$0xff]   ;;  %v3349_v24 = vld [vmem:[%s5445_s2 + $0x1e0] ss:$16 sps:$4 sm:$0xff]  }
  0x1b   :  { %203 = vmatpush1.bf16.msra.mxu0 %v3242_v17  ;;  %714 = vmatpush1.bf16.msra.mxu1 %v3289_v37  ;;  %v3328_v15 = vld [vmem:[%s5445_s2 + $0x188] ss:$16 sps:$4 sm:$0xff]   ;;  %v3336_v16 = vld [vmem:[%s5445_s2 + $0x1ac] ss:$16 sps:$4 sm:$0xff]  }
  0x1c   :  { %204 = vmatprep.subr.bf16.mxu0 %v3243_v18  ;;  %715 = vmatprep.subr.bf16.mxu1 %v3290_v38  ;;  %v3334_v17 = vld [vmem:[%s5445_s2 + $0x1a8] ss:$16 sps:$4 sm:$0xff]   ;;  %v3342_v18 = vld [vmem:[%s5445_s2 + $0x1cc] ss:$16 sps:$4 sm:$0xff]  }
  0x1d   :  { %v3253_v19 = vld [vmem:[%s5444_s0 + $0x38] sm:$0xff]   ;;  %v3350_v33 = vld [vmem:[%s5446_s5] ss:$8 sps:$4 sm:$0xff]  }
  0x1e   :  { %v3340_v20 = vld [vmem:[%s5445_s2 + $0x1c8] ss:$16 sps:$4 sm:$0xff]   ;;  %v3348_v22 = vld [vmem:[%s5445_s2 + $0x1ec] ss:$16 sps:$4 sm:$0xff]  }
  0x1f   :  { %205 = vmatpush1.bf16.msra.mxu0 %v3245_v21  ;;  %716 = vmatpush1.bf16.msra.mxu1 %v3295_v41  ;;  %v3344_v21 = vld [vmem:[%s5445_s2 + $0x1e4] ss:$16 sps:$4 sm:$0xff]   ;;  %v3356_v38 = vld [vmem:[%s5446_s5 + $0x10] ss:$8 sps:$4 sm:$0xff]  }
  0x20   :  { %816 = vmatprep.subr.bf16.mxu0 %v3258_v23  ;;  %717 = vmatprep.subr.bf16.mxu1 %v3296_v42  ;;  %v3346_v23 = vld [vmem:[%s5445_s2 + $0x1e8] ss:$16 sps:$4 sm:$0xff]   ;;  %v3364_v41 = vld [vmem:[%s5446_s5 + $0x24] ss:$8 sps:$4 sm:$0xff]  }
  0x21   :  { %v3367_v42 = vld [vmem:[%s5447_s6 + $0x24] ss:$8 sps:$4 sm:$0xff]  }
  0x22   :  { %223 = vmatmul.mubr.bf16.vlgmr.msra.gmra.mrb[0].mxu0 %v3246_v25  ;;  %v3352_v25 = vld [vmem:[%s5446_s5 + $0x4] ss:$8 sps:$4 sm:$0xff]  }
  0x23   :  { %232 = vmatprep.mubr.bf16.mxu0 %v3549_v1  ;;  %817 = vmatpush1.bf16.msra.mxu0 %v3256_v26  ;;  %v3355_v26 = vld [vmem:[%s5447_s6 + $0x4] ss:$8 sps:$4 sm:$0xff]  }
  0x24   :  { %818 = vmatprep.subr.bf16.mxu0 %v3264_v27  ;;  %718 = vmatpush1.bf16.msra.mxu1 %v3301_v46 }
  0x25   :  { %719 = vmatprep.subr.bf16.mxu1 %v3302_v47  ;;  %v3362_v47 = vld [vmem:[%s5446_s5 + $0x20] ss:$8 sps:$4 sm:$0xff]  }
  0x27   :  { %819 = vmatpush1.bf16.msra.mxu0 %v3262_v30 }
  0x28   :  { %820 = vmatprep.subr.bf16.mxu0 %v3270_v31  ;;  %720 = vmatpush1.bf16.msra.mxu1 %v3307_v50  ;;  %v3373_v50 = vld [vmem:[%s5447_s6 + $0x34] ss:$8 sps:$4 sm:$0xff]  }
  0x29   :  { %721 = vmatprep.subr.bf16.mxu1 %v3308_v51 }
  0x2a   :  { %233 = vmatmul.mubr.bf16.gmra.mrb[4].mxu0 %v3247_v34  ;;  %v3353_v34 = vld [vmem:[%s5447_s6] ss:$8 sps:$4 sm:$0xff]  }
  0x2b   :  { %242 = vmatprep.mubr.bf16.mxu0 %v3549_v1  ;;  %821 = vmatpush1.bf16.msra.mxu0 %v3268_v35  ;;  %v3358_v35 = vld [vmem:[%s5446_s5 + $0x14] ss:$8 sps:$4 sm:$0xff]  }
  0x2c   :  { %822 = vmatprep.subr.bf16.mxu0 %v3276_v36  ;;  %722 = vmatpush1.bf16.msra.mxu1 %v3313_v55  ;;  %v3361_v36 = vld [vmem:[%s5447_s6 + $0x14] ss:$8 sps:$4 sm:$0xff]   ;;  %v3376_v55 = vld [vmem:[%s5446_s5 + $0x44] ss:$8 sps:$4 sm:$0xff]  }
  0x2d   :  { %723 = vmatprep.subr.bf16.mxu1 %v3314_v56  ;;  %v3379_v56 = vld [vmem:[%s5447_s6 + $0x44] ss:$8 sps:$4 sm:$0xff]  }
  0x2f   :  { %823 = vmatpush1.bf16.msra.mxu0 %v3274_v39  ;;  %v3359_v39 = vld [vmem:[%s5447_s6 + $0x10] ss:$8 sps:$4 sm:$0xff]  }
  0x30   :  { %824 = vmatprep.subr.bf16.mxu0 %v3282_v40  ;;  %724 = vmatpush1.bf16.msra.mxu1 %v3319_v59 }
  0x31   :  { %725 = vmatprep.subr.bf16.mxu1 %v3320_v60 }
  0x32   :  { %243 = vmatmul.mubr.bf16.gmra.mrb[8].mxu0 %v3248_v43 }
  0x33   :  { %252 = vmatprep.mubr.bf16.mxu0 %v3549_v1  ;;  %825 = vmatpush1.bf16.msra.mxu0 %v3280_v44 }
  0x34   :  { %826 = vmatprep.subr.bf16.mxu0 %v3288_v45  ;;  %726 = vmatpush1.bf16.msra.mxu1 %v3325_v0  ;;  %v3385_v0 = vld [vmem:[%s5447_s6 + $0x54] ss:$8 sps:$4 sm:$0xff]  }
  0x35   :  { %727 = vmatprep.subr.bf16.mxu1 %v3326_v2 }
  0x37   :  { %827 = vmatpush1.bf16.msra.mxu0 %v3286_v48  ;;  %v3365_v48 = vld [vmem:[%s5447_s6 + $0x20] ss:$8 sps:$4 sm:$0xff]  }
  0x38   :  { %828 = vmatprep.subr.bf16.mxu0 %v3294_v49  ;;  %728 = vmatpush1.bf16.msra.mxu1 %v3331_v5  ;;  %v3370_v49 = vld [vmem:[%s5446_s5 + $0x34] ss:$8 sps:$4 sm:$0xff]  }
  0x39   :  { %729 = vmatprep.subr.bf16.mxu1 %v3332_v6  ;;  %v3388_v6 = vld [vmem:[%s5446_s5 + $0x64] ss:$8 sps:$4 sm:$0xff]  }
  0x3a   :  { %253 = vmatmul.mubr.bf16.gmra.mrb[12].mxu0 %v3249_v52  ;;  %v3368_v52 = vld [vmem:[%s5446_s5 + $0x30] ss:$8 sps:$4 sm:$0xff]  }
  0x3b   :  { %262 = vmatprep.mubr.bf16.mxu0 %v3549_v1  ;;  %829 = vmatpush1.bf16.msra.mxu0 %v3292_v53  ;;  %v3371_v53 = vld [vmem:[%s5447_s6 + $0x30] ss:$8 sps:$4 sm:$0xff]  }
  0x3c   :  { %830 = vmatprep.subr.bf16.mxu0 %v3300_v54  ;;  %730 = vmatpush1.bf16.msra.mxu1 %v3337_v10 }
  0x3d   :  { %731 = vmatprep.subr.bf16.mxu1 %v3338_v11 }
  0x3f   :  { %831 = vmatpush1.bf16.msra.mxu0 %v3298_v57 }
  0x40   :  { %832 = vmatprep.subr.bf16.mxu0 %v3306_v58 }
  0x42   :  { %263 = vmatmul.mubr.bf16.gmra.mrb[16].mxu0 %v3250_v61  ;;  %v3374_v61 = vld [vmem:[%s5446_s5 + $0x40] ss:$8 sps:$4 sm:$0xff]  }
  0x43   :  { %272 = vmatprep.mubr.bf16.mxu0 %v3549_v1  ;;  %833 = vmatpush1.bf16.msra.mxu0 %v3304_v62  ;;  %v3377_v62 = vld [vmem:[%s5447_s6 + $0x40] ss:$8 sps:$4 sm:$0xff]  }
  0x44   :  { %834 = vmatprep.subr.bf16.mxu0 %v3312_v63  ;;  %v3382_v63 = vld [vmem:[%s5446_s5 + $0x54] ss:$8 sps:$4 sm:$0xff]  }
  0x47   :  { %835 = vmatpush1.bf16.msra.mxu0 %v3310_v3  ;;  %v3380_v3 = vld [vmem:[%s5446_s5 + $0x50] ss:$8 sps:$4 sm:$0xff]  }
  0x48   :  { %836 = vmatprep.subr.bf16.mxu0 %v3318_v4  ;;  %v3383_v4 = vld [vmem:[%s5447_s6 + $0x50] ss:$8 sps:$4 sm:$0xff]  }
  0x4a   :  { %273 = vmatmul.mubr.bf16.gmra.mrb[20].mxu0 %v3251_v7  ;;  %v3391_v7 = vld [vmem:[%s5447_s6 + $0x64] ss:$8 sps:$4 sm:$0xff]  }
  0x4b   :  { %282 = vmatprep.mubr.bf16.mxu0 %v3549_v1  ;;  %837 = vmatpush1.bf16.msra.mxu0 %v3316_v8 }
  0x4c   :  { %838 = vmatprep.subr.bf16.mxu0 %v3324_v9 }
  0x4f   :  { %839 = vmatpush1.bf16.msra.mxu0 %v3322_v12  ;;  %v3386_v12 = vld [vmem:[%s5446_s5 + $0x60] ss:$8 sps:$4 sm:$0xff]  }
  0x50   :  { %840 = vmatprep.subr.bf16.mxu0 %v3330_v13  ;;  %v3389_v13 = vld [vmem:[%s5447_s6 + $0x60] ss:$8 sps:$4 sm:$0xff]  }
  0x52   :  { %283 = vmatmul.mubr.bf16.gmra.mrb[24].mxu0 %v3252_v14  ;;  %v3394_v14 = vld [vmem:[%s5446_s5 + $0x74] ss:$8 sps:$4 sm:$0xff]  }
  0x53   :  { %292 = vmatprep.mubr.bf16.mxu0 %v3549_v1  ;;  %841 = vmatpush1.bf16.msra.mxu0 %v3328_v15  ;;  %v3343_v1 = vld [vmem:[%s5445_s2 + $0x1c0] ss:$16 sps:$4 sm:$0xff]   ;;  %v3397_v15 = vld [vmem:[%s5447_s6 + $0x74] ss:$8 sps:$4 sm:$0xff]  }
  0x54   :  { %842 = vmatprep.subr.bf16.mxu0 %v3336_v16  ;;  %732 = vmatpush1.bf16.msra.mxu1 %v3343_v1  ;;  %v3403_v1 = vld [vmem:[%s5447_s6 + $0x84] ss:$8 sps:$4 sm:$0xff]  }
  0x55   :  { %733 = vmatprep.subr.bf16.mxu1 %v3344_v21 }
  0x57   :  { %843 = vmatpush1.bf16.msra.mxu0 %v3334_v17  ;;  %v3392_v17 = vld [vmem:[%s5446_s5 + $0x70] ss:$8 sps:$4 sm:$0xff]  }
  0x58   :  { %844 = vmatprep.subr.bf16.mxu0 %v3342_v18  ;;  %734 = vmatpush1.bf16.msra.mxu1 %v3349_v24  ;;  %v3395_v18 = vld [vmem:[%s5447_s6 + $0x70] ss:$8 sps:$4 sm:$0xff]  }
  0x59   :  { %1773 = vmatprep.subr.bf16.mxu1 %v3352_v25  ;;  %v3398_v25 = vld [vmem:[%s5446_s5 + $0x80] ss:$8 sps:$4 sm:$0xff]  }
  0x5a   :  { %293 = vmatmul.mubr.bf16.gmra.mrb[28].mxu0 %v3253_v19 }
  0x5b   :  { %845 = vmatpush1.bf16.msra.mxu0 %v3340_v20  ;;  %v3400_v20 = vld [vmem:[%s5446_s5 + $0x84] ss:$8 sps:$4 sm:$0xff]  }
  0x5c   :  { %846 = vmatprep.subr.bf16.mxu0 %v3348_v22 }
  0x5f   :  { %847 = vmatpush1.bf16.msra.mxu0 %v3346_v23 }
  0x60   :  { %2495 = vmatprep.subr.bf16.mxu0 %v3355_v26  ;;  %v3401_v26 = vld [vmem:[%s5447_s6 + $0x80] ss:$8 sps:$4 sm:$0xff]  }
  0xf5   :  { %v224_v27 = vpop.f32.mrb[0].mxu0 }
  0xf6   :  { %v226_v28 = vpop.f32.mrb[1].mxu0 }
  0xf7   :  { %v228_v29 = vpop.f32.mrb[2].mxu0 }
  0xf8   :  { %v303_v30 = vpack.c.bf16 %v228_v29, %v224_v27  ;;  %v230_v31 = vpop.f32.mrb[3].mxu0  ;;  %v3406_v27 = vld [vmem:[%s5446_s5 + $0x94] ss:$8 sps:$4 sm:$0xff]  }
  0xf9   :  { %v304_v32 = vpack.c.bf16 %v230_v31, %v226_v28  ;;  %v3409_v28 = vld [vmem:[%s5447_s6 + $0x94] ss:$8 sps:$4 sm:$0xff]   ;;  %v3407_v31 = vld [vmem:[%s5447_s6 + $0x90] ss:$8 sps:$4 sm:$0xff]  }
  0xfb   :  { %735 = vmatprep.mubr.bf16.mxu1 %v304_v32  ;;  %848 = vmatprep.mubr.bf16.mxu0 %v304_v32 }
  0xfc   :  { %736 = vmatmul.mubr.bf16.vlgmr.msra.gmra.mrb[0].mxu1 %v303_v30  ;;  %849 = vmatmul.mubr.bf16.vlgmr.msra.gmra.mrb[32].mxu0 %v303_v30  ;;  %v3404_v30 = vld [vmem:[%s5446_s5 + $0x90] ss:$8 sps:$4 sm:$0xff]  }
  0xfd   :  { %v234_v37 = vpop.f32.mrb[4].mxu0  ;;  %1774 = vmatpush1.bf16.msra.mxu1 %v3350_v33  ;;  %2496 = vmatpush1.bf16.msra.mxu0 %v3353_v34  ;;  %v3412_v33 = vld [vmem:[%s5446_s5 + $0xa4] ss:$8 sps:$4 sm:$0xff]  }
  0xfe   :  { %v236_v40 = vpop.f32.mrb[5].mxu0  ;;  %1775 = vmatprep.subr.bf16.mxu1 %v3358_v35  ;;  %2497 = vmatprep.subr.bf16.mxu0 %v3361_v36  ;;  %v3415_v34 = vld [vmem:[%s5447_s6 + $0xa4] ss:$8 sps:$4 sm:$0xff]  }
  0xff   :  { %v238_v43 = vpop.f32.mrb[6].mxu0 }
 0x100   :  { %v305_v44 = vpack.c.bf16 %v238_v43, %v234_v37  ;;  %v240_v45 = vpop.f32.mrb[7].mxu0 }
 0x101   :  { %v306_v46 = vpack.c.bf16 %v240_v45, %v236_v40  ;;  %1776 = vmatpush1.bf16.msra.mxu1 %v3356_v38  ;;  %2498 = vmatpush1.bf16.msra.mxu0 %v3359_v39  ;;  %v3410_v39 = vld [vmem:[%s5446_s5 + $0xa0] ss:$8 sps:$4 sm:$0xff]   ;;  %v3419_v45 = vld [vmem:[%s5447_s6 + $0xb0] ss:$8 sps:$4 sm:$0xff]  }
 0x102   :  { %1777 = vmatprep.subr.bf16.mxu1 %v3364_v41  ;;  %2499 = vmatprep.subr.bf16.mxu0 %v3367_v42  ;;  %v3413_v40 = vld [vmem:[%s5447_s6 + $0xa0] ss:$8 sps:$4 sm:$0xff]   ;;  %v3418_v41 = vld [vmem:[%s5446_s5 + $0xb4] ss:$8 sps:$4 sm:$0xff]  }
 0x103   :  { %745 = vmatprep.mubr.bf16.mxu1 %v306_v46  ;;  %858 = vmatprep.mubr.bf16.mxu0 %v306_v46  ;;  %v3421_v42 = vld [vmem:[%s5447_s6 + $0xb4] ss:$8 sps:$4 sm:$0xff]  }
 0x104   :  { %746 = vmatmul.mubr.bf16.gmra.mrb[4].mxu1 %v305_v44  ;;  %859 = vmatmul.mubr.bf16.gmra.mrb[36].mxu0 %v305_v44  ;;  %v3416_v44 = vld [vmem:[%s5446_s5 + $0xb0] ss:$8 sps:$4 sm:$0xff]  }
 0x105   :  { %v244_v51 = vpop.f32.mrb[8].mxu0  ;;  %1778 = vmatpush1.bf16.msra.mxu1 %v3362_v47  ;;  %2500 = vmatpush1.bf16.msra.mxu0 %v3365_v48  ;;  %v3424_v47 = vld [vmem:[%s5446_s5 + $0xc4] ss:$8 sps:$4 sm:$0xff]  }
 0x106   :  { %v246_v54 = vpop.f32.mrb[9].mxu0  ;;  %1779 = vmatprep.subr.bf16.mxu1 %v3370_v49  ;;  %2501 = vmatprep.subr.bf16.mxu0 %v3373_v50  ;;  %v3427_v48 = vld [vmem:[%s5447_s6 + $0xc4] ss:$8 sps:$4 sm:$0xff]  }
 0x107   :  { %v248_v57 = vpop.f32.mrb[10].mxu0 }
 0x108   :  { %v307_v58 = vpack.c.bf16 %v248_v57, %v244_v51  ;;  %v250_v59 = vpop.f32.mrb[11].mxu0 }
 0x109   :  { %v308_v60 = vpack.c.bf16 %v250_v59, %v246_v54  ;;  %1780 = vmatpush1.bf16.msra.mxu1 %v3368_v52  ;;  %2502 = vmatpush1.bf16.msra.mxu0 %v3371_v53  ;;  %v3422_v53 = vld [vmem:[%s5446_s5 + $0xc0] ss:$8 sps:$4 sm:$0xff]  }
 0x10a   :  { %1781 = vmatprep.subr.bf16.mxu1 %v3376_v55  ;;  %2503 = vmatprep.subr.bf16.mxu0 %v3379_v56  ;;  %v3425_v54 = vld [vmem:[%s5447_s6 + $0xc0] ss:$8 sps:$4 sm:$0xff]  }
 0x10b   :  { %755 = vmatprep.mubr.bf16.mxu1 %v308_v60  ;;  %868 = vmatprep.mubr.bf16.mxu0 %v308_v60 }
 0x10c   :  { %756 = vmatmul.mubr.bf16.gmra.mrb[8].mxu1 %v307_v58  ;;  %869 = vmatmul.mubr.bf16.gmra.mrb[40].mxu0 %v307_v58 }
 0x10d   :  { %v254_v2 = vpop.f32.mrb[12].mxu0  ;;  %1782 = vmatpush1.bf16.msra.mxu1 %v3374_v61  ;;  %2504 = vmatpush1.bf16.msra.mxu0 %v3377_v62  ;;  %v3430_v61 = vld [vmem:[%s5446_s5 + $0xd4] ss:$8 sps:$4 sm:$0xff]   ;;  %v3428_v62 = vld [vmem:[%s5446_s5 + $0xd0] ss:$8 sps:$4 sm:$0xff]  }
 0x10e   :  { %v256_v5 = vpop.f32.mrb[13].mxu0  ;;  %1783 = vmatprep.subr.bf16.mxu1 %v3382_v63  ;;  %2505 = vmatprep.subr.bf16.mxu0 %v3385_v0  ;;  %v3433_v63 = vld [vmem:[%s5447_s6 + $0xd4] ss:$8 sps:$4 sm:$0xff]   ;;  %v3431_v0 = vld [vmem:[%s5447_s6 + $0xd0] ss:$8 sps:$4 sm:$0xff]  }
 0x10f   :  { %v258_v8 = vpop.f32.mrb[14].mxu0 }
 0x110   :  { %v309_v9 = vpack.c.bf16 %v258_v8, %v254_v2  ;;  %v260_v10 = vpop.f32.mrb[15].mxu0  ;;  %v3436_v2 = vld [vmem:[%s5446_s5 + $0xe4] ss:$8 sps:$4 sm:$0xff]   ;;  %v3445_v8 = vld [vmem:[%s5447_s6 + $0xf4] ss:$8 sps:$4 sm:$0xff]  }
 0x111   :  { %v310_v11 = vpack.c.bf16 %v260_v10, %v256_v5  ;;  %1784 = vmatpush1.bf16.msra.mxu1 %v3380_v3  ;;  %2506 = vmatpush1.bf16.msra.mxu0 %v3383_v4  ;;  %v3439_v3 = vld [vmem:[%s5447_s6 + $0xe4] ss:$8 sps:$4 sm:$0xff]   ;;  %v3434_v4 = vld [vmem:[%s5446_s5 + $0xe0] ss:$8 sps:$4 sm:$0xff]  }
 0x112   :  { %1785 = vmatprep.subr.bf16.mxu1 %v3388_v6  ;;  %2507 = vmatprep.subr.bf16.mxu0 %v3391_v7  ;;  %v3437_v5 = vld [vmem:[%s5447_s6 + $0xe0] ss:$8 sps:$4 sm:$0xff]   ;;  %v3442_v6 = vld [vmem:[%s5446_s5 + $0xf4] ss:$8 sps:$4 sm:$0xff]   ;;  %v3440_v7 = vld [vmem:[%s5446_s5 + $0xf0] ss:$8 sps:$4 sm:$0xff]  }
 0x113   :  { %765 = vmatprep.mubr.bf16.mxu1 %v310_v11  ;;  %878 = vmatprep.mubr.bf16.mxu0 %v310_v11  ;;  %v3448_v10 = vld [vmem:[%s5446_s5 + $0x104] ss:$8 sps:$4 sm:$0xff]  }
 0x114   :  { %766 = vmatmul.mubr.bf16.gmra.mrb[12].mxu1 %v309_v9  ;;  %879 = vmatmul.mubr.bf16.gmra.mrb[44].mxu0 %v309_v9  ;;  %v3443_v9 = vld [vmem:[%s5447_s6 + $0xf0] ss:$8 sps:$4 sm:$0xff]   ;;  %v3451_v11 = vld [vmem:[%s5447_s6 + $0x104] ss:$8 sps:$4 sm:$0xff]  }
 0x115   :  { %v264_v16 = vpop.f32.mrb[16].mxu0  ;;  %1786 = vmatpush1.bf16.msra.mxu1 %v3386_v12  ;;  %2508 = vmatpush1.bf16.msra.mxu0 %v3389_v13  ;;  %v931_v12 = vlaneseq }
 0x116   :  { %v266_v19 = vpop.f32.mrb[17].mxu0  ;;  %1787 = vmatprep.subr.bf16.mxu1 %v3394_v14  ;;  %2509 = vmatprep.subr.bf16.mxu0 %v3397_v15 }
 0x117   :  { %v268_v21 = vpop.f32.mrb[18].mxu0  ;;  %v932_v13 = vshrl.u32 %v931_v12, 7 }
 0x118   :  { %v311_v22 = vpack.c.bf16 %v268_v21, %v264_v16  ;;  %v270_v23 = vpop.f32.mrb[19].mxu0  ;;  %v929_v16 = vld [vmem:[%s5448_s3] sm:$0xf] }
 0x119   :  { %v312_v24 = vpack.c.bf16 %v270_v23, %v266_v19  ;;  %1788 = vmatpush1.bf16.msra.mxu1 %v3392_v17  ;;  %2510 = vmatpush1.bf16.msra.mxu0 %v3395_v18  ;;  %v933_v14 = vsub.s32 0, %v932_v13  ;;  %v941_v15 = vsub.s32 2, %v932_v13  ;;  %v937_v17 = vsub.s32 1, %v932_v13  ;;  %v1015_v19 = vld [vmem:[%s5449_s4] sm:$0xf] }
 0x11a   :  { %1789 = vmatprep.subr.bf16.mxu1 %v3400_v20  ;;  %2511 = vmatprep.subr.bf16.mxu0 %v3403_v1  ;;  %v945_v18 = vsub.s32 3, %v932_v13 }
 0x11b   :  { %775 = vmatprep.mubr.bf16.mxu1 %v312_v24  ;;  %888 = vmatprep.mubr.bf16.mxu0 %v312_v24  ;;  %v4076_v20 = vrot.slane %v929_v16, %v933_v14  ;;  %v4078_v1 = vrot.slane %v929_v16, %v941_v15  ;;  %v4080_v21 = vrot.slane %v929_v16, %v937_v17 }
 0x11c   :  { %776 = vmatmul.mubr.bf16.gmra.mrb[16].mxu1 %v311_v22  ;;  %889 = vmatmul.mubr.bf16.gmra.mrb[48].mxu0 %v311_v22  ;;  %v4082_v22 = vrot.slane %v929_v16, %v945_v18  ;;  %v4084_v23 = vrot.slane %v1015_v19, %v933_v14  ;;  %v4086_v24 = vrot.slane %v1015_v19, %v941_v15 }
 0x11d   :  { %v274_v29 = vpop.f32.mrb[20].mxu0  ;;  %1790 = vmatpush1.bf16.msra.mxu1 %v3398_v25  ;;  %2512 = vmatpush1.bf16.msra.mxu0 %v3401_v26 }
 0x11e   :  { %v276_v32 = vpop.f32.mrb[21].mxu0  ;;  %1791 = vmatprep.subr.bf16.mxu1 %v3406_v27  ;;  %2513 = vmatprep.subr.bf16.mxu0 %v3409_v28  ;;  %v4088_v27 = vrot.slane %v1015_v19, %v937_v17  ;;  %v4090_v28 = vrot.slane %v1015_v19, %v945_v18 }
 0x11f   :  { %v278_v35 = vpop.f32.mrb[22].mxu0 }
 0x120   :  { %v313_v36 = vpack.c.bf16 %v278_v35, %v274_v29  ;;  %v280_v37 = vpop.f32.mrb[23].mxu0 }
 0x121   :  { %v314_v38 = vpack.c.bf16 %v280_v37, %v276_v32  ;;  %1792 = vmatpush1.bf16.msra.mxu1 %v3404_v30  ;;  %2514 = vmatpush1.bf16.msra.mxu0 %v3407_v31 }
 0x122   :  { %1793 = vmatprep.subr.bf16.mxu1 %v3412_v33  ;;  %2515 = vmatprep.subr.bf16.mxu0 %v3415_v34 }
 0x123   :  { %785 = vmatprep.mubr.bf16.mxu1 %v314_v38  ;;  %898 = vmatprep.mubr.bf16.mxu0 %v314_v38 }
 0x124   :  { %786 = vmatmul.mubr.bf16.gmra.mrb[20].mxu1 %v313_v36  ;;  %899 = vmatmul.mubr.bf16.gmra.mrb[52].mxu0 %v313_v36 }
 0x125   :  { %v284_v43 = vpop.f32.mrb[24].mxu0  ;;  %1794 = vmatpush1.bf16.msra.mxu1 %v3410_v39  ;;  %2516 = vmatpush1.bf16.msra.mxu0 %v3413_v40 }
 0x126   :  { %v286_v46 = vpop.f32.mrb[25].mxu0  ;;  %1795 = vmatprep.subr.bf16.mxu1 %v3418_v41  ;;  %2517 = vmatprep.subr.bf16.mxu0 %v3421_v42 }
 0x127   :  { %v288_v49 = vpop.f32.mrb[26].mxu0 }
 0x128   :  { %v315_v50 = vpack.c.bf16 %v288_v49, %v284_v43  ;;  %v290_v51 = vpop.f32.mrb[27].mxu0 }
 0x129   :  { %v316_v52 = vpack.c.bf16 %v290_v51, %v286_v46  ;;  %1796 = vmatpush1.bf16.msra.mxu1 %v3416_v44  ;;  %2518 = vmatpush1.bf16.msra.mxu0 %v3419_v45 }
 0x12a   :  { %1797 = vmatprep.subr.bf16.mxu1 %v3424_v47  ;;  %2519 = vmatprep.subr.bf16.mxu0 %v3427_v48 }
 0x12b   :  { %795 = vmatprep.mubr.bf16.mxu1 %v316_v52  ;;  %908 = vmatprep.mubr.bf16.mxu0 %v316_v52 }
 0x12c   :  { %796 = vmatmul.mubr.bf16.gmra.mrb[24].mxu1 %v315_v50  ;;  %909 = vmatmul.mubr.bf16.gmra.mrb[56].mxu0 %v315_v50 }
 0x12d   :  { %v294_v55 = vpop.f32.mrb[28].mxu0  ;;  %1798 = vmatpush1.bf16.msra.mxu1 %v3422_v53  ;;  %2520 = vmatpush1.bf16.msra.mxu0 %v3425_v54 }
 0x12e   :  { %v296_v56 = vpop.f32.mrb[29].mxu0  ;;  %1799 = vmatprep.subr.bf16.mxu1 %v3430_v61  ;;  %2521 = vmatprep.subr.bf16.mxu0 %v3433_v63 }
 0x12f   :  { %v298_v57 = vpop.f32.mrb[30].mxu0 }
 0x130   :  { %v317_v58 = vpack.c.bf16 %v298_v57, %v294_v55  ;;  %v300_v59 = vpop.f32.mrb[31].mxu0 }
 0x131   :  { %v318_v60 = vpack.c.bf16 %v300_v59, %v296_v56  ;;  %1800 = vmatpush1.bf16.msra.mxu1 %v3428_v62  ;;  %2522 = vmatpush1.bf16.msra.mxu0 %v3431_v0 }
 0x132   :  { %1801 = vmatprep.subr.bf16.mxu1 %v3436_v2  ;;  %2523 = vmatprep.subr.bf16.mxu0 %v3439_v3 }
 0x133   :  { %805 = vmatprep.mubr.bf16.mxu1 %v318_v60  ;;  %918 = vmatprep.mubr.bf16.mxu0 %v318_v60 }
 0x134   :  { %806 = vmatmul.mubr.bf16.gmra.mrb[28].mxu1 %v317_v58  ;;  %919 = vmatmul.mubr.bf16.gmra.mrb[60].mxu0 %v317_v58 }
 0x135   :  { %1802 = vmatpush1.bf16.msra.mxu1 %v3434_v4  ;;  %2524 = vmatpush1.bf16.msra.mxu0 %v3437_v5 }
 0x136   :  { %1803 = vmatprep.subr.bf16.mxu1 %v3442_v6  ;;  %2525 = vmatprep.subr.bf16.mxu0 %v3445_v8 }
 0x139   :  { %1804 = vmatpush1.bf16.msra.mxu1 %v3440_v7  ;;  %2526 = vmatpush1.bf16.msra.mxu0 %v3443_v9 }
 0x13a   :  { %1886 = vmatprep.subr.bf16.mxu1 %v3448_v10  ;;  %2608 = vmatprep.subr.bf16.mxu0 %v3451_v11 }
 0x1cf   :  { %v737_v25 = vpop.f32.mrb[0].mxu1  ;;  %v850_v26 = vpop.f32.mrb[32].mxu0 }
 0x1d0   :  { %v951_v29 = vmul.f32 %v4076_v20, %v737_v25  ;;  %v953_v30 = vmul.f32 %v4078_v1, %v850_v26  ;;  %v739_v31 = vpop.f32.mrb[1].mxu1  ;;  %v852_v32 = vpop.f32.mrb[33].mxu0 }
 0x1d1   :  { %v952_v33 = vmul.f32 %v4080_v21, %v739_v31  ;;  %v954_v34 = vmul.f32 %v4082_v22, %v852_v32  ;;  %v741_v35 = vpop.f32.mrb[2].mxu1  ;;  %v854_v36 = vpop.f32.mrb[34].mxu0 }
 0x1d2   :  { %v1037_v37 = vadd.f32 %v4084_v23, %v951_v29  ;;  %v1039_v38 = vadd.f32 %v4086_v24, %v953_v30  ;;  %v955_v39 = vmul.f32 %v4076_v20, %v741_v35  ;;  %v957_v40 = vmul.f32 %v4078_v1, %v854_v36  ;;  %v743_v41 = vpop.f32.mrb[3].mxu1  ;;  %v4100_v42 = vpop.f32.mrb[35].mxu0 }
 0x1d3   :  { %v1038_v43 = vadd.f32 %v4088_v27, %v952_v33  ;;  %v1040_v44 = vadd.f32 %v4090_v28, %v954_v34  ;;  %v956_v45 = vmul.f32 %v4080_v21, %v743_v41  ;;  %v3446_v33 = vld [vmem:[%s5446_s5 + $0x100] ss:$8 sps:$4 sm:$0xff]  }
 0x1d4   :  { %vm1101_vm0 = vcmp.ge.f32.partialorder %v1037_v37, 0.0  ;;  %v1165_v46 = vmul.f32 0.01, %v1037_v37  ;;  %vm1103_vm1 = vcmp.ge.f32.partialorder %v1039_v38, 0.0  ;;  %v1167_v47 = vmul.f32 0.01, %v1039_v38 }
 0x1d5   :  { %vm1102_vm2 = vcmp.ge.f32.partialorder %v1038_v43, 0.0  ;;  %v1166_v48 = vmul.f32 0.01, %v1038_v43  ;;  %vm1104_vm3 = vcmp.ge.f32.partialorder %v1040_v44, 0.0  ;;  %v1168_v49 = vmul.f32 0.01, %v1040_v44 }
 0x1d6   :  { %v1229_v50 = vsel %vm1101_vm0, %v1037_v37, %v1165_v46  ;;  %v1231_v51 = vsel %vm1103_vm1, %v1039_v38, %v1167_v47  ;;  %v1041_v52 = vadd.f32 %v4084_v23, %v955_v39  ;;  %v1043_v53 = vadd.f32 %v4086_v24, %v957_v40  ;;  %v3449_v34 = vld [vmem:[%s5447_s6 + $0x100] ss:$8 sps:$4 sm:$0xff]   ;;  %v3454_v37 = vld [vmem:[%s5446_s5 + $0x114] ss:$8 sps:$4 sm:$0xff]  }
 0x1d7   :  { %1293 = vst [vmem:[%s5450_s7] sm:$0xff] %v1229_v50  ;;  %1295 = vst [vmem:[%s5450_s7 + $0x10] sm:$0xff] %v1231_v51  ;;  %v747_v54 = vpop.f32.mrb[4].mxu1  ;;  %v4113_v55 = vpop.f32.mrb[36].mxu0  ;;  %v1230_v56 = vsel %vm1102_vm2, %v1038_v43, %v1166_v48  ;;  %v4115_v57 = vsel %vm1104_vm3, %v1040_v44, %v1168_v49  ;;  %v1042_v60 = vadd.f32 %v4088_v27, %v956_v45  ;;  %v3457_v38 = vld [vmem:[%s5447_s6 + $0x114] ss:$8 sps:$4 sm:$0xff]  }
 0x1d8   :  { %5470 = vst [vmem:[#allocation2_spill] sm:$0xff] %v4115_v57  ;;  %vm1105_vm4 = vcmp.ge.f32.partialorder %v1041_v52, 0.0  ;;  %v1169_v58 = vmul.f32 0.01, %v1041_v52  ;;  %vm1107_vm5 = vcmp.ge.f32.partialorder %v1043_v53, 0.0  ;;  %1294 = vst [vmem:[%s5450_s7 + $0x8] sm:$0xff] %v1230_v56  ;;  %v959_v12 = vmul.f32 %v4076_v20, %v747_v54 }
 0x1d9   :  { %v1171_v59 = vmul.f32 0.01, %v1043_v53  ;;  %1296 = vst [vmem:[%s5450_s7 + $0x18] sm:$0xff] %v4115_v57  ;;  %v749_v63 = vpop.f32.mrb[5].mxu1  ;;  %v4125_v0 = vpop.f32.mrb[37].mxu0  ;;  %vm1106_vm6 = vcmp.ge.f32.partialorder %v1042_v60, 0.0 }
 0x1da   :  { %v1233_v61 = vsel %vm1105_vm4, %v1041_v52, %v1169_v58  ;;  %v960_v4 = vmul.f32 %v4080_v21, %v749_v63  ;;  %v751_v5 = vpop.f32.mrb[6].mxu1  ;;  %v4136_v6 = vpop.f32.mrb[38].mxu0  ;;  %v1170_v9 = vmul.f32 0.01, %v1042_v60  ;;  %v1045_v29 = vadd.f32 %v4084_v23, %v959_v12  ;;  %v3452_v43 = vld [vmem:[%s5446_s5 + $0x110] ss:$8 sps:$4 sm:$0xff]  }
 0x1db   :  { %v1235_v62 = vsel %vm1107_vm5, %v1043_v53, %v1171_v59  ;;  %1297 = vst [vmem:[%s5450_s7 + $0x20] sm:$0xff] %v1233_v61  ;;  %v1357_v2 = vpack.c.bf16 %v1233_v61, %v1229_v50  ;;  %v753_v7 = vpop.f32.mrb[7].mxu1  ;;  %v4138_v8 = vpop.f32.mrb[39].mxu0  ;;  %v963_v14 = vmul.f32 %v4076_v20, %v751_v5  ;;  %v3455_v45 = vld [vmem:[%s5447_s6 + $0x110] ss:$8 sps:$4 sm:$0xff]   ;;  %v958_v59 = vmul.f32 %v4082_v22, %v4100_v42 }
 0x1dc   :  { %1299 = vst [vmem:[%s5450_s7 + $0x30] sm:$0xff] %v1235_v62  ;;  %v4133_v3 = vpack.c.bf16 %v1235_v62, %v1231_v51  ;;  %v1046_v10 = vadd.f32 %v4088_v27, %v960_v4  ;;  %v964_v11 = vmul.f32 %v4080_v21, %v753_v7  ;;  %v1234_v18 = vsel %vm1106_vm6, %v1042_v60, %v1170_v9  ;;  %v3460_v53 = vld [vmem:[%s5446_s5 + $0x124] ss:$8 sps:$4 sm:$0xff]   ;;  %v3461_v12 = vld [vmem:[%s5447_s6 + $0x120] ss:$8 sps:$4 sm:$0xff]  }
 0x1dd   :  { %1298 = vst [vmem:[%s5450_s7 + $0x28] sm:$0xff] %v1234_v18  ;;  %v1049_v31 = vadd.f32 %v4084_v23, %v963_v14  ;;  %v1358_v32 = vpack.c.bf16 %v1234_v18, %v1230_v56  ;;  %v1173_v44 = vmul.f32 0.01, %v1045_v29  ;;  %vm1109_vm9 = vcmp.ge.f32.partialorder %v1045_v29, 0.0  ;;  %v3463_v58 = vld [vmem:[%s5447_s6 + $0x124] ss:$8 sps:$4 sm:$0xff]  }
 0x1de   :  { %5471 = vst [vmem:[#allocation3_spill] sm:$0xff] %v4133_v3  ;;  %vm1110_vm7 = vcmp.ge.f32.partialorder %v1046_v10, 0.0  ;;  %v1174_v13 = vmul.f32 0.01, %v1046_v10  ;;  %v1050_v15 = vadd.f32 %v4088_v27, %v964_v11  ;;  %v961_v60 = vmul.f32 %v4078_v1, %v4113_v55  ;;  %v3458_v11 = vld [vmem:[%s5446_s5 + $0x120] ss:$8 sps:$4 sm:$0xff]  }
 0x1df   :  { %v757_v16 = vpop.f32.mrb[8].mxu1  ;;  %v4145_v17 = vpop.f32.mrb[40].mxu0  ;;  %1805 = vmatprep.mubr.bf16.mxu1 %v1358_v32  ;;  %2527 = vmatprep.mubr.bf16.mxu0 %v1358_v32  ;;  %v1177_v48 = vmul.f32 0.01, %v1049_v31  ;;  %vm1113_vm10 = vcmp.ge.f32.partialorder %v1049_v31, 0.0  ;;  %v1237_v62 = vsel %vm1109_vm9, %v1045_v29, %v1173_v44  ;;  %v962_v7 = vmul.f32 %v4082_v22, %v4125_v0 }
 0x1e0   :  { %v759_v19 = vpop.f32.mrb[9].mxu1  ;;  %v4147_v25 = vpop.f32.mrb[41].mxu0  ;;  %v1238_v26 = vsel %vm1110_vm7, %v1046_v10, %v1174_v13  ;;  %vm1114_vm8 = vcmp.ge.f32.partialorder %v1050_v15, 0.0  ;;  %v1178_v30 = vmul.f32 0.01, %v1050_v15  ;;  %1806 = vmatmul.mubr.bf16.vlgmr.msra.gmra.mrb[32].mxu1 %v1357_v2  ;;  %2528 = vmatmul.mubr.bf16.vlgmr.msra.gmra.mrb[64].mxu0 %v1357_v2  ;;  %v967_v49 = vmul.f32 %v4076_v20, %v757_v16  ;;  %1301 = vst [vmem:[%s5450_s7 + $0x40] sm:$0xff] %v1237_v62 }
 0x1e1   :  { %1302 = vst [vmem:[%s5450_s7 + $0x48] sm:$0xff] %v1238_v26  ;;  %v761_v35 = vpop.f32.mrb[10].mxu1  ;;  %v4163_v36 = vpop.f32.mrb[42].mxu0  ;;  %1887 = vmatpush1.bf16.msra.mxu1 %v3446_v33  ;;  %2609 = vmatpush1.bf16.msra.mxu0 %v3449_v34  ;;  %v968_v52 = vmul.f32 %v4080_v21, %v759_v19  ;;  %v1241_v5 = vsel %vm1113_vm10, %v1049_v31, %v1177_v48  ;;  %v3466_v14 = vld [vmem:[%s5446_s5 + $0x134] ss:$8 sps:$4 sm:$0xff]  }
 0x1e2   :  { %v763_v39 = vpop.f32.mrb[11].mxu1  ;;  %v4171_v40 = vpop.f32.mrb[43].mxu0  ;;  %v1242_v41 = vsel %vm1114_vm8, %v1050_v15, %v1178_v30  ;;  %1888 = vmatprep.subr.bf16.mxu1 %v3454_v37  ;;  %2610 = vmatprep.subr.bf16.mxu0 %v3457_v38  ;;  %v971_v54 = vmul.f32 %v4076_v20, %v761_v35  ;;  %v4210_v4 = vadd.f32 %v4084_v23, %v967_v49  ;;  %v3469_v15 = vld [vmem:[%s5447_s6 + $0x134] ss:$8 sps:$4 sm:$0xff]   ;;  %v4254_v29 = vld [vmem:[%s5447_s6 + $0x130] ss:$8 sps:$4 sm:$0xff]  }
 0x1e3   :  { %1306 = vst [vmem:[%s5450_s7 + $0x68] sm:$0xff] %v1242_v41  ;;  %v972_v56 = vmul.f32 %v4080_v21, %v763_v39  ;;  %v1362_v61 = vpack.c.bf16 %v1242_v41, %v1238_v26  ;;  %v965_v9 = vmul.f32 %v4078_v1, %v4136_v6  ;;  %v1054_v10 = vadd.f32 %v4088_v27, %v968_v52  ;;  %v3464_v26 = vld [vmem:[%s5446_s5 + $0x130] ss:$8 sps:$4 sm:$0xff]   ;;  %v3472_v35 = vld [vmem:[%s5446_s5 + $0x144] ss:$8 sps:$4 sm:$0xff]  }
 0x1e4   :  { %1305 = vst [vmem:[%s5450_s7 + $0x60] sm:$0xff] %v1241_v5  ;;  %v1057_v0 = vadd.f32 %v4084_v23, %v971_v54  ;;  %v1361_v13 = vpack.c.bf16 %v1241_v5, %v1237_v62  ;;  %v4241_v16 = vadd.f32 %v4090_v28, %v958_v59  ;;  %v4244_v18 = vadd.f32 %v4086_v24, %v961_v60  ;;  %v4273_v37 = vld [vmem:[%s5447_s6 + $0x144] ss:$8 sps:$4 sm:$0xff]   ;;  %v4323_v62 = vld [vmem:[%s5447_s6 + $0x140] ss:$8 sps:$4 sm:$0xff]  }
 0x1e5   :  { %1889 = vmatpush1.bf16.msra.mxu1 %v3452_v43  ;;  %2611 = vmatpush1.bf16.msra.mxu0 %v3455_v45  ;;  %v1058_v6 = vadd.f32 %v4088_v27, %v972_v56  ;;  %v966_v19 = vmul.f32 %v4082_v22, %v4138_v8  ;;  %5472 = vst [vmem:[#allocation4_spill] sm:$0xff] %v4254_v29  ;;  %v1181_v32 = vmul.f32 0.01, %v4210_v4  ;;  %5473 = vst [vmem:[#allocation5_spill] sm:$0xff] %v4273_v37 }
 0x1e6   :  { %1815 = vmatprep.mubr.bf16.mxu1 %v1362_v61  ;;  %1890 = vmatprep.subr.bf16.mxu1 %v3460_v53  ;;  %v969_v33 = vmul.f32 %v4078_v1, %v4145_v17  ;;  %v970_v8 = vmul.f32 %v4082_v22, %v4147_v25  ;;  %v973_v34 = vmul.f32 %v4078_v1, %v4163_v36  ;;  %vm1117_vm11 = vcmp.ge.f32.partialorder %v4210_v4, 0.0 }
 0x1e7   :  { %v4182_v46 = vpop.f32.mrb[12].mxu1  ;;  %v4184_v47 = vpop.f32.mrb[44].mxu0  ;;  %2537 = vmatprep.mubr.bf16.mxu0 %v1362_v61  ;;  %2612 = vmatprep.subr.bf16.mxu0 %v3463_v58  ;;  %vm1118_vm12 = vcmp.ge.f32.partialorder %v1054_v10, 0.0  ;;  %v1182_v17 = vmul.f32 0.01, %v1054_v10  ;;  %v4283_v39 = vadd.f32 %v4090_v28, %v962_v7  ;;  %v4286_v41 = vadd.f32 %v4086_v24, %v965_v9  ;;  %5475 = vst [vmem:[#allocation7_spill] sm:$0xff] %v4323_v62 }
 0x1e8   :  { %v4187_v50 = vpop.f32.mrb[13].mxu1  ;;  %v4189_v51 = vpop.f32.mrb[45].mxu0  ;;  %1816 = vmatmul.mubr.bf16.gmra.mrb[36].mxu1 %v1361_v13  ;;  %2538 = vmatmul.mubr.bf16.gmra.mrb[68].mxu0 %v1361_v13  ;;  %v975_v25 = vmul.f32 %v4076_v20, %v4182_v46  ;;  %v1185_v43 = vmul.f32 0.01, %v1057_v0  ;;  %v1186_v44 = vmul.f32 0.01, %v1058_v6  ;;  %v4296_v52 = vadd.f32 %v4090_v28, %v966_v19 }
 0x1e9   :  { %v4205_v63 = vpop.f32.mrb[14].mxu1  ;;  %v4207_v2 = vpop.f32.mrb[46].mxu0  ;;  %1891 = vmatpush1.bf16.msra.mxu1 %v3458_v11  ;;  %2613 = vmatpush1.bf16.msra.mxu0 %v3461_v12  ;;  %vm1121_vm13 = vcmp.ge.f32.partialorder %v1057_v0, 0.0  ;;  %vm1122_vm14 = vcmp.ge.f32.partialorder %v1058_v6, 0.0  ;;  %v976_v46 = vmul.f32 %v4080_v21, %v4187_v50  ;;  %v4299_v53 = vadd.f32 %v4086_v24, %v969_v33  ;;  %v3470_v58 = vld [vmem:[%s5446_s5 + $0x140] ss:$8 sps:$4 sm:$0xff]  }
 0x1ea   :  { %v773_v42 = vpop.f32.mrb[15].mxu1  ;;  %v4216_v55 = vpop.f32.mrb[47].mxu0  ;;  %1892 = vmatprep.subr.bf16.mxu1 %v3466_v14  ;;  %2614 = vmatprep.subr.bf16.mxu0 %v3469_v15  ;;  %v4302_v54 = vadd.f32 %v4090_v28, %v970_v8  ;;  %v4305_v56 = vadd.f32 %v4086_v24, %v973_v34  ;;  %v4311_v50 = vmul.f32 0.01, %v4241_v16  ;;  %v4314_v59 = vadd.f32 %v4084_v23, %v975_v25  ;;  %v3478_v11 = vld [vmem:[%s5446_s5 + $0x154] ss:$8 sps:$4 sm:$0xff]  }
 0x1eb   :  { %v980_v49 = vmul.f32 %v4080_v21, %v773_v42  ;;  %v979_v60 = vmul.f32 %v4076_v20, %v4205_v63  ;;  %v1246_v61 = vsel %vm1118_vm12, %v1054_v10, %v1182_v17  ;;  %v4330_v7 = vmul.f32 0.01, %v4244_v18  ;;  %v3484_v33 = vld [vmem:[%s5446_s5 + $0x164] ss:$8 sps:$4 sm:$0xff]  }
 0x1ec   :  { %5474 = vst [vmem:[#allocation6_spill] sm:$0xff] %v4311_v50  ;;  %v1250_v9 = vsel %vm1122_vm14, %v1058_v6, %v1186_v44  ;;  %1310 = vst [vmem:[%s5450_s7 + $0x88] sm:$0xff] %v1246_v61  ;;  %v1245_v63 = vsel %vm1117_vm11, %v4210_v4, %v1181_v32  ;;  %v1249_v10 = vsel %vm1121_vm13, %v1057_v0, %v1185_v43  ;;  %v4345_v12 = vmul.f32 0.01, %v4283_v39  ;;  %v4366_v4 = vld [vmem:[%s5447_s6 + $0x150] ss:$8 sps:$4 sm:$0xff]  }
 0x1ed   :  { %1893 = vmatpush1.bf16.msra.mxu1 %v3464_v26  ;;  %2615 = vmatpush1.bf16.msra.mxu0 %v4254_v29  ;;  %5476 = vst [vmem:[#allocation8_spill] sm:$0xff] %v4330_v7  ;;  %v974_v6 = vmul.f32 %v4082_v22, %v4171_v40  ;;  %v1062_v13 = vadd.f32 %v4088_v27, %v976_v46  ;;  %1314 = vst [vmem:[%s5450_s7 + $0xa8] sm:$0xff] %v1250_v9  ;;  %v3476_v40 = vld [vmem:[%s5446_s5 + $0x150] ss:$8 sps:$4 sm:$0xff]   ;;  %v4371_v0 = vld [vmem:[%s5447_s6 + $0x154] ss:$8 sps:$4 sm:$0xff]  }
 0x1ee   :  { %1894 = vmatprep.subr.bf16.mxu1 %v3472_v35  ;;  %2616 = vmatprep.subr.bf16.mxu0 %v4273_v37  ;;  %5477 = vst [vmem:[#allocation9_spill] sm:$0xff] %v4345_v12  ;;  %v1066_v14 = vadd.f32 %v4088_v27, %v980_v49  ;;  %1309 = vst [vmem:[%s5450_s7 + $0x80] sm:$0xff] %v1245_v63  ;;  %v4374_v15 = vmul.f32 0.01, %v4286_v41  ;;  %v4377_v19 = vmul.f32 0.01, %v4296_v52 }
 0x1ef   :  { %v4256_v30 = vpop.f32.mrb[16].mxu1  ;;  %v4258_v31 = vpop.f32.mrb[48].mxu0  ;;  %1313 = vst [vmem:[%s5450_s7 + $0xa0] sm:$0xff] %v1249_v10  ;;  %5478 = vst [vmem:[#allocation10_spill] sm:$0xff] %v4366_v4  ;;  %v1366_v26 = vpack.c.bf16 %v1250_v9, %v1246_v61  ;;  %v1365_v32 = vpack.c.bf16 %v1249_v10, %v1245_v63  ;;  %v4385_v8 = vld [vmem:[%s5447_s6 + $0x164] ss:$8 sps:$4 sm:$0xff]   ;;  %v977_v43 = vmul.f32 %v4078_v1, %v4184_v47 }
 0x1f0   :  { %v4278_v36 = vpop.f32.mrb[17].mxu1  ;;  %v4280_v38 = vpop.f32.mrb[49].mxu0  ;;  %5479 = vst [vmem:[#allocation11_spill] sm:$0xff] %v4371_v0  ;;  %5480 = vst [vmem:[#allocation12_spill] sm:$0xff] %v4374_v15  ;;  %v4392_v17 = vmul.f32 0.01, %v4299_v53  ;;  %v4400_v44 = vadd.f32 %v4084_v23, %v979_v60  ;;  %v978_v63 = vmul.f32 %v4082_v22, %v4189_v51  ;;  %v982_v51 = vmul.f32 %v4082_v22, %v4216_v55 }
 0x1f1   :  { %v4288_v45 = vpop.f32.mrb[18].mxu1  ;;  %v4290_v48 = vpop.f32.mrb[50].mxu0  ;;  %5481 = vst [vmem:[#allocation13_spill] sm:$0xff] %v4377_v19  ;;  %5482 = vst [vmem:[#allocation14_spill] sm:$0xff] %v4385_v8  ;;  %v4395_v25 = vmul.f32 0.01, %v4302_v54  ;;  %1895 = vmatpush1.bf16.msra.mxu1 %v3470_v58  ;;  %2617 = vmatpush1.bf16.msra.mxu0 %v4323_v62  ;;  %v4418_v58 = vadd.f32 %v4090_v28, %v974_v6  ;;  %v981_v62 = vmul.f32 %v4078_v1, %v4207_v2 }
 0x1f2   :  { %v4325_v5 = vpop.f32.mrb[19].mxu1  ;;  %v4327_v42 = vpop.f32.mrb[51].mxu0  ;;  %5483 = vst [vmem:[#allocation15_spill] sm:$0xff] %v4392_v17  ;;  %v4408_v61 = vmul.f32 0.01, %v4305_v56  ;;  %1825 = vmatprep.mubr.bf16.mxu1 %v1366_v26  ;;  %2547 = vmatprep.mubr.bf16.mxu0 %v1366_v26  ;;  %vm1125_vm15 = vcmp.ge.f32.partialorder %v4314_v59, 0.0  ;;  %v4431_v6 = vadd.f32 %v4086_v24, %v977_v43  ;;  %v983_v26 = vmul.f32 %v4076_v20, %v4256_v30 }
 0x1f3   :  { %5484 = vst [vmem:[#allocation16_spill] sm:$0xff] %v4395_v25  ;;  %v1189_v9 = vmul.f32 0.01, %v4314_v59  ;;  %v1190_v10 = vmul.f32 0.01, %v1062_v13  ;;  %1826 = vmatmul.mubr.bf16.gmra.mrb[40].mxu1 %v1365_v32  ;;  %2548 = vmatmul.mubr.bf16.gmra.mrb[72].mxu0 %v1365_v32  ;;  %vm1126_vm0 = vcmp.ge.f32.partialorder %v1062_v13, 0.0  ;;  %v984_v32 = vmul.f32 %v4080_v21, %v4278_v36 }
 0x1f4   :  { %5485 = vst [vmem:[#allocation17_spill] sm:$0xff] %v4408_v61  ;;  %v1194_v37 = vmul.f32 0.01, %v1066_v14  ;;  %vm1130_vm1 = vcmp.ge.f32.partialorder %v1066_v14, 0.0  ;;  %1896 = vmatprep.subr.bf16.mxu1 %v3478_v11  ;;  %2618 = vmatprep.subr.bf16.mxu0 %v4371_v0  ;;  %v1193_v2 = vmul.f32 0.01, %v4400_v44  ;;  %v4448_v43 = vadd.f32 %v4090_v28, %v978_v63 }
 0x1f5   :  { %1897 = vmatpush1.bf16.msra.mxu1 %v3476_v40  ;;  %2619 = vmatpush1.bf16.msra.mxu0 %v4366_v4  ;;  %v3482_v55 = vld [vmem:[%s5446_s5 + $0x160] ss:$8 sps:$4 sm:$0xff]   ;;  %vm1129_vm2 = vcmp.ge.f32.partialorder %v4400_v44, 0.0  ;;  %v987_v30 = vmul.f32 %v4076_v20, %v4288_v45  ;;  %v988_v36 = vmul.f32 %v4080_v21, %v4325_v5  ;;  %v4457_v40 = vadd.f32 %v4086_v24, %v981_v62  ;;  %v3490_v45 = vld [vmem:[%s5446_s5 + $0x174] ss:$8 sps:$4 sm:$0xff]  }
 0x1f6   :  { %v4445_v11 = vld [vmem:[%s5447_s6 + $0x160] ss:$8 sps:$4 sm:$0xff]   ;;  %1898 = vmatprep.subr.bf16.mxu1 %v3484_v33  ;;  %2620 = vmatprep.subr.bf16.mxu0 %v4385_v8  ;;  %v1254_v4 = vsel %vm1126_vm0, %v1062_v13, %v1190_v10  ;;  %v1258_v0 = vsel %vm1130_vm1, %v1066_v14, %v1194_v37  ;;  %v1253_v63 = vsel %vm1125_vm15, %v4314_v59, %v1189_v9  ;;  %v4470_v5 = vld [vmem:[%s5447_s6 + $0x174] ss:$8 sps:$4 sm:$0xff]   ;;  %v3496_v61 = vld [vmem:[%s5446_s5 + $0x184] ss:$8 sps:$4 sm:$0xff]  }
 0x1f7   :  { %v4387_v34 = vpop.f32.mrb[20].mxu1  ;;  %v4389_v35 = vpop.f32.mrb[52].mxu0  ;;  %5486 = vst [vmem:[#allocation18_spill] sm:$0xff] %v4445_v11  ;;  %5487 = vst [vmem:[#allocation19_spill] sm:$0xff] %v4470_v5  ;;  %v4477_v13 = vadd.f32 %v4090_v28, %v982_v51  ;;  %v985_v37 = vmul.f32 %v4078_v1, %v4258_v31  ;;  %v986_v59 = vmul.f32 %v4082_v22, %v4280_v38  ;;  %v3488_v31 = vld [vmem:[%s5446_s5 + $0x170] ss:$8 sps:$4 sm:$0xff]  }
 0x1f8   :  { %v4403_v46 = vpop.f32.mrb[21].mxu1  ;;  %v4405_v49 = vpop.f32.mrb[53].mxu0  ;;  %1318 = vst [vmem:[%s5450_s7 + $0xc8] sm:$0xff] %v1254_v4  ;;  %1322 = vst [vmem:[%s5450_s7 + $0xe8] sm:$0xff] %v1258_v0  ;;  %v1370_v14 = vpack.c.bf16 %v1258_v0, %v1254_v4  ;;  %v4498_v38 = vld [vmem:[%s5447_s6 + $0x170] ss:$8 sps:$4 sm:$0xff]   ;;  %v4508_v4 = vadd.f32 %v4084_v23, %v983_v26  ;;  %v4511_v0 = vadd.f32 %v4088_v27, %v984_v32 }
 0x1f9   :  { %v4413_v47 = vpop.f32.mrb[22].mxu1  ;;  %v4415_v60 = vpop.f32.mrb[54].mxu0  ;;  %1317 = vst [vmem:[%s5450_s7 + $0xc0] sm:$0xff] %v1253_v63  ;;  %5488 = vst [vmem:[#allocation20_spill] sm:$0xff] %v4498_v38  ;;  %v4505_v51 = vmul.f32 0.01, %v4418_v58  ;;  %v1257_v8 = vsel %vm1129_vm2, %v4400_v44, %v1193_v2  ;;  %1899 = vmatpush1.bf16.msra.mxu1 %v3482_v55  ;;  %2621 = vmatpush1.bf16.msra.mxu0 %v4445_v11  ;;  %v1073_v32 = vadd.f32 %v4084_v23, %v987_v30 }
 0x1fa   :  { %v4422_v29 = vpop.f32.mrb[23].mxu1  ;;  %v4424_v3 = vpop.f32.mrb[55].mxu0  ;;  %v4525_v26 = vmul.f32 0.01, %v4431_v6  ;;  %v1074_v25 = vadd.f32 %v4088_v27, %v988_v36  ;;  %1835 = vmatprep.mubr.bf16.mxu1 %v1370_v14  ;;  %2557 = vmatprep.mubr.bf16.mxu0 %v1370_v14  ;;  %1321 = vst [vmem:[%s5450_s7 + $0xe0] sm:$0xff] %v1257_v8  ;;  %v1369_v44 = vpack.c.bf16 %v1257_v8, %v1253_v63  ;;  %vm1133_vm3 = vcmp.ge.f32.partialorder %v4508_v4, 0.0 }
 0x1fb   :  { %5489 = vst [vmem:[#allocation21_spill] sm:$0xff] %v4505_v51  ;;  %v4535_v2 = vld [vmem:[%s5447_s6 + $0x184] ss:$8 sps:$4 sm:$0xff]   ;;  %v4542_v30 = vmul.f32 0.01, %v4448_v43  ;;  %v989_v14 = vmul.f32 %v4078_v1, %v4290_v48  ;;  %v990_v8 = vmul.f32 %v4082_v22, %v4327_v42  ;;  %1900 = vmatprep.subr.bf16.mxu1 %v3490_v45  ;;  %2622 = vmatprep.subr.bf16.mxu0 %v4470_v5  ;;  %vm1134_vm4 = vcmp.ge.f32.partialorder %v4511_v0, 0.0 }
 0x1fc   :  { %5490 = vst [vmem:[#allocation22_spill] sm:$0xff] %v4525_v26  ;;  %5491 = vst [vmem:[#allocation23_spill] sm:$0xff] %v4535_v2  ;;  %v4545_v36 = vmul.f32 0.01, %v4457_v40  ;;  %v3494_v63 = vld [vmem:[%s5446_s5 + $0x180] ss:$8 sps:$4 sm:$0xff]   ;;  %1836 = vmatmul.mubr.bf16.gmra.mrb[44].mxu1 %v1369_v44  ;;  %2558 = vmatmul.mubr.bf16.gmra.mrb[76].mxu0 %v1369_v44  ;;  %v991_v48 = vmul.f32 %v4076_v20, %v4387_v34  ;;  %v992_v44 = vmul.f32 %v4080_v21, %v4403_v46 }
 0x1fd   :  { %5492 = vst [vmem:[#allocation24_spill] sm:$0xff] %v4542_v30  ;;  %v4556_v26 = vmul.f32 0.01, %v4477_v13  ;;  %v4559_v30 = vadd.f32 %v4086_v24, %v985_v37  ;;  %v4569_v42 = vld [vmem:[%s5447_s6 + $0x180] ss:$8 sps:$4 sm:$0xff]   ;;  %1901 = vmatpush1.bf16.msra.mxu1 %v3488_v31  ;;  %2623 = vmatpush1.bf16.msra.mxu0 %v4498_v38  ;;  %vm1137_vm5 = vcmp.ge.f32.partialorder %v1073_v32, 0.0  ;;  %v4586_v15 = vadd.f32 %v4090_v28, %v990_v8 }
 0x1fe   :  { %5493 = vst [vmem:[#allocation25_spill] sm:$0xff] %v4545_v36  ;;  %v4562_v36 = vadd.f32 %v4090_v28, %v986_v59  ;;  %5495 = vst [vmem:[#allocation27_spill] sm:$0xff] %v4569_v42  ;;  %v3502_v45 = vld [vmem:[%s5446_s5 + $0x194] ss:$8 sps:$4 sm:$0xff]   ;;  %v1197_v37 = vmul.f32 0.01, %v4508_v4  ;;  %1902 = vmatprep.subr.bf16.mxu1 %v3496_v61  ;;  %2624 = vmatprep.subr.bf16.mxu0 %v4535_v2  ;;  %v996_v46 = vmul.f32 %v4080_v21, %v4422_v29 }
 0x1ff   :  { %v4472_v33 = vpop.f32.mrb[24].mxu1  ;;  %v4474_v62 = vpop.f32.mrb[56].mxu0  ;;  %5494 = vst [vmem:[#allocation26_spill] sm:$0xff] %v4556_v26  ;;  %v1198_v59 = vmul.f32 0.01, %v4511_v0  ;;  %v4583_v26 = vadd.f32 %v4086_v24, %v989_v14  ;;  %vm1138_vm6 = vcmp.ge.f32.partialorder %v1074_v25, 0.0  ;;  %v4600_v2 = vadd.f32 %v4084_v23, %v991_v48 }
 0x200   :  { %v4500_v9 = vpop.f32.mrb[25].mxu1  ;;  %v4502_v10 = vpop.f32.mrb[57].mxu0  ;;  %v1201_v34 = vmul.f32 0.01, %v1073_v32  ;;  %v1202_v5 = vmul.f32 0.01, %v1074_v25  ;;  %v993_v14 = vmul.f32 %v4078_v1, %v4389_v35  ;;  %v994_v8 = vmul.f32 %v4082_v22, %v4405_v49 }
 0x201   :  { %v4520_v17 = vpop.f32.mrb[26].mxu1  ;;  %v4522_v51 = vpop.f32.mrb[58].mxu0  ;;  %v4593_v31 = vld [vmem:[%s5447_s6 + $0x194] ss:$8 sps:$4 sm:$0xff]   ;;  %v995_v29 = vmul.f32 %v4076_v20, %v4413_v47  ;;  %v4609_v7 = vmul.f32 0.01, %v4559_v30  ;;  %v4612_v19 = vadd.f32 %v4088_v27, %v992_v44  ;;  %v997_v57 = vmul.f32 %v4078_v1, %v4415_v60  ;;  %1903 = vmatpush1.bf16.msra.mxu1 %v3494_v63  ;;  %2625 = vmatpush1.bf16.msra.mxu0 %v4569_v42 }
 0x202   :  { %v4537_v55 = vpop.f32.mrb[27].mxu1  ;;  %v4539_v11 = vpop.f32.mrb[59].mxu0  ;;  %5496 = vst [vmem:[#allocation28_spill] sm:$0xff] %v4593_v31  ;;  %v998_v48 = vmul.f32 %v4082_v22, %v4424_v3  ;;  %v1262_v47 = vsel %vm1134_vm4, %v4511_v0, %v1198_v59  ;;  %v1266_v44 = vsel %vm1138_vm6, %v1074_v25, %v1202_v5  ;;  %v1261_v60 = vsel %vm1133_vm3, %v4508_v4, %v1197_v37  ;;  %v3500_v3 = vld [vmem:[%s5446_s5 + $0x190] ss:$8 sps:$4 sm:$0xff]  }
 0x203   :  { %5497 = vst [vmem:[#allocation29_spill] sm:$0xff] %v4609_v7  ;;  %v1265_v7 = vsel %vm1137_vm5, %v1073_v32, %v1201_v34  ;;  %1904 = vmatprep.subr.bf16.mxu1 %v3502_v45  ;;  %v4639_v12 = vmul.f32 0.01, %v4562_v36  ;;  %v4642_v25 = vmul.f32 0.01, %v4583_v26  ;;  %v1082_v5 = vadd.f32 %v4088_v27, %v996_v46  ;;  %1326 = vst [vmem:[%s5450_s7 + $0x108] sm:$0xff] %v1262_v47 }
 0x204   :  { %1330 = vst [vmem:[%s5450_s7 + $0x128] sm:$0xff] %v1266_v44  ;;  %v1374_v4 = vpack.c.bf16 %v1266_v44, %v1262_v47  ;;  %1325 = vst [vmem:[%s5450_s7 + $0x100] sm:$0xff] %v1261_v60  ;;  %2626 = vmatprep.subr.bf16.mxu0 %v4593_v31  ;;  %v4663_v45 = vmul.f32 0.01, %v4586_v15  ;;  %v4666_v37 = vadd.f32 %v4086_v24, %v993_v14  ;;  %v4673_v46 = vld [vmem:[%s5447_s6 + $0x190] ss:$8 sps:$4 sm:$0xff]  }
 0x205   :  { %5498 = vst [vmem:[#allocation30_spill] sm:$0xff] %v4639_v12  ;;  %5499 = vst [vmem:[#allocation31_spill] sm:$0xff] %v4642_v25  ;;  %v1373_v59 = vpack.c.bf16 %v1265_v7, %v1261_v60  ;;  %v999_v34 = vmul.f32 %v4076_v20, %v4472_v33  ;;  %v3508_v47 = vld [vmem:[%s5446_s5 + $0x1a4] ss:$8 sps:$4 sm:$0xff]   ;;  %vm1141_vm7 = vcmp.ge.f32.partialorder %v4600_v2, 0.0  ;;  %v4681_v14 = vadd.f32 %v4090_v28, %v994_v8 }
 0x206   :  { %1329 = vst [vmem:[%s5450_s7 + $0x120] sm:$0xff] %v1265_v7  ;;  %5500 = vst [vmem:[#allocation32_spill] sm:$0xff] %v4663_v45  ;;  %v1205_v44 = vmul.f32 0.01, %v4600_v2  ;;  %v1081_v7 = vadd.f32 %v4084_v23, %v995_v29  ;;  %1845 = vmatprep.mubr.bf16.mxu1 %v1374_v4  ;;  %2567 = vmatprep.mubr.bf16.mxu0 %v1374_v4  ;;  %v4687_v33 = vld [vmem:[%s5447_s6 + $0x1a4] ss:$8 sps:$4 sm:$0xff]   ;;  %v4691_v60 = vadd.f32 %v4086_v24, %v997_v57 }
 0x207   :  { %v4595_v38 = vpop.f32.mrb[28].mxu1  ;;  %v4597_v61 = vpop.f32.mrb[60].mxu0  ;;  %5501 = vst [vmem:[#allocation33_spill] sm:$0xff] %v4673_v46  ;;  %5502 = vst [vmem:[#allocation34_spill] sm:$0xff] %v4687_v33  ;;  %vm1142_vm8 = vcmp.ge.f32.partialorder %v4612_v19, 0.0  ;;  %v4694_v31 = vadd.f32 %v4090_v28, %v998_v48  ;;  %1846 = vmatmul.mubr.bf16.gmra.mrb[48].mxu1 %v1373_v59  ;;  %2568 = vmatmul.mubr.bf16.gmra.mrb[80].mxu0 %v1373_v59  ;;  %v1001_v8 = vmul.f32 %v4078_v1, %v4474_v62 }
 0x208   :  { %v4619_v35 = vpop.f32.mrb[29].mxu1  ;;  %v4621_v49 = vpop.f32.mrb[61].mxu0  ;;  %v3506_v29 = vld [vmem:[%s5446_s5 + $0x1a0] ss:$8 sps:$4 sm:$0xff]   ;;  %v1206_v4 = vmul.f32 0.01, %v4612_v19  ;;  %v1000_v45 = vmul.f32 %v4080_v21, %v4500_v9  ;;  %v1002_v57 = vmul.f32 %v4082_v22, %v4502_v10  ;;  %1905 = vmatpush1.bf16.msra.mxu1 %v3500_v3  ;;  %v4712_v62 = vadd.f32 %v4084_v23, %v999_v34  ;;  %2627 = vmatpush1.bf16.msra.mxu0 %v4673_v46 }
 0x209   :  { %v4634_v63 = vpop.f32.mrb[30].mxu1  ;;  %v4636_v42 = vpop.f32.mrb[62].mxu0  ;;  %v1210_v25 = vmul.f32 0.01, %v1082_v5  ;;  %v4709_v48 = vld [vmem:[%s5447_s6 + $0x1a0] ss:$8 sps:$4 sm:$0xff]   ;;  %v1003_v59 = vmul.f32 %v4076_v20, %v4520_v17  ;;  %v1005_v12 = vmul.f32 %v4078_v1, %v4522_v51  ;;  %1906 = vmatprep.subr.bf16.mxu1 %v3508_v47  ;;  %v1004_v51 = vmul.f32 %v4080_v21, %v4537_v55  ;;  %2628 = vmatprep.subr.bf16.mxu0 %v4687_v33 }
 0x20a   :  { %v4658_v0 = vpop.f32.mrb[31].mxu1  ;;  %v4660_v32 = vpop.f32.mrb[63].mxu0  ;;  %vm1146_vm9 = vcmp.ge.f32.partialorder %v1082_v5, 0.0  ;;  %v3514_v9 = vld [vmem:[%s5446_s5 + $0x1b4] ss:$8 sps:$4 sm:$0xff]   ;;  %vm1145_vm10 = vcmp.ge.f32.partialorder %v1081_v7, 0.0  ;;  %v4743_v50 = vadd.f32 %v4086_v24, %v1001_v8  ;;  %v1269_v33 = vsel %vm1141_vm7, %v4600_v2, %v1205_v44 }
 0x20b   :  { %v4725_v10 = vld [vmem:[%s5447_s6 + $0x1b4] ss:$8 sps:$4 sm:$0xff]   ;;  %v4728_v3 = vmul.f32 0.01, %v4666_v37  ;;  %v4731_v17 = vmul.f32 0.01, %v4681_v14  ;;  %v1274_v55 = vsel %vm1146_vm9, %v1082_v5, %v1210_v25  ;;  %v4760_v8 = vadd.f32 %v4084_v23, %v1003_v59 }
 0x20c   :  { %v1209_v34 = vmul.f32 0.01, %v1081_v7  ;;  %v4737_v47 = vmul.f32 0.01, %v4691_v60  ;;  %v4740_v46 = vmul.f32 0.01, %v4694_v31  ;;  %1907 = vmatpush1.bf16.msra.mxu1 %v3506_v29  ;;  %2629 = vmatpush1.bf16.msra.mxu0 %v4709_v48  ;;  %v1007_v25 = vmul.f32 %v4076_v20, %v4595_v38 }
 0x20d   :  { %5503 = vst [vmem:[#allocation35_spill] sm:$0xff] %v4728_v3  ;;  %5504 = vst [vmem:[#allocation36_spill] sm:$0xff] %v4731_v17  ;;  %v4746_v3 = vadd.f32 %v4088_v27, %v1000_v45  ;;  %v1270_v17 = vsel %vm1142_vm8, %v4612_v19, %v1206_v4  ;;  %vm1149_vm11 = vcmp.ge.f32.partialorder %v4712_v62, 0.0  ;;  %v4763_v45 = vadd.f32 %v4086_v24, %v1005_v12  ;;  %v3512_v5 = vld [vmem:[%s5446_s5 + $0x1b0] ss:$8 sps:$4 sm:$0xff]  }
 0x20e   :  { %5505 = vst [vmem:[#allocation37_spill] sm:$0xff] %v4737_v47  ;;  %v4757_v47 = vadd.f32 %v4090_v28, %v1002_v57  ;;  %1334 = vst [vmem:[%s5450_s7 + $0x148] sm:$0xff] %v1270_v17  ;;  %1908 = vmatprep.subr.bf16.mxu1 %v3514_v9  ;;  %v4776_v19 = vadd.f32 %v4088_v27, %v1004_v51  ;;  %v1378_v12 = vpack.c.bf16 %v1274_v55, %v1270_v17  ;;  %v4787_v44 = vld [vmem:[%s5447_s6 + $0x1b0] ss:$8 sps:$4 sm:$0xff]   ;;  %v3520_v57 = vld [vmem:[%s5446_s5 + $0x1c4] ss:$8 sps:$4 sm:$0xff]  }
 0x20f   :  { %1338 = vst [vmem:[%s5450_s7 + $0x168] sm:$0xff] %v1274_v55  ;;  %1333 = vst [vmem:[%s5450_s7 + $0x140] sm:$0xff] %v1269_v33  ;;  %v1273_v2 = vsel %vm1145_vm10, %v1081_v7, %v1209_v34  ;;  %2630 = vmatprep.subr.bf16.mxu0 %v4725_v10  ;;  %vm1108_vm12 = vcmp.ge.f32.partialorder %v4241_v16, 0.0  ;;  %vm1112_vm13 = vcmp.ge.f32.partialorder %v4283_v39, 0.0  ;;  %v1213_v7 = vmul.f32 0.01, %v4712_v62 }
 0x210   :  { %v1006_v38 = vmul.f32 %v4082_v22, %v4539_v11  ;;  %1337 = vst [vmem:[%s5450_s7 + $0x160] sm:$0xff] %v1273_v2  ;;  %v1377_v29 = vpack.c.bf16 %v1273_v2, %v1269_v33  ;;  %v1008_v4 = vmul.f32 %v4080_v21, %v4619_v35  ;;  %v4806_v59 = vld [vmem:[%s5447_s6 + $0x1c4] ss:$8 sps:$4 sm:$0xff]   ;;  %v4809_v9 = vmul.f32 0.01, %v4743_v50  ;;  %1855 = vmatprep.mubr.bf16.mxu1 %v1378_v12 }
 0x211   :  { %5506 = vst [vmem:[#allocation38_spill] sm:$0xff] %v4806_v59  ;;  %vm1150_vm14 = vcmp.ge.f32.partialorder %v4746_v3, 0.0  ;;  %2577 = vmatprep.mubr.bf16.mxu0 %v1378_v12  ;;  %v4813_v11 = vadd.f32 %v4084_v23, %v1007_v25  ;;  %v1011_v35 = vmul.f32 %v4076_v20, %v4634_v63  ;;  %v3518_v33 = vld [vmem:[%s5446_s5 + $0x1c0] ss:$8 sps:$4 sm:$0xff]   ;;  %vm1111_vm15 = vcmp.ge.f32.partialorder %v4244_v18, 0.0  ;;  %1909 = vmatpush1.bf16.msra.mxu1 %v3512_v5 }
 0x212   :  { %v4823_v17 = vld [vmem:[%s5447_s6 + $0x1c0] ss:$8 sps:$4 sm:$0xff]   ;;  %vm1116_vm0 = vcmp.ge.f32.partialorder %v4296_v52, 0.0  ;;  %v1214_v34 = vmul.f32 0.01, %v4746_v3  ;;  %vm1153_vm1 = vcmp.ge.f32.partialorder %v4760_v8, 0.0  ;;  %1856 = vmatmul.mubr.bf16.gmra.mrb[52].mxu1 %v1377_v29  ;;  %2578 = vmatmul.mubr.bf16.gmra.mrb[84].mxu0 %v1377_v29  ;;  %v1094_v20 = vadd.f32 %v4088_v27, %v1008_v4 }
 0x213   :  { %v4829_v51 = vmul.f32 0.01, %v4757_v47  ;;  %vm1115_vm2 = vcmp.ge.f32.partialorder %v4286_v41, 0.0  ;;  %vm1120_vm3 = vcmp.ge.f32.partialorder %v4302_v54, 0.0  ;;  %v1217_v63 = vmul.f32 0.01, %v4760_v8  ;;  %2631 = vmatpush1.bf16.msra.mxu0 %v4787_v44  ;;  %1910 = vmatprep.subr.bf16.mxu1 %v3520_v57 }
 0x214   :  { %v4837_v55 = vmul.f32 0.01, %v4763_v45  ;;  %v1218_v12 = vmul.f32 0.01, %v4776_v19  ;;  %v4841_v2 = vadd.f32 %v4084_v23, %v1011_v35  ;;  %vm1154_vm6 = vcmp.ge.f32.partialorder %v4776_v19, 0.0  ;;  %2632 = vmatprep.subr.bf16.mxu0 %v4806_v59 }
 0x215   :  { %v4848_v25 = vadd.f32 %v4090_v28, %v1006_v38  ;;  %v1009_v29 = vmul.f32 %v4078_v1, %v4597_v61  ;;  %v1010_v4 = vmul.f32 %v4082_v22, %v4621_v49  ;;  %v3526_v23 = vld [vmem:[%s5446_s5 + $0x1d4] ss:$8 sps:$4 sm:$0xff]   ;;  %vm1157_vm10 = vcmp.ge.f32.partialorder %v4813_v11, 0.0  ;;  %1911 = vmatpush1.bf16.msra.mxu1 %v3518_v33  ;;  %v3532_v33 = vld [vmem:[%s5446_s5 + $0x1e4] ss:$8 sps:$4 sm:$0xff]  }
 0x216   :  { %v4861_v5 = vld [vmem:[%s5447_s6 + $0x1d4] ss:$8 sps:$4 sm:$0xff]   ;;  %v1221_v61 = vmul.f32 0.01, %v4813_v11  ;;  %v1222_v49 = vmul.f32 0.01, %v1094_v20  ;;  %v1013_v38 = vmul.f32 %v4078_v1, %v4636_v42  ;;  %v1012_v57 = vmul.f32 %v4080_v21, %v4658_v0  ;;  %1912 = vmatprep.subr.bf16.mxu1 %v3526_v23 }
 0x217   :  { %vm1127_vm4 = vcmp.ge.f32.partialorder %v4431_v6, 0.0  ;;  %vm1158_vm5 = vcmp.ge.f32.partialorder %v1094_v20, 0.0  ;;  %v1014_v35 = vmul.f32 %v4082_v22, %v4660_v32  ;;  %v1278_v59 = vsel %vm1150_vm14, %v4746_v3, %v1214_v34  ;;  %2633 = vmatpush1.bf16.msra.mxu0 %v4823_v17 }
 0x218   :  { %vm1131_vm9 = vcmp.ge.f32.partialorder %v4457_v40, 0.0  ;;  %vm1136_vm8 = vcmp.ge.f32.partialorder %v4562_v36, 0.0  ;;  %v1225_v1 = vmul.f32 0.01, %v4841_v2  ;;  %v1282_v42 = vsel %vm1154_vm6, %v4776_v19, %v1218_v12  ;;  %1342 = vst [vmem:[%s5450_s7 + $0x188] sm:$0xff] %v1278_v59  ;;  %2634 = vmatprep.subr.bf16.mxu0 %v4861_v5 }
 0x219   :  { %v1277_v21 = vsel %vm1149_vm11, %v4712_v62, %v1213_v7  ;;  %v1281_v22 = vsel %vm1153_vm1, %v4760_v8, %v1217_v63  ;;  %vm1135_vm14 = vcmp.ge.f32.partialorder %v4559_v30, 0.0  ;;  %v4898_v0 = vadd.f32 %v4086_v24, %v1009_v29  ;;  %1346 = vst [vmem:[%s5450_s7 + $0x1a8] sm:$0xff] %v1282_v42  ;;  %v3524_v8 = vld [vmem:[%s5446_s5 + $0x1d0] ss:$8 sps:$4 sm:$0xff]  }
 0x21a   :  { %v4901_v32 = vadd.f32 %v4090_v28, %v1010_v4  ;;  %vm1161_vm6 = vcmp.ge.f32.partialorder %v4841_v2, 0.0  ;;  %v1098_v62 = vadd.f32 %v4088_v27, %v1012_v57  ;;  %1341 = vst [vmem:[%s5450_s7 + $0x180] sm:$0xff] %v1277_v21  ;;  %1345 = vst [vmem:[%s5450_s7 + $0x1a0] sm:$0xff] %v1281_v22  ;;  %v1382_v27 = vpack.c.bf16 %v1282_v42, %v1278_v59  ;;  %v4923_v19 = vld [vmem:[%s5447_s6 + $0x1d0] ss:$8 sps:$4 sm:$0xff]  }
 0x21b   :  { %v1381_v3 = vpack.c.bf16 %v1281_v22, %v1277_v21  ;;  %v1286_v7 = vsel %vm1158_vm5, %v1094_v20, %v1222_v49  ;;  %v1285_v59 = vsel %vm1157_vm10, %v4813_v11, %v1221_v61  ;;  %vm1143_vm1 = vcmp.ge.f32.partialorder %v4666_v37, 0.0  ;;  %v4949_v11 = vld [vmem:[%s5447_s6 + $0x1e4] ss:$8 sps:$4 sm:$0xff]   ;;  %v5508_v29 = vld [vmem:[#allocation9_spill] sm:$0xff]  ;;  %1913 = vmatpush1.bf16.msra.mxu1 %v3524_v8  ;;  %2635 = vmatpush1.bf16.msra.mxu0 %v4923_v19  ;;  %v3530_v57 = vld [vmem:[%s5446_s5 + $0x1e0] ss:$8 sps:$4 sm:$0xff]  }
 0x21c   :  { %vm1147_vm11 = vcmp.ge.f32.partialorder %v4691_v60, 0.0  ;;  %v4935_v34 = vadd.f32 %v4086_v24, %v1013_v38  ;;  %vm1162_vm7 = vcmp.ge.f32.partialorder %v1098_v62, 0.0  ;;  %v1226_v63 = vmul.f32 0.01, %v1098_v62  ;;  %1350 = vst [vmem:[%s5450_s7 + $0x1c8] sm:$0xff] %v1286_v7  ;;  %1349 = vst [vmem:[%s5450_s7 + $0x1c0] sm:$0xff] %v1285_v59  ;;  %1865 = vmatprep.mubr.bf16.mxu1 %v1382_v27  ;;  %2587 = vmatprep.mubr.bf16.mxu0 %v1382_v27 }
 0x21d   :  { %v4938_v12 = vadd.f32 %v4090_v28, %v1014_v35  ;;  %v1289_v24 = vsel %vm1161_vm6, %v4841_v2, %v1225_v1  ;;  %v5507_v28 = vld [vmem:[#allocation6_spill] sm:$0xff]  ;;  %v1240_v4 = vsel %vm1112_vm13, %v4283_v39, %v5508_v29  ;;  %vm1151_vm5 = vcmp.ge.f32.partialorder %v4743_v50, 0.0  ;;  %1866 = vmatmul.mubr.bf16.gmra.mrb[56].mxu1 %v1381_v3  ;;  %2588 = vmatmul.mubr.bf16.gmra.mrb[88].mxu0 %v1381_v3  ;;  %v5510_v1 = vld [vmem:[#allocation13_spill] sm:$0xff]  ;;  %v5511_v21 = vld [vmem:[#allocation8_spill] sm:$0xff] }
 0x21e   :  { %v1236_v20 = vsel %vm1108_vm12, %v4241_v16, %v5507_v28  ;;  %vm1155_vm10 = vcmp.ge.f32.partialorder %v4763_v45, 0.0  ;;  %v4967_v23 = vmul.f32 0.01, %v4848_v25  ;;  %v1290_v2 = vsel %vm1162_vm7, %v1098_v62, %v1226_v63  ;;  %1353 = vst [vmem:[%s5450_s7 + $0x1e0] sm:$0xff] %v1289_v24  ;;  %v5509_v39 = vld [vmem:[#allocation2_spill] sm:$0xff]  ;;  %1304 = vst [vmem:[%s5450_s7 + $0x58] sm:$0xff] %v1240_v4  ;;  %1914 = vmatprep.subr.bf16.mxu1 %v3532_v33 }
 0x21f   :  { %v4973_v16 = vpack.c.bf16 %v1289_v24, %v1285_v59  ;;  %1300 = vst [vmem:[%s5450_s7 + $0x38] sm:$0xff] %v1236_v20  ;;  %v4979_v61 = vpack.c.bf16 %v1236_v20, %v5509_v39  ;;  %vm1159_vm12 = vcmp.ge.f32.partialorder %v4898_v0, 0.0  ;;  %v4986_v49 = vmul.f32 0.01, %v4898_v0  ;;  %1354 = vst [vmem:[%s5450_s7 + $0x1e8] sm:$0xff] %v1290_v2  ;;  %2636 = vmatprep.subr.bf16.mxu0 %v4949_v11  ;;  %v5513_v8 = vld [vmem:[#allocation16_spill] sm:$0xff] }
 0x220   :  { %v1386_v38 = vpack.c.bf16 %v1290_v2, %v1286_v7  ;;  %v4998_v35 = vld [vmem:[%s5447_s6 + $0x1e0] ss:$8 sps:$4 sm:$0xff]   ;;  %v1244_v42 = vsel %vm1116_vm0, %v4296_v52, %v5510_v1  ;;  %v1239_v22 = vsel %vm1111_vm15, %v4244_v18, %v5511_v21  ;;  %vm1160_vm13 = vcmp.ge.f32.partialorder %v4901_v32, 0.0  ;;  %v3538_v62 = vld [vmem:[%s5446_s5 + $0x1f4] ss:$8 sps:$4 sm:$0xff]   ;;  %1915 = vmatpush1.bf16.msra.mxu1 %v3530_v57 }
 0x221   :  { %v5016_v27 = vld [vmem:[%s5447_s6 + $0x1f4] ss:$8 sps:$4 sm:$0xff]   ;;  %1308 = vst [vmem:[%s5450_s7 + $0x78] sm:$0xff] %v1244_v42  ;;  %v5021_v52 = vpack.c.bf16 %v1244_v42, %v1240_v4  ;;  %1303 = vst [vmem:[%s5450_s7 + $0x50] sm:$0xff] %v1239_v22  ;;  %v1248_v7 = vsel %vm1120_vm3, %v4302_v54, %v5513_v8  ;;  %v5035_v33 = vmul.f32 0.01, %v4901_v32  ;;  %2637 = vmatpush1.bf16.msra.mxu0 %v4998_v35  ;;  %1916 = vmatprep.subr.bf16.mxu1 %v3538_v62 }
 0x222   :  { %v5512_v18 = vld [vmem:[#allocation12_spill] sm:$0xff]  ;;  %1875 = vmatprep.mubr.bf16.mxu1 %v1386_v38  ;;  %2597 = vmatprep.mubr.bf16.mxu0 %v1386_v38  ;;  %vm5515_vm15 = vcmp.ge.f32.partialorder %v4418_v58, 0.0  ;;  %1312 = vst [vmem:[%s5450_s7 + $0x98] sm:$0xff] %v1248_v7  ;;  %v5516_v54 = vld [vmem:[#allocation15_spill] sm:$0xff]  ;;  %vm5517_vm0 = vcmp.ge.f32.partialorder %v4299_v53, 0.0  ;;  %v5518_v20 = vld [vmem:[#allocation17_spill] sm:$0xff] }
 0x223   :  { %v1243_v3 = vsel %vm1115_vm2, %v4286_v41, %v5512_v18  ;;  %v5514_v41 = vld [vmem:[#allocation21_spill] sm:$0xff]  ;;  %v1247_v24 = vsel %vm5517_vm0, %v4299_v53, %v5516_v54  ;;  %vm5519_vm2 = vcmp.ge.f32.partialorder %v4305_v56, 0.0  ;;  %v5520_v29 = vld [vmem:[#allocation24_spill] sm:$0xff]  ;;  %vm5521_vm3 = vcmp.ge.f32.partialorder %v4448_v43, 0.0  ;;  %v5522_v4 = vld [vmem:[#allocation26_spill] sm:$0xff]  ;;  %2638 = vmatprep.subr.bf16.mxu0 %v5016_v27 }
 0x224   :  { %1307 = vst [vmem:[%s5450_s7 + $0x70] sm:$0xff] %v1243_v3  ;;  %v5040_v59 = vpack.c.bf16 %v1243_v3, %v1239_v22  ;;  %v1252_v63 = vsel %vm5515_vm15, %v4418_v58, %v5514_v41  ;;  %v1251_v58 = vsel %vm5519_vm2, %v4305_v56, %v5518_v20  ;;  %1311 = vst [vmem:[%s5450_s7 + $0x90] sm:$0xff] %v1247_v24  ;;  %vm5523_vm7 = vcmp.ge.f32.partialorder %v4477_v13, 0.0  ;;  %v3536_v57 = vld [vmem:[%s5446_s5 + $0x1f0] ss:$8 sps:$4 sm:$0xff]   ;;  %v5530_v8 = vld [vmem:[#allocation31_spill] sm:$0xff] }
 0x225   :  { %1316 = vst [vmem:[%s5450_s7 + $0xb8] sm:$0xff] %v1252_v63  ;;  %v5056_v28 = vpack.c.bf16 %v1252_v63, %v1248_v7  ;;  %v1256_v53 = vsel %vm5521_vm3, %v4448_v43, %v5520_v29  ;;  %v1260_v2 = vsel %vm5523_vm7, %v4477_v13, %v5522_v4  ;;  %vm1163_vm6 = vcmp.ge.f32.partialorder %v4935_v34, 0.0  ;;  %1315 = vst [vmem:[%s5450_s7 + $0xb0] sm:$0xff] %v1251_v58  ;;  %v5524_v13 = vld [vmem:[#allocation22_spill] sm:$0xff]  ;;  %v5099_v1 = vld [vmem:[%s5447_s6 + $0x1f0] ss:$8 sps:$4 sm:$0xff]  }
 0x226   :  { %v5078_v56 = vpack.c.bf16 %v1251_v58, %v1247_v24  ;;  %1320 = vst [vmem:[%s5450_s7 + $0xd8] sm:$0xff] %v1256_v53  ;;  %1324 = vst [vmem:[%s5450_s7 + $0xf8] sm:$0xff] %v1260_v2  ;;  %v5086_v43 = vpack.c.bf16 %v1260_v2, %v1256_v53  ;;  %v1255_v39 = vsel %vm1127_vm4, %v4431_v6, %v5524_v13  ;;  %v1227_v38 = vmul.f32 0.01, %v4935_v34  ;;  %v5525_v42 = vld [vmem:[#allocation25_spill] sm:$0xff]  ;;  %v5526_v6 = vld [vmem:[#allocation30_spill] sm:$0xff] }
 0x227   :  { %v1259_v21 = vsel %vm1131_vm9, %v4457_v40, %v5525_v42  ;;  %1319 = vst [vmem:[%s5450_s7 + $0xd0] sm:$0xff] %v1255_v39  ;;  %v1264_v22 = vsel %vm1136_vm8, %v4562_v36, %v5526_v6  ;;  %v5527_v62 = vld [vmem:[#allocation32_spill] sm:$0xff]  ;;  %vm5528_vm4 = vcmp.ge.f32.partialorder %v4586_v15, 0.0  ;;  %v5529_v36 = vld [vmem:[#allocation29_spill] sm:$0xff]  ;;  %vm5531_vm8 = vcmp.ge.f32.partialorder %v4583_v26, 0.0  ;;  %1876 = vmatmul.mubr.bf16.gmra.mrb[60].mxu1 %v4973_v16  ;;  %2598 = vmatmul.mubr.bf16.gmra.mrb[92].mxu0 %v4973_v16  ;;  %v5535_v54 = vld [vmem:[#allocation35_spill] sm:$0xff] }
 0x228   :  { %v1268_v18 = vsel %vm5528_vm4, %v4586_v15, %v5527_v62  ;;  %1323 = vst [vmem:[%s5450_s7 + $0xf0] sm:$0xff] %v1259_v21  ;;  %v5120_v3 = vpack.c.bf16 %v1259_v21, %v1255_v39  ;;  %1328 = vst [vmem:[%s5450_s7 + $0x118] sm:$0xff] %v1264_v22  ;;  %v1263_v15 = vsel %vm1135_vm14, %v4559_v30, %v5529_v36  ;;  %v1228_v41 = vmul.f32 0.01, %v4938_v12  ;;  %v5532_v63 = vld [vmem:[#allocation36_spill] sm:$0xff]  ;;  %v5541_v4 = vld [vmem:[#allocation5_spill] sm:$0xff] }
 0x229   :  { %1332 = vst [vmem:[%s5450_s7 + $0x138] sm:$0xff] %v1268_v18  ;;  %v5128_v40 = vpack.c.bf16 %v1268_v18, %v1264_v22  ;;  %v1267_v7 = vsel %vm5531_vm8, %v4583_v26, %v5530_v8  ;;  %1327 = vst [vmem:[%s5450_s7 + $0x110] sm:$0xff] %v1263_v15  ;;  %vm5533_vm9 = vcmp.ge.f32.partialorder %v4681_v14, 0.0  ;;  %vm5534_vm14 = vcmp.ge.f32.partialorder %v4694_v31, 0.0  ;;  %1918 = vmatprep.mubr.bf16.mxu1 %v4979_v61  ;;  %v3542_v20 = vld [vmem:[%s5447_s6 + $0x104] ss:$8 sps:$4 sm:$0xff]  }
 0x22a   :  { %1331 = vst [vmem:[%s5450_s7 + $0x130] sm:$0xff] %v1267_v7  ;;  %v5147_v30 = vpack.c.bf16 %v1267_v7, %v1263_v15  ;;  %v1272_v26 = vsel %vm5533_vm9, %v4681_v14, %v5532_v63  ;;  %v1276_v16 = vsel %vm5534_vm14, %v4694_v31, %v4740_v46  ;;  %vm1164_vm15 = vcmp.ge.f32.partialorder %v4938_v12, 0.0  ;;  %2640 = vmatprep.mubr.bf16.mxu0 %v4979_v61  ;;  %v5536_v46 = vld [vmem:[#allocation37_spill] sm:$0xff]  ;;  %v5540_v53 = vld [vmem:[#allocation4_spill] sm:$0xff]  ;;  %v5544_v2 = vld [vmem:[#allocation10_spill] sm:$0xff] }
 0x22b   :  { %1336 = vst [vmem:[%s5450_s7 + $0x158] sm:$0xff] %v1272_v26  ;;  %1340 = vst [vmem:[%s5450_s7 + $0x178] sm:$0xff] %v1276_v16  ;;  %v5166_v14 = vpack.c.bf16 %v1276_v16, %v1272_v26  ;;  %v1271_v31 = vsel %vm1143_vm1, %v4666_v37, %v5535_v54  ;;  %v1275_v61 = vsel %vm1147_vm11, %v4691_v60, %v5536_v46  ;;  %1917 = vmatpush1.bf16.msra.mxu1 %v3536_v57  ;;  %v3548_v29 = vld [vmem:[%s5447_s6 + $0x134] ss:$8 sps:$4 sm:$0xff]   ;;  %v5545_v13 = vld [vmem:[#allocation14_spill] sm:$0xff] }
 0x22c   :  { %2639 = vmatpush1.bf16.msra.mxu0 %v5099_v1  ;;  %1335 = vst [vmem:[%s5450_s7 + $0x150] sm:$0xff] %v1271_v31  ;;  %1339 = vst [vmem:[%s5450_s7 + $0x170] sm:$0xff] %v1275_v61  ;;  %v5183_v24 = vpack.c.bf16 %v1275_v61, %v1271_v31  ;;  %vm5537_vm1 = vcmp.ge.f32.partialorder %v4757_v47, 0.0  ;;  %vm5538_vm11 = vcmp.ge.f32.partialorder %v4848_v25, 0.0  ;;  %3125 = vmatprep.subr.bf16.mxu1 %v3542_v20  ;;  %v5546_v39 = vld [vmem:[#allocation18_spill] sm:$0xff]  ;;  %v5550_v57 = vld [vmem:[#allocation27_spill] sm:$0xff] }
 0x22d   :  { %v1280_v37 = vsel %vm5537_vm1, %v4757_v47, %v4829_v51  ;;  %v1284_v60 = vsel %vm5538_vm11, %v4848_v25, %v4967_v23  ;;  %v1279_v47 = vsel %vm1151_vm5, %v4743_v50, %v4809_v9  ;;  %v1283_v51 = vsel %vm1155_vm10, %v4763_v45, %v4837_v55  ;;  %v5551_v42 = vld [vmem:[#allocation28_spill] sm:$0xff]  ;;  %v5552_v21 = vld [vmem:[#allocation33_spill] sm:$0xff]  ;;  %v5553_v6 = vld [vmem:[#allocation34_spill] sm:$0xff] }
 0x22e   :  { %1344 = vst [vmem:[%s5450_s7 + $0x198] sm:$0xff] %v1280_v37  ;;  %1348 = vst [vmem:[%s5450_s7 + $0x1b8] sm:$0xff] %v1284_v60  ;;  %v5202_v58 = vpack.c.bf16 %v1284_v60, %v1280_v37  ;;  %v1288_v25 = vsel %vm1160_vm13, %v4901_v32, %v5035_v33  ;;  %v5222_v23 = vpack.c.bf16 %v1283_v51, %v1279_v47  ;;  %v3546_v33 = vld [vmem:[%s5447_s6 + $0x124] ss:$8 sps:$4 sm:$0xff]  }
 0x22f   :  { %1343 = vst [vmem:[%s5450_s7 + $0x190] sm:$0xff] %v1279_v47  ;;  %1347 = vst [vmem:[%s5450_s7 + $0x1b0] sm:$0xff] %v1283_v51  ;;  %v1292_v50 = vsel %vm1164_vm15, %v4938_v12, %v1228_v41  ;;  %v1287_v45 = vsel %vm1159_vm12, %v4898_v0, %v4986_v49  ;;  %v1291_v9 = vsel %vm1163_vm6, %v4935_v34, %v1227_v38  ;;  %v5539_v0 = vld [vmem:[#allocation3_spill] sm:$0xff]  ;;  %v3544_v12 = vld [vmem:[%s5447_s6 + $0x114] ss:$8 sps:$4 sm:$0xff]  }
 0x230   :  { %1352 = vst [vmem:[%s5450_s7 + $0x1d8] sm:$0xff] %v1288_v25  ;;  %1356 = vst [vmem:[%s5450_s7 + $0x1f8] sm:$0xff] %v1292_v50  ;;  %v5240_v55 = vpack.c.bf16 %v1292_v50, %v1288_v25  ;;  %v5248_v32 = vpack.c.bf16 %v1291_v9, %v1287_v45  ;;  %1919 = vmatmul.mubr.bf16.vlgmr.msra.gmra.mrb[32].mxu1 %v5539_v0  ;;  %2641 = vmatmul.mubr.bf16.vlgmr.msra.gmra.mrb[64].mxu0 %v5539_v0  ;;  %v3543_v34 = vld [vmem:[%s5447_s6 + $0x100] ss:$8 sps:$4 sm:$0xff]   ;;  %v3545_v49 = vld [vmem:[%s5447_s6 + $0x110] ss:$8 sps:$4 sm:$0xff]  }
 0x231   :  { %1351 = vst [vmem:[%s5450_s7 + $0x1d0] sm:$0xff] %v1287_v45  ;;  %1355 = vst [vmem:[%s5450_s7 + $0x1f0] sm:$0xff] %v1291_v9  ;;  %3141 = vmatpush1.bf16.msra.mxu1 %v3543_v34  ;;  %1928 = vmatprep.mubr.bf16.mxu1 %v5021_v52  ;;  %v5548_v38 = vld [vmem:[#allocation20_spill] sm:$0xff]  ;;  %v5554_v22 = vld [vmem:[#allocation38_spill] sm:$0xff] }
 0x232   :  { %2650 = vmatprep.mubr.bf16.mxu0 %v5021_v52  ;;  %3126 = vmatprep.subr.bf16.mxu1 %v3544_v12  ;;  %v3547_v52 = vld [vmem:[%s5447_s6 + $0x120] ss:$8 sps:$4 sm:$0xff]  }
 0x235   :  { %3142 = vmatpush1.bf16.msra.mxu1 %v3545_v49 }
 0x236   :  { %3127 = vmatprep.subr.bf16.mxu1 %v3546_v33 }
 0x238   :  { %1929 = vmatmul.mubr.bf16.gmra.mrb[36].mxu1 %v5040_v59  ;;  %2651 = vmatmul.mubr.bf16.gmra.mrb[68].mxu0 %v5040_v59  ;;  %v5542_v59 = vld [vmem:[#allocation7_spill] sm:$0xff] }
 0x239   :  { %3143 = vmatpush1.bf16.msra.mxu1 %v3547_v52  ;;  %1938 = vmatprep.mubr.bf16.mxu1 %v5056_v28 }
 0x23a   :  { %2660 = vmatprep.mubr.bf16.mxu0 %v5056_v28  ;;  %3128 = vmatprep.subr.bf16.mxu1 %v3548_v29  ;;  %v5543_v28 = vld [vmem:[#allocation11_spill] sm:$0xff] }
 0x23d   :  { %3144 = vmatpush1.bf16.msra.mxu1 %v5540_v53 }
 0x23e   :  { %3129 = vmatprep.subr.bf16.mxu1 %v5541_v4 }
 0x240   :  { %1939 = vmatmul.mubr.bf16.gmra.mrb[40].mxu1 %v5078_v56  ;;  %2661 = vmatmul.mubr.bf16.gmra.mrb[72].mxu0 %v5078_v56  ;;  %v5547_v56 = vld [vmem:[#allocation19_spill] sm:$0xff] }
 0x241   :  { %3145 = vmatpush1.bf16.msra.mxu1 %v5542_v59  ;;  %1948 = vmatprep.mubr.bf16.mxu1 %v5086_v43 }
 0x242   :  { %2670 = vmatprep.mubr.bf16.mxu0 %v5086_v43  ;;  %3130 = vmatprep.subr.bf16.mxu1 %v5543_v28  ;;  %v5549_v43 = vld [vmem:[#allocation23_spill] sm:$0xff] }
 0x245   :  { %3146 = vmatpush1.bf16.msra.mxu1 %v5544_v2 }
 0x246   :  { %3131 = vmatprep.subr.bf16.mxu1 %v5545_v13 }
 0x248   :  { %1949 = vmatmul.mubr.bf16.gmra.mrb[44].mxu1 %v5120_v3  ;;  %2671 = vmatmul.mubr.bf16.gmra.mrb[76].mxu0 %v5120_v3 }
 0x249   :  { %3147 = vmatpush1.bf16.msra.mxu1 %v5546_v39  ;;  %1958 = vmatprep.mubr.bf16.mxu1 %v5128_v40 }
 0x24a   :  { %2680 = vmatprep.mubr.bf16.mxu0 %v5128_v40  ;;  %3132 = vmatprep.subr.bf16.mxu1 %v5547_v56 }
 0x24d   :  { %3148 = vmatpush1.bf16.msra.mxu1 %v5548_v38 }
 0x24e   :  { %3133 = vmatprep.subr.bf16.mxu1 %v5549_v43 }
 0x250   :  { %1959 = vmatmul.mubr.bf16.gmra.mrb[48].mxu1 %v5147_v30  ;;  %2681 = vmatmul.mubr.bf16.gmra.mrb[80].mxu0 %v5147_v30 }
 0x251   :  { %3149 = vmatpush1.bf16.msra.mxu1 %v5550_v57  ;;  %1968 = vmatprep.mubr.bf16.mxu1 %v5166_v14 }
 0x252   :  { %2690 = vmatprep.mubr.bf16.mxu0 %v5166_v14  ;;  %3134 = vmatprep.subr.bf16.mxu1 %v5551_v42 }
 0x255   :  { %3150 = vmatpush1.bf16.msra.mxu1 %v5552_v21 }
 0x256   :  { %3135 = vmatprep.subr.bf16.mxu1 %v5553_v6 }
 0x258   :  { %1969 = vmatmul.mubr.bf16.gmra.mrb[52].mxu1 %v5183_v24  ;;  %2691 = vmatmul.mubr.bf16.gmra.mrb[84].mxu0 %v5183_v24 }
 0x259   :  { %3151 = vmatpush1.bf16.msra.mxu1 %v4709_v48  ;;  %1978 = vmatprep.mubr.bf16.mxu1 %v5202_v58 }
 0x25a   :  { %3136 = vmatprep.subr.bf16.mxu1 %v4725_v10 }
 0x25d   :  { %3152 = vmatpush1.bf16.msra.mxu1 %v4787_v44 }
 0x25e   :  { %3137 = vmatprep.subr.bf16.mxu1 %v5554_v22 }
 0x260   :  { %1979 = vmatmul.mubr.bf16.gmra.mrb[56].mxu1 %v5222_v23 }
 0x261   :  { %3153 = vmatpush1.bf16.msra.mxu1 %v4823_v17  ;;  %1988 = vmatprep.mubr.bf16.mxu1 %v5240_v55 }
 0x262   :  { %3138 = vmatprep.subr.bf16.mxu1 %v4861_v5 }
 0x265   :  { %3154 = vmatpush1.bf16.msra.mxu1 %v4923_v19 }
 0x266   :  { %3139 = vmatprep.subr.bf16.mxu1 %v4949_v11 }
 0x268   :  { %1989 = vmatmul.mubr.bf16.gmra.mrb[60].mxu1 %v5248_v32 }
 0x269   :  { %3155 = vmatpush1.bf16.msra.mxu1 %v4998_v35  ;;  %2700 = vmatprep.mubr.bf16.mxu1 %v5202_v58 }
 0x26a   :  { %3140 = vmatprep.subr.bf16.mxu1 %v5016_v27 }
 0x26d   :  { %3156 = vmatpush1.bf16.msra.mxu1 %v5099_v1 }
 0x270   :  { %2701 = vmatmul.mubr.bf16.vlgmr.msra.gmra.mrb[64].mxu1 %v5222_v23 }
 0x271   :  { %2710 = vmatprep.mubr.bf16.mxu1 %v5240_v55 }
 0x278   :  { %2711 = vmatmul.mubr.bf16.gmra.mrb[68].mxu1 %v5248_v32 }
 0x2f0   :  { %v5323_v48 = vpop.f32.mrb[88].mxu0 }
 0x2f1   :  { %v5325_v10 = vpop.f32.mrb[89].mxu0 }
 0x2f2   :  { %v5327_v44 = vpop.f32.mrb[90].mxu0 }
 0x2f3   :  { %v5329_v17 = vpop.f32.mrb[91].mxu0 }
 0x2fa   :  { %v5331_v5 = vpop.f32.mrb[92].mxu0 }
 0x2fb   :  { %v5333_v19 = vpop.f32.mrb[93].mxu0 }
 0x2fc   :  { %v5335_v11 = vpop.f32.mrb[94].mxu0 }
 0x2fd   :  { %v5337_v35 = vpop.f32.mrb[95].mxu0 }
 0x303   :  { %v1920_v27 = vpop.f32.mrb[32].mxu1  ;;  %v2642_v1 = vpop.f32.mrb[64].mxu0 }
 0x304   :  { %v1922_v62 = vpop.f32.mrb[33].mxu1  ;;  %v2644_v18 = vpop.f32.mrb[65].mxu0 }
 0x305   :  { %v3093_v3 = vpack.c.bf16 %v1922_v62, %v1920_v27  ;;  %v3109_v40 = vpack.c.bf16 %v2644_v18, %v2642_v1  ;;  %v1924_v36 = vpop.f32.mrb[34].mxu1  ;;  %v2646_v15 = vpop.f32.mrb[66].mxu0 }
 0x306   :  { %v1926_v8 = vpop.f32.mrb[35].mxu1  ;;  %v2648_v7 = vpop.f32.mrb[67].mxu0 }
 0x307   :  { %2095 = vst [vmem:[%s5451_s8] sm:$0xff] %v3093_v3  ;;  %2817 = vst [vmem:[%s5452_s9] sm:$0xff] %v3109_v40  ;;  %v3094_v41 = vpack.c.bf16 %v1926_v8, %v1924_v36  ;;  %v3110_v30 = vpack.c.bf16 %v2648_v7, %v2646_v15 }
 0x309   :  { %2096 = vst [vmem:[%s5451_s8 + $0x8] sm:$0xff] %v3094_v41  ;;  %2818 = vst [vmem:[%s5452_s9 + $0x8] sm:$0xff] %v3110_v30 }
 0x30b   :  { %v1930_v63 = vpop.f32.mrb[36].mxu1  ;;  %v2652_v26 = vpop.f32.mrb[68].mxu0 }
 0x30c   :  { %v1932_v16 = vpop.f32.mrb[37].mxu1  ;;  %v2654_v14 = vpop.f32.mrb[69].mxu0 }
 0x30d   :  { %v3095_v54 = vpack.c.bf16 %v1932_v16, %v1930_v63  ;;  %v3111_v31 = vpack.c.bf16 %v2654_v14, %v2652_v26  ;;  %v1934_v46 = vpop.f32.mrb[38].mxu1  ;;  %v2656_v61 = vpop.f32.mrb[70].mxu0 }
 0x30e   :  { %v1936_v24 = vpop.f32.mrb[39].mxu1  ;;  %v2658_v37 = vpop.f32.mrb[71].mxu0 }
 0x30f   :  { %2097 = vst [vmem:[%s5451_s8 + $0x10] sm:$0xff] %v3095_v54  ;;  %2819 = vst [vmem:[%s5452_s9 + $0x10] sm:$0xff] %v3111_v31  ;;  %v3096_v60 = vpack.c.bf16 %v1936_v24, %v1934_v46  ;;  %v3112_v20 = vpack.c.bf16 %v2658_v37, %v2656_v61 }
 0x311   :  { %2098 = vst [vmem:[%s5451_s8 + $0x18] sm:$0xff] %v3096_v60  ;;  %2820 = vst [vmem:[%s5452_s9 + $0x18] sm:$0xff] %v3112_v20 }
 0x313   :  { %v1940_v58 = vpop.f32.mrb[40].mxu1  ;;  %v2662_v47 = vpop.f32.mrb[72].mxu0 }
 0x314   :  { %v1942_v51 = vpop.f32.mrb[41].mxu1  ;;  %v2664_v25 = vpop.f32.mrb[73].mxu0 }
 0x315   :  { %v3097_v23 = vpack.c.bf16 %v1942_v51, %v1940_v58  ;;  %v3113_v50 = vpack.c.bf16 %v2664_v25, %v2662_v47  ;;  %v1944_v45 = vpop.f32.mrb[42].mxu1  ;;  %v2666_v9 = vpop.f32.mrb[74].mxu0 }
 0x316   :  { %v1946_v55 = vpop.f32.mrb[43].mxu1  ;;  %v2668_v32 = vpop.f32.mrb[75].mxu0 }
 0x317   :  { %2099 = vst [vmem:[%s5451_s8 + $0x20] sm:$0xff] %v3097_v23  ;;  %2821 = vst [vmem:[%s5452_s9 + $0x20] sm:$0xff] %v3113_v50  ;;  %v3098_v0 = vpack.c.bf16 %v1946_v55, %v1944_v45  ;;  %v3114_v34 = vpack.c.bf16 %v2668_v32, %v2666_v9 }
 0x319   :  { %2100 = vst [vmem:[%s5451_s8 + $0x28] sm:$0xff] %v3098_v0  ;;  %2822 = vst [vmem:[%s5452_s9 + $0x28] sm:$0xff] %v3114_v34 }
 0x31b   :  { %v1950_v12 = vpop.f32.mrb[44].mxu1  ;;  %v2672_v49 = vpop.f32.mrb[76].mxu0 }
 0x31c   :  { %v1952_v33 = vpop.f32.mrb[45].mxu1  ;;  %v2674_v52 = vpop.f32.mrb[77].mxu0 }
 0x31d   :  { %v3099_v29 = vpack.c.bf16 %v1952_v33, %v1950_v12  ;;  %v3115_v53 = vpack.c.bf16 %v2674_v52, %v2672_v49  ;;  %v1954_v4 = vpop.f32.mrb[46].mxu1  ;;  %v2676_v59 = vpop.f32.mrb[78].mxu0 }
 0x31e   :  { %v1956_v28 = vpop.f32.mrb[47].mxu1  ;;  %v2678_v2 = vpop.f32.mrb[79].mxu0 }
 0x31f   :  { %2101 = vst [vmem:[%s5451_s8 + $0x30] sm:$0xff] %v3099_v29  ;;  %2823 = vst [vmem:[%s5452_s9 + $0x30] sm:$0xff] %v3115_v53  ;;  %v3100_v13 = vpack.c.bf16 %v1956_v28, %v1954_v4  ;;  %v3116_v39 = vpack.c.bf16 %v2678_v2, %v2676_v59 }
 0x321   :  { %2102 = vst [vmem:[%s5451_s8 + $0x38] sm:$0xff] %v3100_v13  ;;  %2824 = vst [vmem:[%s5452_s9 + $0x38] sm:$0xff] %v3116_v39 }
 0x323   :  { %v1960_v56 = vpop.f32.mrb[48].mxu1  ;;  %v2682_v38 = vpop.f32.mrb[80].mxu0 }
 0x324   :  { %v1962_v43 = vpop.f32.mrb[49].mxu1  ;;  %v2684_v57 = vpop.f32.mrb[81].mxu0 }
 0x325   :  { %v3101_v42 = vpack.c.bf16 %v1962_v43, %v1960_v56  ;;  %v3117_v21 = vpack.c.bf16 %v2684_v57, %v2682_v38  ;;  %v1964_v6 = vpop.f32.mrb[50].mxu1  ;;  %v2686_v22 = vpop.f32.mrb[82].mxu0 }
 0x326   :  { %v1966_v27 = vpop.f32.mrb[51].mxu1  ;;  %v2688_v1 = vpop.f32.mrb[83].mxu0 }
 0x327   :  { %2103 = vst [vmem:[%s5451_s8 + $0x40] sm:$0xff] %v3101_v42  ;;  %2825 = vst [vmem:[%s5452_s9 + $0x40] sm:$0xff] %v3117_v21  ;;  %v3102_v62 = vpack.c.bf16 %v1966_v27, %v1964_v6  ;;  %v3118_v18 = vpack.c.bf16 %v2688_v1, %v2686_v22 }
 0x329   :  { %2104 = vst [vmem:[%s5451_s8 + $0x48] sm:$0xff] %v3102_v62  ;;  %2826 = vst [vmem:[%s5452_s9 + $0x48] sm:$0xff] %v3118_v18 }
 0x32b   :  { %v1970_v3 = vpop.f32.mrb[52].mxu1  ;;  %v2692_v40 = vpop.f32.mrb[84].mxu0 }
 0x32c   :  { %v1972_v36 = vpop.f32.mrb[53].mxu1  ;;  %v2694_v15 = vpop.f32.mrb[85].mxu0 }
 0x32d   :  { %v3103_v8 = vpack.c.bf16 %v1972_v36, %v1970_v3  ;;  %v3119_v7 = vpack.c.bf16 %v2694_v15, %v2692_v40  ;;  %v1974_v41 = vpop.f32.mrb[54].mxu1  ;;  %v2696_v30 = vpop.f32.mrb[86].mxu0 }
 0x32e   :  { %v1976_v63 = vpop.f32.mrb[55].mxu1  ;;  %v2698_v26 = vpop.f32.mrb[87].mxu0 }
 0x32f   :  { %2105 = vst [vmem:[%s5451_s8 + $0x50] sm:$0xff] %v3103_v8  ;;  %2827 = vst [vmem:[%s5452_s9 + $0x50] sm:$0xff] %v3119_v7  ;;  %v3104_v16 = vpack.c.bf16 %v1976_v63, %v1974_v41  ;;  %v3120_v14 = vpack.c.bf16 %v2698_v26, %v2696_v30 }
 0x331   :  { %2106 = vst [vmem:[%s5451_s8 + $0x58] sm:$0xff] %v3104_v16  ;;  %2828 = vst [vmem:[%s5452_s9 + $0x58] sm:$0xff] %v3120_v14 }
 0x333   :  { %v1980_v54 = vpop.f32.mrb[56].mxu1 }
 0x334   :  { %v1982_v31 = vpop.f32.mrb[57].mxu1 }
 0x335   :  { %v3105_v46 = vpack.c.bf16 %v1982_v31, %v1980_v54  ;;  %v1984_v61 = vpop.f32.mrb[58].mxu1 }
 0x336   :  { %v1986_v24 = vpop.f32.mrb[59].mxu1 }
 0x337   :  { %2107 = vst [vmem:[%s5451_s8 + $0x60] sm:$0xff] %v3105_v46  ;;  %v3106_v37 = vpack.c.bf16 %v1986_v24, %v1984_v61 }
 0x339   :  { %2108 = vst [vmem:[%s5451_s8 + $0x68] sm:$0xff] %v3106_v37 }
 0x33b   :  { %v1990_v60 = vpop.f32.mrb[60].mxu1 }
 0x33c   :  { %v1992_v20 = vpop.f32.mrb[61].mxu1 }
 0x33d   :  { %v3107_v58 = vpack.c.bf16 %v1992_v20, %v1990_v60  ;;  %v1994_v47 = vpop.f32.mrb[62].mxu1 }
 0x33e   :  { %v1996_v51 = vpop.f32.mrb[63].mxu1 }
 0x33f   :  { %2109 = vst [vmem:[%s5451_s8 + $0x70] sm:$0xff] %v3107_v58  ;;  %v3108_v25 = vpack.c.bf16 %v1996_v51, %v1994_v47 }
 0x341   :  { %2110 = vst [vmem:[%s5451_s8 + $0x78] sm:$0xff] %v3108_v25 }
 0x343   :  { %v2702_v23 = vpop.f32.mrb[64].mxu1 }
 0x344   :  { %v2703_v50 = vadd.f32 %v2702_v23, %v5323_v48  ;;  %v2704_v45 = vpop.f32.mrb[65].mxu1 }
 0x345   :  { %v2705_v9 = vadd.f32 %v2704_v45, %v5325_v10  ;;  %v2706_v55 = vpop.f32.mrb[66].mxu1 }
 0x346   :  { %v2707_v32 = vadd.f32 %v2706_v55, %v5327_v44  ;;  %v2708_v0 = vpop.f32.mrb[67].mxu1 }
 0x347   :  { %v3121_v34 = vpack.c.bf16 %v2705_v9, %v2703_v50  ;;  %v2709_v12 = vadd.f32 %v2708_v0, %v5329_v17 }
 0x349   :  { %2829 = vst [vmem:[%s5452_s9 + $0x60] sm:$0xff] %v3121_v34  ;;  %v3122_v49 = vpack.c.bf16 %v2709_v12, %v2707_v32 }
 0x34b   :  { %2830 = vst [vmem:[%s5452_s9 + $0x68] sm:$0xff] %v3122_v49  ;;  %v2712_v48 = vpop.f32.mrb[68].mxu1 }
 0x34c   :  { %v2713_v33 = vadd.f32 %v2712_v48, %v5331_v5  ;;  %v2714_v10 = vpop.f32.mrb[69].mxu1 }
 0x34d   :  { %v2715_v52 = vadd.f32 %v2714_v10, %v5333_v19  ;;  %v2716_v44 = vpop.f32.mrb[70].mxu1 }
 0x34e   :  { %v2717_v29 = vadd.f32 %v2716_v44, %v5335_v11  ;;  %v2718_v53 = vpop.f32.mrb[71].mxu1 }
 0x34f   :  { %v3123_v17 = vpack.c.bf16 %v2715_v52, %v2713_v33  ;;  %v2719_v4 = vadd.f32 %v2718_v53, %v5337_v35 }
 0x351   :  { %2831 = vst [vmem:[%s5452_s9 + $0x70] sm:$0xff] %v3123_v17  ;;  %v3124_v59 = vpack.c.bf16 %v2719_v4, %v2717_v29 }
 0x353   :  { %2832 = vst [vmem:[%s5452_s9 + $0x78] sm:$0xff] %v3124_v59 }

// kernel: gnn_forward.7
= control target key start
LH: loop header
LB: loop body
LE: loop exit
PB: predicated region body
PF: predicated region fallthrough
CT: control target
= control target key end

     0   :  { %v2473_v0 = vmov 0   ;;  %v543_v4 = vlaneseq  ;;  %vm2015_vm0 = vcmask 7168   ;;  %s3665_s3 = inlined_call_operand.vmem [shape: bf16[256,128], index: 3, kind: input, shape index: {}]   ;;  %s3666_s0 = inlined_call_operand.vmem [shape: bf16[512,256], index: 0, kind: input, shape index: {}]   ;;  %s3667_s1 = inlined_call_operand.vmem [shape: bf16[512,256], index: 1, kind: input, shape index: {}]   ;;  %s3668_s2 = inlined_call_operand.vmem [shape: f32[1,256], index: 2, kind: input, shape index: {}]   ;;  %s3669_s4 = inlined_call_operand.vmem [shape: f32[1,128], index: 4, kind: input, shape index: {}]   ;;  %s3670_s5 = inlined_call_operand.vmem [shape: f32[1,128], index: 5, kind: input, shape index: {}]   ;;  %s3671_s6 = inlined_call_operand.<no memory space> [shape: f32[1,1], index: 6, kind: input, shape index: {}]   ;;  %s3672_s7 = inlined_call_operand.vmem [shape: f32[512,1], index: 7, kind: output, shape index: {}]  }
   0x1   :  { %1008 = vmatprep.subr.bf16.mxu0 %v2473_v0  ;;  %2167 = vmatprep.subr.bf16.mxu1 %v2473_v0  ;;  %v2200_v1 = vld [vmem:[%s3665_s3] sm:$0xff]   ;;  %v2201_v2 = vld [vmem:[%s3665_s3 + $0x8] sm:$0xff]   ;;  %v2202_v3 = vld [vmem:[%s3665_s3 + $0x10] sm:$0xff]  }
   0x2   :  { %1009 = vmatpush1.bf16.msra.mxu0 %v2200_v1  ;;  %2183 = vmatpush1.bf16.msra.mxu1 %v2200_v1  ;;  %v2203_v5 = vld [vmem:[%s3665_s3 + $0x18] sm:$0xff]   ;;  %v544_v6 = vshrl.u32 %v543_v4, 7  ;;  %v2204_v7 = vld [vmem:[%s3665_s3 + $0x20] sm:$0xff]   ;;  %v2205_v10 = vld [vmem:[%s3665_s3 + $0x28] sm:$0xff]  }
   0x3   :  { %1010 = vmatprep.subr.bf16.mxu0 %v2473_v0  ;;  %2168 = vmatprep.subr.bf16.mxu1 %v2473_v0  ;;  %v29_v11 = vld [vmem:[%s3666_s0] sm:$0xff]  ;;  %v30_v12 = vld [vmem:[%s3666_s0 + $0x8] sm:$0xff]  ;;  %v2578_v32 = vld [vmem:[%s3666_s0 + $0x10] sm:$0xff] }
   0x4   :  { %v545_v8 = vsub.s32 0, %v544_v6  ;;  %v549_v9 = vsub.s32 1, %v544_v6  ;;  %v221_v13 = vld [vmem:[%s3667_s1] sm:$0xff]  ;;  %v93_v14 = vunpack.c.l.bf16 %v29_v11  ;;  %v94_v15 = vunpack.c.h.bf16 %v29_v11  ;;  %v222_v18 = vld [vmem:[%s3667_s1 + $0x8] sm:$0xff]  ;;  %v2583_v37 = vld [vmem:[%s3666_s0 + $0x18] sm:$0xff] }
   0x5   :  { %v95_v16 = vunpack.c.l.bf16 %v30_v12  ;;  %v96_v17 = vunpack.c.h.bf16 %v30_v12  ;;  %v541_v19 = vld [vmem:[%s3668_s2] sm:$0x3]  ;;  %v285_v21 = vunpack.c.l.bf16 %v221_v13  ;;  %v286_v22 = vunpack.c.h.bf16 %v221_v13  ;;  %v62_v25 = vld [vmem:[%s3666_s0 + $0x108] sm:$0xff]  ;;  %v2206_v42 = vld [vmem:[%s3665_s3 + $0x30] sm:$0xff]  }
   0x6   :  { %1011 = vmatpush1.bf16.msra.mxu0 %v2201_v2  ;;  %2184 = vmatpush1.bf16.msra.mxu1 %v2201_v2  ;;  %v61_v20 = vld [vmem:[%s3666_s0 + $0x100] sm:$0xff]  ;;  %v287_v23 = vunpack.c.l.bf16 %v222_v18  ;;  %v288_v24 = vunpack.c.h.bf16 %v222_v18  ;;  %v254_v27 = vld [vmem:[%s3667_s1 + $0x108] sm:$0xff]  ;;  %v2571_v28 = vrot.slane %v541_v19, %v545_v8  ;;  %v2573_v29 = vrot.slane %v541_v19, %v549_v9  ;;  %v223_v51 = vld [vmem:[%s3667_s1 + $0x10] sm:$0xff] }
   0x7   :  { %1012 = vmatprep.subr.bf16.mxu0 %v2473_v0  ;;  %2169 = vmatprep.subr.bf16.mxu1 %v2473_v0  ;;  %v253_v26 = vld [vmem:[%s3667_s1 + $0x100] sm:$0xff]  ;;  %v157_v30 = vunpack.c.l.bf16 %v61_v20  ;;  %v158_v31 = vunpack.c.h.bf16 %v61_v20  ;;  %v414_v33 = vadd.f32 %v286_v22, %v94_v15  ;;  %v159_v35 = vunpack.c.l.bf16 %v62_v25  ;;  %v224_v60 = vld [vmem:[%s3667_s1 + $0x18] sm:$0xff]  ;;  %v63_v11 = vld [vmem:[%s3666_s0 + $0x110] sm:$0xff] }
   0x8   :  { %v416_v34 = vadd.f32 %v288_v24, %v96_v17  ;;  %v160_v36 = vunpack.c.h.bf16 %v62_v25  ;;  %v349_v38 = vunpack.c.l.bf16 %v253_v26  ;;  %v350_v39 = vunpack.c.h.bf16 %v253_v26  ;;  %v2207_v61 = vld [vmem:[%s3665_s3 + $0x38] sm:$0xff]   ;;  %v255_v13 = vld [vmem:[%s3667_s1 + $0x110] sm:$0xff]  ;;  %v2208_v18 = vld [vmem:[%s3665_s3 + $0x40] sm:$0xff]  }
   0x9   :  { %v351_v40 = vunpack.c.l.bf16 %v254_v27  ;;  %v352_v41 = vunpack.c.h.bf16 %v254_v27  ;;  %v554_v43 = vadd.f32 %v2573_v29, %v414_v33  ;;  %v413_v45 = vadd.f32 %v285_v21, %v93_v14  ;;  %v64_v12 = vld [vmem:[%s3666_s0 + $0x118] sm:$0xff] }
   0xa   :  { %1013 = vmatpush1.bf16.msra.mxu0 %v2202_v3  ;;  %2185 = vmatpush1.bf16.msra.mxu1 %v2202_v3  ;;  %v556_v44 = vadd.f32 %v2573_v29, %v416_v34  ;;  %v98_v46 = vunpack.c.h.bf16 %v2578_v32  ;;  %v478_v47 = vadd.f32 %v350_v39, %v158_v31  ;;  %v415_v49 = vadd.f32 %v287_v23, %v95_v16  ;;  %v256_v23 = vld [vmem:[%s3667_s1 + $0x118] sm:$0xff]  ;;  %v33_v34 = vld [vmem:[%s3666_s0 + $0x20] sm:$0xff]  ;;  %v2209_v39 = vld [vmem:[%s3665_s3 + $0x48] sm:$0xff]  }
   0xb   :  { %1014 = vmatprep.subr.bf16.mxu0 %v2473_v0  ;;  %2170 = vmatprep.subr.bf16.mxu1 %v2473_v0  ;;  %v480_v48 = vadd.f32 %v352_v41, %v160_v36  ;;  %v100_v50 = vunpack.c.h.bf16 %v2583_v37  ;;  %v682_v52 = vmax.f32 %v554_v43, 0.0  ;;  %v553_v54 = vadd.f32 %v2571_v28, %v413_v45 }
   0xc   :  { %v684_v53 = vmax.f32 %v556_v44, 0.0  ;;  %v477_v55 = vadd.f32 %v349_v38, %v157_v30  ;;  %v618_v56 = vadd.f32 %v2573_v29, %v478_v47  ;;  %v555_v58 = vadd.f32 %v2571_v28, %v415_v49  ;;  %v34_v44 = vld [vmem:[%s3666_s0 + $0x28] sm:$0xff]  ;;  %v225_v49 = vld [vmem:[%s3667_s1 + $0x20] sm:$0xff] }
   0xd   :  { %v620_v57 = vadd.f32 %v2573_v29, %v480_v48  ;;  %v479_v59 = vadd.f32 %v351_v40, %v159_v35  ;;  %v681_v63 = vmax.f32 %v553_v54, 0.0  ;;  %v290_v2 = vunpack.c.h.bf16 %v223_v51 }
   0xe   :  { %1015 = vmatpush1.bf16.msra.mxu0 %v2203_v5  ;;  %2186 = vmatpush1.bf16.msra.mxu1 %v2203_v5  ;;  %v810_v62 = vpack.c.bf16 %v684_v53, %v682_v52  ;;  %v617_v1 = vadd.f32 %v2571_v28, %v477_v55  ;;  %v746_v3 = vmax.f32 %v618_v56, 0.0  ;;  %v683_v5 = vmax.f32 %v555_v58, 0.0 }
   0xf   :  { %1016 = vmatprep.subr.bf16.mxu0 %v2473_v0  ;;  %2171 = vmatprep.subr.bf16.mxu1 %v2473_v0  ;;  %v748_v4 = vmax.f32 %v620_v57, 0.0  ;;  %v619_v6 = vadd.f32 %v2571_v28, %v479_v59  ;;  %v292_v8 = vunpack.c.h.bf16 %v224_v60  ;;  %v418_v9 = vadd.f32 %v290_v2, %v98_v46  ;;  %v2210_v59 = vld [vmem:[%s3665_s3 + $0x50] sm:$0xff]  }
  0x10   :  { %1040 = vmatprep.mubr.bf16.mxu0 %v810_v62  ;;  %v2621_v15 = vpack.c.bf16 %v683_v5, %v681_v63  ;;  %v99_v17 = vunpack.c.l.bf16 %v2583_v37  ;;  %v289_v21 = vunpack.c.l.bf16 %v223_v51  ;;  %v291_v22 = vunpack.c.l.bf16 %v224_v60 }
  0x11   :  { %v842_v14 = vpack.c.bf16 %v748_v4, %v746_v3  ;;  %v747_v16 = vmax.f32 %v619_v6, 0.0  ;;  %v420_v19 = vadd.f32 %v292_v8, %v100_v50  ;;  %v558_v20 = vadd.f32 %v2573_v29, %v418_v9  ;;  %v226_v50 = vld [vmem:[%s3667_s1 + $0x28] sm:$0xff] }
  0x12   :  { %1017 = vmatpush1.bf16.msra.mxu0 %v2204_v7  ;;  %2187 = vmatpush1.bf16.msra.mxu1 %v2204_v7  ;;  %v745_v7 = vmax.f32 %v617_v1, 0.0  ;;  %v162_v25 = vunpack.c.h.bf16 %v63_v11  ;;  %v164_v26 = vunpack.c.h.bf16 %v64_v12  ;;  %v354_v27 = vunpack.c.h.bf16 %v255_v13  ;;  %v65_v1 = vld [vmem:[%s3666_s0 + $0x120] sm:$0xff]  ;;  %v66_v6 = vld [vmem:[%s3666_s0 + $0x128] sm:$0xff] }
  0x13   :  { %1018 = vmatprep.subr.bf16.mxu0 %v2473_v0  ;;  %2172 = vmatprep.subr.bf16.mxu1 %v2473_v0  ;;  %v560_v30 = vadd.f32 %v2573_v29, %v420_v19  ;;  %v686_v31 = vmax.f32 %v558_v20, 0.0  ;;  %v419_v33 = vadd.f32 %v291_v22, %v99_v17  ;;  %v356_v35 = vunpack.c.h.bf16 %v256_v23 }
  0x14   :  { %v2633_v24 = vpack.c.bf16 %v747_v16, %v745_v7  ;;  %1168 = vmatprep.mubr.bf16.mxu1 %v842_v14  ;;  %v482_v36 = vadd.f32 %v354_v27, %v162_v25  ;;  %v161_v37 = vunpack.c.l.bf16 %v63_v11  ;;  %v163_v38 = vunpack.c.l.bf16 %v64_v12  ;;  %v257_v11 = vld [vmem:[%s3667_s1 + $0x120] sm:$0xff]  ;;  %v258_v12 = vld [vmem:[%s3667_s1 + $0x128] sm:$0xff] }
  0x15   :  { %v688_v40 = vmax.f32 %v560_v30, 0.0  ;;  %v353_v43 = vunpack.c.l.bf16 %v255_v13  ;;  %v484_v45 = vadd.f32 %v356_v35, %v164_v26  ;;  %v355_v47 = vunpack.c.l.bf16 %v256_v23 }
  0x16   :  { %1019 = vmatpush1.bf16.msra.mxu0 %v2205_v10  ;;  %2188 = vmatpush1.bf16.msra.mxu1 %v2205_v10  ;;  %v97_v10 = vunpack.c.l.bf16 %v2578_v32  ;;  %v622_v46 = vadd.f32 %v2573_v29, %v482_v36  ;;  %v102_v48 = vunpack.c.h.bf16 %v33_v34  ;;  %v104_v58 = vunpack.c.h.bf16 %v34_v44 }
  0x17   :  { %1020 = vmatprep.subr.bf16.mxu0 %v2473_v0  ;;  %2173 = vmatprep.subr.bf16.mxu1 %v2473_v0  ;;  %v2656_v51 = vpack.c.bf16 %v688_v40, %v686_v31  ;;  %v481_v54 = vadd.f32 %v353_v43, %v161_v37  ;;  %v624_v55 = vadd.f32 %v2573_v29, %v484_v45  ;;  %v294_v62 = vunpack.c.h.bf16 %v225_v49  ;;  %v227_v40 = vld [vmem:[%s3667_s1 + $0x30] sm:$0xff] }
  0x18   :  { %v417_v32 = vadd.f32 %v289_v21, %v97_v10  ;;  %v750_v56 = vmax.f32 %v622_v46, 0.0  ;;  %v483_v57 = vadd.f32 %v355_v47, %v163_v38  ;;  %v296_v63 = vunpack.c.h.bf16 %v226_v50  ;;  %v228_v46 = vld [vmem:[%s3667_s1 + $0x38] sm:$0xff] }
  0x19   :  { %v752_v2 = vmax.f32 %v624_v55, 0.0  ;;  %v101_v4 = vunpack.c.l.bf16 %v33_v34  ;;  %v103_v5 = vunpack.c.l.bf16 %v34_v44  ;;  %v422_v8 = vadd.f32 %v294_v62, %v102_v48  ;;  %v35_v34 = vld [vmem:[%s3666_s0 + $0x30] sm:$0xff] }
  0x1a   :  { %1021 = vmatpush1.bf16.msra.mxu0 %v2206_v42  ;;  %2189 = vmatpush1.bf16.msra.mxu1 %v2206_v42  ;;  %v557_v41 = vadd.f32 %v2571_v28, %v417_v32  ;;  %v559_v42 = vadd.f32 %v2571_v28, %v419_v33  ;;  %v623_v3 = vadd.f32 %v2571_v28, %v483_v57  ;;  %v293_v10 = vunpack.c.l.bf16 %v225_v49 }
  0x1b   :  { %1022 = vmatprep.subr.bf16.mxu0 %v2473_v0  ;;  %2174 = vmatprep.subr.bf16.mxu1 %v2473_v0  ;;  %v424_v9 = vadd.f32 %v296_v63, %v104_v58  ;;  %v2680_v13 = vpack.c.bf16 %v752_v2, %v750_v56  ;;  %v295_v16 = vunpack.c.l.bf16 %v226_v50  ;;  %v166_v17 = vunpack.c.h.bf16 %v65_v1 }
  0x1c   :  { %v685_v52 = vmax.f32 %v557_v41, 0.0  ;;  %v687_v53 = vmax.f32 %v559_v42, 0.0  ;;  %v751_v14 = vmax.f32 %v623_v3, 0.0  ;;  %v562_v19 = vadd.f32 %v2573_v29, %v422_v8  ;;  %v2212_v41 = vld [vmem:[%s3665_s3 + $0x60] sm:$0xff]   ;;  %v67_v3 = vld [vmem:[%s3666_s0 + $0x130] sm:$0xff] }
  0x1d   :  { %v564_v20 = vadd.f32 %v2573_v29, %v424_v9  ;;  %v421_v21 = vadd.f32 %v293_v10, %v101_v4  ;;  %v168_v22 = vunpack.c.h.bf16 %v66_v6  ;;  %v423_v25 = vadd.f32 %v295_v16, %v103_v5  ;;  %v68_v4 = vld [vmem:[%s3666_s0 + $0x138] sm:$0xff]  ;;  %v259_v9 = vld [vmem:[%s3667_s1 + $0x130] sm:$0xff] }
  0x1e   :  { %1023 = vmatpush1.bf16.msra.mxu0 %v2207_v61  ;;  %2190 = vmatpush1.bf16.msra.mxu1 %v2207_v61  ;;  %v2662_v60 = vpack.c.bf16 %v687_v53, %v685_v52  ;;  %v621_v61 = vadd.f32 %v2571_v28, %v481_v54  ;;  %v358_v26 = vunpack.c.h.bf16 %v257_v11  ;;  %v360_v27 = vunpack.c.h.bf16 %v258_v12  ;;  %v260_v16 = vld [vmem:[%s3667_s1 + $0x138] sm:$0xff] }
  0x1f   :  { %1024 = vmatprep.subr.bf16.mxu0 %v2473_v0  ;;  %2175 = vmatprep.subr.bf16.mxu1 %v2473_v0  ;;  %v690_v30 = vmax.f32 %v562_v19, 0.0  ;;  %v692_v31 = vmax.f32 %v564_v20, 0.0  ;;  %v561_v32 = vadd.f32 %v2571_v28, %v421_v21  ;;  %v165_v33 = vunpack.c.l.bf16 %v65_v1  ;;  %v2214_v21 = vld [vmem:[%s3665_s3 + $0x70] sm:$0xff]  }
  0x20   :  { %v749_v7 = vmax.f32 %v621_v61, 0.0  ;;  %v563_v35 = vadd.f32 %v2571_v28, %v423_v25  ;;  %v486_v36 = vadd.f32 %v358_v26, %v166_v17  ;;  %v488_v37 = vadd.f32 %v360_v27, %v168_v22  ;;  %v2213_v61 = vld [vmem:[%s3665_s3 + $0x68] sm:$0xff]  }
  0x21   :  { %v167_v38 = vunpack.c.l.bf16 %v66_v6  ;;  %v2705_v42 = vpack.c.bf16 %v692_v31, %v690_v30  ;;  %v689_v43 = vmax.f32 %v561_v32, 0.0  ;;  %v357_v44 = vunpack.c.l.bf16 %v257_v11 }
  0x22   :  { %1025 = vmatpush1.bf16.msra.mxu0 %v2208_v18  ;;  %2191 = vmatpush1.bf16.msra.mxu1 %v2208_v18  ;;  %v2211_v18 = vld [vmem:[%s3665_s3 + $0x58] sm:$0xff]   ;;  %v2689_v23 = vpack.c.bf16 %v751_v14, %v749_v7  ;;  %v359_v45 = vunpack.c.l.bf16 %v258_v12  ;;  %v691_v47 = vmax.f32 %v563_v35, 0.0  ;;  %v626_v48 = vadd.f32 %v2573_v29, %v486_v36 }
  0x23   :  { %1026 = vmatprep.subr.bf16.mxu0 %v2473_v0  ;;  %2176 = vmatprep.subr.bf16.mxu1 %v2473_v0  ;;  %v628_v49 = vadd.f32 %v2573_v29, %v488_v37  ;;  %v106_v50 = vunpack.c.h.bf16 %v35_v34  ;;  %v485_v52 = vadd.f32 %v357_v44, %v165_v33  ;;  %v298_v55 = vunpack.c.h.bf16 %v227_v40 }
  0x24   :  { %v487_v53 = vadd.f32 %v359_v45, %v167_v38  ;;  %v2714_v56 = vpack.c.bf16 %v691_v47, %v689_v43  ;;  %v754_v57 = vmax.f32 %v626_v48, 0.0  ;;  %v105_v2 = vunpack.c.l.bf16 %v35_v34  ;;  %v37_v34 = vld [vmem:[%s3666_s0 + $0x40] sm:$0xff]  ;;  %v2215_v47 = vld [vmem:[%s3665_s3 + $0x78] sm:$0xff]  }
  0x25   :  { %v756_v58 = vmax.f32 %v628_v49, 0.0  ;;  %v625_v62 = vadd.f32 %v2571_v28, %v485_v52  ;;  %v426_v1 = vadd.f32 %v298_v55, %v106_v50  ;;  %v297_v8 = vunpack.c.l.bf16 %v227_v40  ;;  %v229_v40 = vld [vmem:[%s3667_s1 + $0x40] sm:$0xff] }
  0x26   :  { %1027 = vmatpush1.bf16.msra.mxu0 %v2209_v39  ;;  %2192 = vmatpush1.bf16.msra.mxu1 %v2209_v39  ;;  %v36_v39 = vld [vmem:[%s3666_s0 + $0x38] sm:$0xff]  ;;  %v627_v63 = vadd.f32 %v2571_v28, %v487_v53  ;;  %v299_v14 = vunpack.c.l.bf16 %v228_v46  ;;  %v170_v19 = vunpack.c.h.bf16 %v67_v3  ;;  %v172_v20 = vunpack.c.h.bf16 %v68_v4 }
  0x27   :  { %1028 = vmatprep.subr.bf16.mxu0 %v2473_v0  ;;  %2177 = vmatprep.subr.bf16.mxu1 %v2473_v0  ;;  %v108_v54 = vunpack.c.h.bf16 %v36_v39  ;;  %v2729_v5 = vpack.c.bf16 %v756_v58, %v754_v57  ;;  %v107_v7 = vunpack.c.l.bf16 %v36_v39  ;;  %v753_v10 = vmax.f32 %v625_v62, 0.0  ;;  %v38_v39 = vld [vmem:[%s3666_s0 + $0x48] sm:$0xff] }
  0x28   :  { %v755_v11 = vmax.f32 %v627_v63, 0.0  ;;  %v566_v12 = vadd.f32 %v2573_v29, %v426_v1  ;;  %v362_v27 = vunpack.c.h.bf16 %v259_v9  ;;  %v364_v32 = vunpack.c.h.bf16 %v260_v16 }
  0x29   :  { %v427_v26 = vadd.f32 %v299_v14, %v107_v7  ;;  %v169_v33 = vunpack.c.l.bf16 %v67_v3  ;;  %v171_v37 = vunpack.c.l.bf16 %v68_v4  ;;  %v361_v38 = vunpack.c.l.bf16 %v259_v9  ;;  %v70_v4 = vld [vmem:[%s3666_s0 + $0x148] sm:$0xff] }
  0x2a   :  { %1029 = vmatpush1.bf16.msra.mxu0 %v2210_v59  ;;  %2193 = vmatpush1.bf16.msra.mxu1 %v2210_v59  ;;  %v300_v59 = vunpack.c.h.bf16 %v228_v46  ;;  %v2742_v22 = vpack.c.bf16 %v755_v11, %v753_v10  ;;  %v694_v25 = vmax.f32 %v566_v12, 0.0  ;;  %v490_v36 = vadd.f32 %v362_v27, %v170_v19  ;;  %v230_v46 = vld [vmem:[%s3667_s1 + $0x48] sm:$0xff]  ;;  %v261_v10 = vld [vmem:[%s3667_s1 + $0x140] sm:$0xff] }
  0x2b   :  { %1030 = vmatprep.subr.bf16.mxu0 %v2473_v0  ;;  %2178 = vmatprep.subr.bf16.mxu1 %v2473_v0  ;;  %v567_v35 = vadd.f32 %v2571_v28, %v427_v26  ;;  %v492_v44 = vadd.f32 %v364_v32, %v172_v20  ;;  %v363_v45 = vunpack.c.l.bf16 %v260_v16  ;;  %v489_v50 = vadd.f32 %v361_v38, %v169_v33 }
  0x2c   :  { %v428_v6 = vadd.f32 %v300_v59, %v108_v54  ;;  %v630_v49 = vadd.f32 %v2573_v29, %v490_v36  ;;  %v110_v52 = vunpack.c.h.bf16 %v37_v34  ;;  %v112_v55 = vunpack.c.h.bf16 %v38_v39 }
  0x2d   :  { %v695_v48 = vmax.f32 %v567_v35, 0.0  ;;  %v632_v53 = vadd.f32 %v2573_v29, %v492_v44  ;;  %v491_v54 = vadd.f32 %v363_v45, %v171_v37  ;;  %v302_v57 = vunpack.c.h.bf16 %v229_v40  ;;  %v232_v44 = vld [vmem:[%s3667_s1 + $0x58] sm:$0xff] }
  0x2e   :  { %1031 = vmatpush1.bf16.msra.mxu0 %v2211_v18  ;;  %2194 = vmatpush1.bf16.msra.mxu1 %v2211_v18  ;;  %v568_v17 = vadd.f32 %v2573_v29, %v428_v6  ;;  %v425_v18 = vadd.f32 %v297_v8, %v105_v2  ;;  %v758_v59 = vmax.f32 %v630_v49, 0.0  ;;  %v304_v62 = vunpack.c.h.bf16 %v230_v46 }
  0x2f   :  { %1032 = vmatprep.subr.bf16.mxu0 %v2473_v0  ;;  %2179 = vmatprep.subr.bf16.mxu1 %v2473_v0  ;;  %v760_v63 = vmax.f32 %v632_v53, 0.0  ;;  %v631_v1 = vadd.f32 %v2571_v28, %v491_v54  ;;  %v430_v2 = vadd.f32 %v302_v57, %v110_v52  ;;  %v109_v3 = vunpack.c.l.bf16 %v37_v34 }
  0x30   :  { %v696_v30 = vmax.f32 %v568_v17, 0.0  ;;  %v565_v31 = vadd.f32 %v2571_v28, %v425_v18  ;;  %v432_v7 = vadd.f32 %v304_v62, %v112_v55  ;;  %v111_v8 = vunpack.c.l.bf16 %v38_v39  ;;  %v262_v17 = vld [vmem:[%s3667_s1 + $0x148] sm:$0xff] }
  0x31   :  { %v301_v9 = vunpack.c.l.bf16 %v229_v40  ;;  %v2782_v11 = vpack.c.bf16 %v760_v63, %v758_v59  ;;  %v759_v12 = vmax.f32 %v631_v1, 0.0  ;;  %v570_v14 = vadd.f32 %v2573_v29, %v430_v2  ;;  %v71_v2 = vld [vmem:[%s3666_s0 + $0x150] sm:$0xff] }
  0x32   :  { %1033 = vmatpush1.bf16.msra.mxu0 %v2212_v41  ;;  %2195 = vmatpush1.bf16.msra.mxu1 %v2212_v41  ;;  %v2757_v41 = vpack.c.bf16 %v696_v30, %v694_v25  ;;  %v693_v43 = vmax.f32 %v565_v31, 0.0  ;;  %v303_v16 = vunpack.c.l.bf16 %v230_v46  ;;  %v572_v18 = vadd.f32 %v2573_v29, %v432_v7 }
  0x33   :  { %1034 = vmatprep.subr.bf16.mxu0 %v2473_v0  ;;  %2180 = vmatprep.subr.bf16.mxu1 %v2473_v0  ;;  %v429_v19 = vadd.f32 %v301_v9, %v109_v3  ;;  %v698_v26 = vmax.f32 %v570_v14, 0.0  ;;  %v366_v30 = vunpack.c.h.bf16 %v261_v10  ;;  %v368_v33 = vunpack.c.h.bf16 %v262_v17  ;;  %v72_v3 = vld [vmem:[%s3666_s0 + $0x158] sm:$0xff] }
  0x34   :  { %v2769_v58 = vpack.c.bf16 %v695_v48, %v693_v43  ;;  %v431_v27 = vadd.f32 %v303_v16, %v111_v8  ;;  %v700_v31 = vmax.f32 %v572_v18, 0.0  ;;  %v175_v36 = vunpack.c.l.bf16 %v70_v4  ;;  %v263_v8 = vld [vmem:[%s3667_s1 + $0x150] sm:$0xff] }
  0x35   :  { %v569_v32 = vadd.f32 %v2571_v28, %v429_v19  ;;  %v365_v37 = vunpack.c.l.bf16 %v261_v10  ;;  %v367_v43 = vunpack.c.l.bf16 %v262_v17  ;;  %v308_v59 = vunpack.c.h.bf16 %v232_v44 }
  0x36   :  { %1035 = vmatpush1.bf16.msra.mxu0 %v2213_v61  ;;  %2196 = vmatpush1.bf16.msra.mxu1 %v2213_v61  ;;  %v629_v61 = vadd.f32 %v2571_v28, %v489_v50  ;;  %v2806_v38 = vpack.c.bf16 %v700_v31, %v698_v26  ;;  %v178_v17 = vunpack.c.h.bf16 %v71_v2  ;;  %v180_v18 = vunpack.c.h.bf16 %v72_v3  ;;  %v41_v31 = vld [vmem:[%s3666_s0 + $0x60] sm:$0xff] }
  0x37   :  { %1036 = vmatprep.subr.bf16.mxu0 %v2473_v0  ;;  %2181 = vmatprep.subr.bf16.mxu1 %v2473_v0  ;;  %v697_v39 = vmax.f32 %v569_v32, 0.0  ;;  %v495_v50 = vadd.f32 %v367_v43, %v175_v36 }
  0x38   :  { %v757_v6 = vmax.f32 %v629_v61, 0.0 }
  0x39   :  { %v635_v62 = vadd.f32 %v2571_v28, %v495_v50 }
  0x3a   :  { %1037 = vmatpush1.bf16.msra.mxu0 %v2214_v21  ;;  %2197 = vmatpush1.bf16.msra.mxu1 %v2214_v21  ;;  %v176_v21 = vunpack.c.h.bf16 %v70_v4  ;;  %v2791_v25 = vpack.c.bf16 %v759_v12, %v757_v6 }
  0x3b   :  { %1038 = vmatprep.subr.bf16.mxu0 %v2473_v0  ;;  %2182 = vmatprep.subr.bf16.mxu1 %v2473_v0  ;;  %v69_v0 = vld [vmem:[%s3666_s0 + $0x140] sm:$0xff]  ;;  %v763_v10 = vmax.f32 %v635_v62, 0.0 }
  0x3c   :  { %v174_v20 = vunpack.c.h.bf16 %v69_v0  ;;  %v173_v34 = vunpack.c.l.bf16 %v69_v0  ;;  %v496_v40 = vadd.f32 %v368_v33, %v176_v21 }
  0x3e   :  { %1039 = vmatpush1.bf16.msra.mxu0 %v2215_v47  ;;  %2198 = vmatpush1.bf16.msra.mxu1 %v2215_v47  ;;  %v494_v35 = vadd.f32 %v366_v30, %v174_v20  ;;  %v493_v47 = vadd.f32 %v365_v37, %v173_v34  ;;  %v636_v49 = vadd.f32 %v2573_v29, %v496_v40  ;;  %v177_v30 = vunpack.c.l.bf16 %v71_v2  ;;  %v265_v2 = vld [vmem:[%s3667_s1 + $0x160] sm:$0xff] }
  0x3f   :  { %v179_v34 = vunpack.c.l.bf16 %v72_v3 }
  0x40   :  { %v634_v46 = vadd.f32 %v2573_v29, %v494_v35  ;;  %v633_v57 = vadd.f32 %v2571_v28, %v493_v47  ;;  %v764_v61 = vmax.f32 %v636_v49, 0.0  ;;  %v233_v35 = vld [vmem:[%s3667_s1 + $0x60] sm:$0xff] }
  0x41   :  { %1041 = vmatmul.mubr.bf16.vlgmr.msra.gmra.mrb[0].mxu0 %v2621_v15  ;;  %1169 = vmatmul.mubr.bf16.vlgmr.msra.gmra.mrb[0].mxu1 %v2633_v24  ;;  %v39_v15 = vld [vmem:[%s3666_s0 + $0x50] sm:$0xff]  ;;  %v571_v24 = vadd.f32 %v2571_v28, %v431_v27  ;;  %v310_v49 = vunpack.c.h.bf16 %v233_v35 }
  0x42   :  { %1048 = vmatprep.mubr.bf16.mxu0 %v2656_v51  ;;  %1176 = vmatprep.mubr.bf16.mxu1 %v2680_v13  ;;  %v40_v51 = vld [vmem:[%s3666_s0 + $0x58] sm:$0xff]  ;;  %v231_v13 = vld [vmem:[%s3667_s1 + $0x50] sm:$0xff]  ;;  %v114_v48 = vunpack.c.h.bf16 %v39_v15  ;;  %v762_v55 = vmax.f32 %v634_v46, 0.0  ;;  %v113_v1 = vunpack.c.l.bf16 %v39_v15  ;;  %v761_v0 = vmax.f32 %v633_v57, 0.0 }
  0x43   :  { %v699_v45 = vmax.f32 %v571_v24, 0.0  ;;  %v116_v52 = vunpack.c.h.bf16 %v40_v51  ;;  %v306_v53 = vunpack.c.h.bf16 %v231_v13  ;;  %v115_v6 = vunpack.c.l.bf16 %v40_v51  ;;  %v42_v24 = vld [vmem:[%s3666_s0 + $0x68] sm:$0xff] }
  0x44   :  { %v305_v7 = vunpack.c.l.bf16 %v231_v13  ;;  %v2830_v9 = vpack.c.bf16 %v764_v61, %v762_v55  ;;  %v2837_v19 = vpack.c.bf16 %v763_v10, %v761_v0  ;;  %v369_v15 = vunpack.c.l.bf16 %v263_v8  ;;  %v73_v61 = vld [vmem:[%s3666_s0 + $0x160] sm:$0xff] }
  0x45   :  { %v2813_v54 = vpack.c.bf16 %v699_v45, %v697_v39  ;;  %v434_v63 = vadd.f32 %v306_v53, %v114_v48  ;;  %v436_v4 = vadd.f32 %v308_v59, %v116_v52  ;;  %v234_v39 = vld [vmem:[%s3667_s1 + $0x68] sm:$0xff]  ;;  %v118_v45 = vunpack.c.h.bf16 %v41_v31 }
  0x46   :  { %v433_v16 = vadd.f32 %v305_v7, %v113_v1  ;;  %v120_v48 = vunpack.c.h.bf16 %v42_v24  ;;  %v312_v55 = vunpack.c.h.bf16 %v234_v39  ;;  %v309_v1 = vunpack.c.l.bf16 %v233_v35  ;;  %v266_v7 = vld [vmem:[%s3667_s1 + $0x168] sm:$0xff] }
  0x47   :  { %v574_v12 = vadd.f32 %v2573_v29, %v434_v63  ;;  %v576_v14 = vadd.f32 %v2573_v29, %v436_v4  ;;  %v438_v59 = vadd.f32 %v310_v49, %v118_v45  ;;  %v119_v63 = vunpack.c.l.bf16 %v42_v24  ;;  %v236_v24 = vld [vmem:[%s3667_s1 + $0x78] sm:$0xff] }
  0x48   :  { %v573_v26 = vadd.f32 %v2571_v28, %v433_v16  ;;  %v440_v62 = vadd.f32 %v312_v55, %v120_v48  ;;  %v76_v55 = vld [vmem:[%s3666_s0 + $0x178] sm:$0xff] }
  0x49   :  { %1049 = vmatmul.mubr.bf16.gmra.mrb[4].mxu0 %v2662_v60  ;;  %1177 = vmatmul.mubr.bf16.gmra.mrb[4].mxu1 %v2689_v23  ;;  %v307_v60 = vunpack.c.l.bf16 %v232_v44  ;;  %v264_v23 = vld [vmem:[%s3667_s1 + $0x158] sm:$0xff]  ;;  %v704_v21 = vmax.f32 %v576_v14, 0.0  ;;  %v497_v44 = vadd.f32 %v369_v15, %v177_v30  ;;  %v578_v4 = vadd.f32 %v2573_v29, %v438_v59 }
  0x4a   :  { %1056 = vmatprep.mubr.bf16.mxu0 %v2705_v42  ;;  %1184 = vmatprep.mubr.bf16.mxu1 %v2729_v5  ;;  %v702_v42 = vmax.f32 %v574_v12, 0.0  ;;  %v370_v5 = vunpack.c.h.bf16 %v263_v8  ;;  %v372_v27 = vunpack.c.h.bf16 %v264_v23  ;;  %v701_v37 = vmax.f32 %v573_v26, 0.0 }
  0x4b   :  { %v435_v20 = vadd.f32 %v307_v60, %v115_v6  ;;  %v371_v13 = vunpack.c.l.bf16 %v264_v23  ;;  %v637_v53 = vadd.f32 %v2571_v28, %v497_v44  ;;  %v311_v6 = vunpack.c.l.bf16 %v234_v39 }
  0x4c   :  { %v498_v33 = vadd.f32 %v370_v5, %v178_v17  ;;  %v2850_v36 = vpack.c.bf16 %v704_v21, %v702_v42  ;;  %v500_v51 = vadd.f32 %v372_v27, %v180_v18  ;;  %v580_v8 = vadd.f32 %v2573_v29, %v440_v62  ;;  %v43_v21 = vld [vmem:[%s3666_s0 + $0x70] sm:$0xff] }
  0x4d   :  { %v575_v32 = vadd.f32 %v2571_v28, %v435_v20  ;;  %v499_v47 = vadd.f32 %v371_v13, %v179_v34  ;;  %v182_v12 = vunpack.c.h.bf16 %v73_v61  ;;  %v706_v14 = vmax.f32 %v578_v4, 0.0 }
  0x4e   :  { %v638_v43 = vadd.f32 %v2573_v29, %v498_v33  ;;  %v640_v46 = vadd.f32 %v2573_v29, %v500_v51  ;;  %v439_v16 = vadd.f32 %v311_v6, %v119_v63  ;;  %v374_v17 = vunpack.c.h.bf16 %v265_v2  ;;  %v235_v33 = vld [vmem:[%s3667_s1 + $0x70] sm:$0xff] }
  0x4f   :  { %v703_v40 = vmax.f32 %v575_v32, 0.0  ;;  %v708_v18 = vmax.f32 %v580_v8, 0.0  ;;  %v376_v20 = vunpack.c.h.bf16 %v266_v7  ;;  %v181_v5 = vunpack.c.l.bf16 %v73_v61  ;;  %v44_v32 = vld [vmem:[%s3666_s0 + $0x78] sm:$0xff]  ;;  %v267_v61 = vld [vmem:[%s3667_s1 + $0x170] sm:$0xff] }
  0x50   :  { %v766_v52 = vmax.f32 %v638_v43, 0.0  ;;  %v768_v57 = vmax.f32 %v640_v46, 0.0  ;;  %v579_v26 = vadd.f32 %v2571_v28, %v439_v16  ;;  %v502_v27 = vadd.f32 %v374_v17, %v182_v12 }
  0x51   :  { %1057 = vmatmul.mubr.bf16.gmra.mrb[8].mxu0 %v2714_v56  ;;  %1185 = vmatmul.mubr.bf16.gmra.mrb[8].mxu1 %v2742_v22  ;;  %v2861_v50 = vpack.c.bf16 %v703_v40, %v701_v37  ;;  %v639_v56 = vadd.f32 %v2571_v28, %v499_v47  ;;  %v117_v22 = vunpack.c.l.bf16 %v41_v31  ;;  %v373_v31 = vunpack.c.l.bf16 %v265_v2 }
  0x52   :  { %1064 = vmatprep.mubr.bf16.mxu0 %v2757_v41  ;;  %1192 = vmatprep.mubr.bf16.mxu1 %v2782_v11  ;;  %v74_v41 = vld [vmem:[%s3666_s0 + $0x168] sm:$0xff]  ;;  %v765_v11 = vmax.f32 %v637_v53, 0.0  ;;  %v2874_v3 = vpack.c.bf16 %v768_v57, %v766_v52  ;;  %v375_v15 = vunpack.c.l.bf16 %v266_v7  ;;  %v707_v35 = vmax.f32 %v579_v26, 0.0  ;;  %v75_v53 = vld [vmem:[%s3666_s0 + $0x170] sm:$0xff] }
  0x53   :  { %v767_v0 = vmax.f32 %v639_v56, 0.0  ;;  %v437_v10 = vadd.f32 %v309_v1, %v117_v22  ;;  %v184_v60 = vunpack.c.h.bf16 %v74_v41  ;;  %v183_v30 = vunpack.c.l.bf16 %v74_v41  ;;  %v268_v1 = vld [vmem:[%s3667_s1 + $0x178] sm:$0xff] }
  0x54   :  { %v642_v37 = vadd.f32 %v2573_v29, %v502_v27  ;;  %v501_v51 = vadd.f32 %v373_v31, %v181_v5  ;;  %v122_v13 = vunpack.c.h.bf16 %v43_v21  ;;  %v314_v43 = vunpack.c.h.bf16 %v235_v33 }
  0x55   :  { %v2881_v23 = vpack.c.bf16 %v767_v0, %v765_v11  ;;  %v577_v42 = vadd.f32 %v2571_v28, %v437_v10  ;;  %v504_v34 = vadd.f32 %v376_v20, %v184_v60  ;;  %v503_v40 = vadd.f32 %v375_v15, %v183_v30  ;;  %v237_v20 = vld [vmem:[%s3667_s1 + $0x80] sm:$0xff]  ;;  %v238_v30 = vld [vmem:[%s3667_s1 + $0x88] sm:$0xff] }
  0x56   :  { %v770_v44 = vmax.f32 %v642_v37, 0.0  ;;  %v641_v45 = vadd.f32 %v2571_v28, %v501_v51  ;;  %v316_v46 = vunpack.c.h.bf16 %v236_v24  ;;  %v442_v49 = vadd.f32 %v314_v43, %v122_v13 }
  0x57   :  { %v644_v39 = vadd.f32 %v2573_v29, %v504_v34  ;;  %v643_v48 = vadd.f32 %v2571_v28, %v503_v40  ;;  %v121_v52 = vunpack.c.l.bf16 %v43_v21  ;;  %v123_v59 = vunpack.c.l.bf16 %v44_v32 }
  0x58   :  { %v769_v57 = vmax.f32 %v641_v45, 0.0  ;;  %v313_v22 = vunpack.c.l.bf16 %v235_v33  ;;  %v582_v62 = vadd.f32 %v2573_v29, %v442_v49  ;;  %v315_v63 = vunpack.c.l.bf16 %v236_v24  ;;  %v77_v45 = vld [vmem:[%s3666_s0 + $0x180] sm:$0xff] }
  0x59   :  { %1065 = vmatmul.mubr.bf16.gmra.mrb[12].mxu0 %v2769_v58  ;;  %1193 = vmatmul.mubr.bf16.gmra.mrb[12].mxu1 %v2791_v25  ;;  %v2898_v58 = vpack.c.bf16 %v708_v18, %v706_v14  ;;  %v705_v25 = vmax.f32 %v577_v42, 0.0  ;;  %v772_v47 = vmax.f32 %v644_v39, 0.0  ;;  %v771_v11 = vmax.f32 %v643_v48, 0.0  ;;  %v269_v49 = vld [vmem:[%s3667_s1 + $0x180] sm:$0xff] }
  0x5a   :  { %1072 = vmatprep.mubr.bf16.mxu0 %v2806_v38  ;;  %1200 = vmatprep.mubr.bf16.mxu1 %v2830_v9  ;;  %v124_v38 = vunpack.c.h.bf16 %v44_v32  ;;  %v441_v0 = vadd.f32 %v313_v22, %v121_v52  ;;  %v186_v4 = vunpack.c.h.bf16 %v75_v53  ;;  %v188_v6 = vunpack.c.h.bf16 %v76_v55 }
  0x5b   :  { %v2905_v9 = vpack.c.bf16 %v707_v35, %v705_v25  ;;  %v854_v41 = vpack.c.bf16 %v772_v47, %v770_v44  ;;  %v2927_v7 = vpack.c.bf16 %v771_v11, %v769_v57  ;;  %v710_v8 = vmax.f32 %v582_v62, 0.0 }
  0x5c   :  { %v444_v56 = vadd.f32 %v316_v46, %v124_v38  ;;  %v443_v10 = vadd.f32 %v315_v63, %v123_v59  ;;  %v378_v12 = vunpack.c.h.bf16 %v267_v61  ;;  %v581_v14 = vadd.f32 %v2571_v28, %v441_v0  ;;  %v78_v46 = vld [vmem:[%s3666_s0 + $0x188] sm:$0xff] }
  0x5d   :  { %v185_v16 = vunpack.c.l.bf16 %v75_v53  ;;  %v377_v42 = vunpack.c.l.bf16 %v267_v61  ;;  %v379_v27 = vunpack.c.l.bf16 %v268_v1  ;;  %v318_v35 = vunpack.c.h.bf16 %v237_v20 }
  0x5e   :  { %v584_v2 = vadd.f32 %v2573_v29, %v444_v56  ;;  %v583_v17 = vadd.f32 %v2571_v28, %v443_v10  ;;  %v506_v18 = vadd.f32 %v378_v12, %v186_v4  ;;  %v709_v21 = vmax.f32 %v581_v14, 0.0  ;;  %v270_v56 = vld [vmem:[%s3667_s1 + $0x188] sm:$0xff]  ;;  %v48_v14 = vld [vmem:[%s3666_s0 + $0x98] sm:$0xff] }
  0x5f   :  { %v505_v33 = vadd.f32 %v377_v42, %v185_v16  ;;  %v320_v39 = vunpack.c.h.bf16 %v238_v30  ;;  %v319_v57 = vunpack.c.l.bf16 %v238_v30  ;;  %v190_v22 = vunpack.c.h.bf16 %v77_v45 }
  0x60   :  { %v712_v60 = vmax.f32 %v584_v2, 0.0  ;;  %v711_v31 = vmax.f32 %v583_v17, 0.0  ;;  %v646_v32 = vadd.f32 %v2573_v29, %v506_v18  ;;  %v192_v61 = vunpack.c.h.bf16 %v78_v46 }
  0x61   :  { %1073 = vmatmul.mubr.bf16.gmra.mrb[16].mxu0 %v2813_v54  ;;  %1201 = vmatmul.mubr.bf16.gmra.mrb[16].mxu1 %v2837_v19  ;;  %v380_v54 = vunpack.c.h.bf16 %v268_v1  ;;  %v45_v19 = vld [vmem:[%s3666_s0 + $0x80] sm:$0xff]  ;;  %v645_v13 = vadd.f32 %v2571_v28, %v505_v33  ;;  %v382_v63 = vunpack.c.h.bf16 %v269_v49  ;;  %v384_v0 = vunpack.c.h.bf16 %v270_v56 }
  0x62   :  { %1080 = vmatprep.mubr.bf16.mxu0 %v2850_v36  ;;  %1208 = vmatprep.mubr.bf16.mxu1 %v2874_v3  ;;  %v187_v36 = vunpack.c.l.bf16 %v76_v55  ;;  %v46_v3 = vld [vmem:[%s3666_s0 + $0x88] sm:$0xff]  ;;  %v2940_v5 = vpack.c.bf16 %v712_v60, %v710_v8  ;;  %v126_v25 = vunpack.c.h.bf16 %v45_v19  ;;  %v2947_v37 = vpack.c.bf16 %v711_v31, %v709_v21 }
  0x63   :  { %v508_v26 = vadd.f32 %v380_v54, %v188_v6  ;;  %v128_v24 = vunpack.c.h.bf16 %v46_v3  ;;  %v774_v51 = vmax.f32 %v646_v32, 0.0  ;;  %v125_v44 = vunpack.c.l.bf16 %v45_v19  ;;  %v47_v6 = vld [vmem:[%s3666_s0 + $0x90] sm:$0xff] }
  0x64   :  { %v507_v15 = vadd.f32 %v379_v27, %v187_v36  ;;  %v446_v43 = vadd.f32 %v318_v35, %v126_v25  ;;  %v773_v47 = vmax.f32 %v645_v13, 0.0  ;;  %v127_v48 = vunpack.c.l.bf16 %v46_v3  ;;  %v239_v54 = vld [vmem:[%s3667_s1 + $0x90] sm:$0xff]  ;;  %v240_v36 = vld [vmem:[%s3667_s1 + $0x98] sm:$0xff] }
  0x65   :  { %v648_v34 = vadd.f32 %v2573_v29, %v508_v26  ;;  %v189_v4 = vunpack.c.l.bf16 %v77_v45  ;;  %v510_v10 = vadd.f32 %v382_v63, %v190_v22  ;;  %v191_v12 = vunpack.c.l.bf16 %v78_v46  ;;  %v80_v35 = vld [vmem:[%s3666_s0 + $0x198] sm:$0xff] }
  0x66   :  { %v647_v38 = vadd.f32 %v2571_v28, %v507_v15  ;;  %v586_v55 = vadd.f32 %v2573_v29, %v446_v43  ;;  %v447_v62 = vadd.f32 %v319_v57, %v127_v48  ;;  %v381_v60 = vunpack.c.l.bf16 %v269_v49 }
  0x67   :  { %v776_v40 = vmax.f32 %v648_v34, 0.0  ;;  %v512_v17 = vadd.f32 %v384_v0, %v192_v61  ;;  %v383_v18 = vunpack.c.l.bf16 %v270_v56  ;;  %v650_v3 = vadd.f32 %v2573_v29, %v510_v10  ;;  %v49_v61 = vld [vmem:[%s3666_s0 + $0xa0] sm:$0xff] }
  0x68   :  { %v775_v53 = vmax.f32 %v647_v38, 0.0  ;;  %v714_v11 = vmax.f32 %v586_v55, 0.0  ;;  %v587_v8 = vadd.f32 %v2571_v28, %v447_v62  ;;  %v130_v21 = vunpack.c.h.bf16 %v47_v6  ;;  %v271_v38 = vld [vmem:[%s3667_s1 + $0x190] sm:$0xff] }
  0x69   :  { %1081 = vmatmul.mubr.bf16.gmra.mrb[20].mxu0 %v2861_v50  ;;  %1209 = vmatmul.mubr.bf16.gmra.mrb[20].mxu1 %v2881_v23  ;;  %v448_v50 = vadd.f32 %v320_v39, %v128_v24  ;;  %v317_v23 = vunpack.c.l.bf16 %v237_v20  ;;  %v856_v52 = vpack.c.bf16 %v776_v40, %v774_v51  ;;  %v509_v20 = vadd.f32 %v381_v60, %v189_v4 }
  0x6a   :  { %1088 = vmatprep.mubr.bf16.mxu0 %v2898_v58  ;;  %1216 = vmatprep.mubr.bf16.mxu1 %v854_v41  ;;  %v855_v41 = vpack.c.bf16 %v775_v53, %v773_v47  ;;  %v715_v42 = vmax.f32 %v587_v8, 0.0  ;;  %v652_v26 = vadd.f32 %v2573_v29, %v512_v17  ;;  %v511_v27 = vadd.f32 %v383_v18, %v191_v12  ;;  %v272_v47 = vld [vmem:[%s3667_s1 + $0x198] sm:$0xff]  ;;  %v242_v8 = vld [vmem:[%s3667_s1 + $0xa8] sm:$0xff] }
  0x6b   :  { %v588_v58 = vadd.f32 %v2573_v29, %v448_v50  ;;  %v445_v59 = vadd.f32 %v317_v23, %v125_v44  ;;  %v132_v30 = vunpack.c.h.bf16 %v48_v14  ;;  %v322_v31 = vunpack.c.h.bf16 %v239_v54 }
  0x6c   :  { %v778_v33 = vmax.f32 %v650_v3, 0.0  ;;  %v324_v25 = vunpack.c.h.bf16 %v240_v36  ;;  %v651_v34 = vadd.f32 %v2571_v28, %v511_v27  ;;  %v129_v24 = vunpack.c.l.bf16 %v47_v6 }
  0x6d   :  { %v716_v1 = vmax.f32 %v588_v58, 0.0  ;;  %v585_v2 = vadd.f32 %v2571_v28, %v445_v59  ;;  %v450_v15 = vadd.f32 %v322_v31, %v130_v21  ;;  %v131_v39 = vunpack.c.l.bf16 %v48_v14  ;;  %v82_v31 = vld [vmem:[%s3666_s0 + $0x1a8] sm:$0xff] }
  0x6e   :  { %v452_v13 = vadd.f32 %v324_v25, %v132_v30  ;;  %v321_v40 = vunpack.c.l.bf16 %v239_v54  ;;  %v779_v44 = vmax.f32 %v651_v34, 0.0  ;;  %v323_v46 = vunpack.c.l.bf16 %v240_v36  ;;  %v81_v30 = vld [vmem:[%s3666_s0 + $0x1a0] sm:$0xff] }
  0x6f   :  { %v826_v16 = vpack.c.bf16 %v716_v1, %v714_v11  ;;  %v713_v19 = vmax.f32 %v585_v2, 0.0  ;;  %v590_v45 = vadd.f32 %v2573_v29, %v450_v15  ;;  %v196_v49 = vunpack.c.h.bf16 %v80_v35  ;;  %v273_v34 = vld [vmem:[%s3667_s1 + $0x1a0] sm:$0xff] }
  0x70   :  { %v592_v50 = vadd.f32 %v2573_v29, %v452_v13  ;;  %v449_v48 = vadd.f32 %v321_v40, %v129_v24  ;;  %v451_v55 = vadd.f32 %v323_v46, %v131_v39  ;;  %v386_v57 = vunpack.c.h.bf16 %v271_v38 }
  0x71   :  { %1089 = vmatmul.mubr.bf16.gmra.mrb[24].mxu0 %v2905_v9  ;;  %1217 = vmatmul.mubr.bf16.gmra.mrb[24].mxu1 %v2927_v7  ;;  %v2987_v32 = vpack.c.bf16 %v715_v42, %v713_v19  ;;  %v649_v9 = vadd.f32 %v2571_v28, %v509_v20  ;;  %v780_v7 = vmax.f32 %v652_v26, 0.0  ;;  %v718_v53 = vmax.f32 %v590_v45, 0.0 }
  0x72   :  { %1096 = vmatprep.mubr.bf16.mxu0 %v2940_v5  ;;  %1224 = vmatprep.mubr.bf16.mxu1 %v856_v52  ;;  %v79_v5 = vld [vmem:[%s3666_s0 + $0x190] sm:$0xff]  ;;  %v720_v56 = vmax.f32 %v592_v50, 0.0  ;;  %v589_v58 = vadd.f32 %v2571_v28, %v449_v48  ;;  %v388_v59 = vunpack.c.h.bf16 %v272_v47  ;;  %v591_v11 = vadd.f32 %v2571_v28, %v451_v55 }
  0x73   :  { %v777_v51 = vmax.f32 %v649_v9, 0.0  ;;  %v858_v43 = vpack.c.bf16 %v780_v7, %v778_v33  ;;  %v194_v23 = vunpack.c.h.bf16 %v79_v5  ;;  %v193_v22 = vunpack.c.l.bf16 %v79_v5 }
  0x74   :  { %v195_v63 = vunpack.c.l.bf16 %v80_v35  ;;  %v385_v1 = vunpack.c.l.bf16 %v271_v38  ;;  %v828_v2 = vpack.c.bf16 %v720_v56, %v718_v53  ;;  %v717_v0 = vmax.f32 %v589_v58, 0.0  ;;  %v243_v56 = vld [vmem:[%s3667_s1 + $0xb0] sm:$0xff] }
  0x75   :  { %v857_v52 = vpack.c.bf16 %v779_v44, %v777_v51  ;;  %v514_v62 = vadd.f32 %v386_v57, %v194_v23  ;;  %v516_v4 = vadd.f32 %v388_v59, %v196_v49  ;;  %v387_v6 = vunpack.c.l.bf16 %v272_v47  ;;  %v274_v51 = vld [vmem:[%s3667_s1 + $0x1a8] sm:$0xff]  ;;  %v51_v23 = vld [vmem:[%s3666_s0 + $0xb0] sm:$0xff]  ;;  %v52_v57 = vld [vmem:[%s3666_s0 + $0xb8] sm:$0xff] }
  0x76   :  { %v719_v10 = vmax.f32 %v591_v11, 0.0  ;;  %v513_v60 = vadd.f32 %v385_v1, %v193_v22  ;;  %v134_v14 = vunpack.c.h.bf16 %v49_v61  ;;  %v328_v3 = vunpack.c.h.bf16 %v242_v8  ;;  %v244_v11 = vld [vmem:[%s3667_s1 + $0xb8] sm:$0xff] }
  0x77   :  { %v654_v12 = vadd.f32 %v2573_v29, %v514_v62  ;;  %v656_v54 = vadd.f32 %v2573_v29, %v516_v4  ;;  %v133_v27 = vunpack.c.l.bf16 %v49_v61  ;;  %v327_v35 = vunpack.c.l.bf16 %v242_v8 }
  0x78   :  { %v827_v18 = vpack.c.bf16 %v719_v10, %v717_v0  ;;  %v653_v42 = vadd.f32 %v2571_v28, %v513_v60  ;;  %v198_v40 = vunpack.c.h.bf16 %v81_v30  ;;  %v200_v38 = vunpack.c.h.bf16 %v82_v31 }
  0x79   :  { %1097 = vmatmul.mubr.bf16.gmra.mrb[28].mxu0 %v2947_v37  ;;  %1225 = vmatmul.mubr.bf16.gmra.mrb[28].mxu1 %v855_v41  ;;  %v50_v37 = vld [vmem:[%s3666_s0 + $0xa8] sm:$0xff]  ;;  %v241_v41 = vld [vmem:[%s3667_s1 + $0xa0] sm:$0xff]  ;;  %v782_v36 = vmax.f32 %v654_v12, 0.0  ;;  %v784_v20 = vmax.f32 %v656_v54, 0.0  ;;  %v390_v45 = vunpack.c.h.bf16 %v273_v34  ;;  %v392_v50 = vunpack.c.h.bf16 %v274_v51 }
  0x7a   :  { %1104 = vmatprep.mubr.bf16.mxu0 %v826_v16  ;;  %1232 = vmatprep.mubr.bf16.mxu1 %v858_v43  ;;  %v515_v16 = vadd.f32 %v387_v6, %v195_v63  ;;  %v136_v19 = vunpack.c.h.bf16 %v50_v37  ;;  %v326_v17 = vunpack.c.h.bf16 %v241_v41  ;;  %v781_v33 = vmax.f32 %v653_v42, 0.0 }
  0x7b   :  { %v135_v25 = vunpack.c.l.bf16 %v50_v37  ;;  %v325_v7 = vunpack.c.l.bf16 %v241_v41  ;;  %v860_v15 = vpack.c.bf16 %v784_v20, %v782_v36  ;;  %v197_v48 = vunpack.c.l.bf16 %v81_v30  ;;  %v275_v20 = vld [vmem:[%s3667_s1 + $0x1b0] sm:$0xff] }
  0x7c   :  { %v655_v21 = vadd.f32 %v2571_v28, %v515_v16  ;;  %v454_v26 = vadd.f32 %v326_v17, %v134_v14  ;;  %v456_v9 = vadd.f32 %v328_v3, %v136_v19  ;;  %v199_v53 = vunpack.c.l.bf16 %v82_v31  ;;  %v83_v19 = vld [vmem:[%s3666_s0 + $0x1b0] sm:$0xff]  ;;  %v84_v17 = vld [vmem:[%s3666_s0 + $0x1b8] sm:$0xff] }
  0x7d   :  { %v453_v39 = vadd.f32 %v325_v7, %v133_v27  ;;  %v389_v55 = vunpack.c.l.bf16 %v273_v34  ;;  %v520_v22 = vadd.f32 %v392_v50, %v200_v38  ;;  %v391_v61 = vunpack.c.l.bf16 %v274_v51  ;;  %v276_v31 = vld [vmem:[%s3667_s1 + $0x1b8] sm:$0xff] }
  0x7e   :  { %v783_v24 = vmax.f32 %v655_v21, 0.0  ;;  %v594_v5 = vadd.f32 %v2573_v29, %v454_v26  ;;  %v596_v13 = vadd.f32 %v2573_v29, %v456_v9  ;;  %v138_v37 = vunpack.c.h.bf16 %v51_v23 }
  0x7f   :  { %v593_v47 = vadd.f32 %v2571_v28, %v453_v39  ;;  %v517_v1 = vadd.f32 %v389_v55, %v197_v48  ;;  %v660_v41 = vadd.f32 %v2573_v29, %v520_v22  ;;  %v140_v0 = vunpack.c.h.bf16 %v52_v57 }
  0x80   :  { %v859_v43 = vpack.c.bf16 %v783_v24, %v781_v33  ;;  %v722_v44 = vmax.f32 %v594_v5, 0.0  ;;  %v724_v46 = vmax.f32 %v596_v13, 0.0  ;;  %v330_v4 = vunpack.c.h.bf16 %v243_v56 }
  0x81   :  { %1105 = vmatmul.mubr.bf16.gmra.mrb[32].mxu0 %v2987_v32  ;;  %1233 = vmatmul.mubr.bf16.gmra.mrb[32].mxu1 %v857_v52  ;;  %v455_v32 = vadd.f32 %v327_v35, %v135_v25  ;;  %v518_v52 = vadd.f32 %v390_v45, %v198_v40  ;;  %v721_v59 = vmax.f32 %v593_v47, 0.0  ;;  %v657_v10 = vadd.f32 %v2571_v28, %v517_v1  ;;  %v53_v40 = vld [vmem:[%s3666_s0 + $0xc0] sm:$0xff]  ;;  %v54_v45 = vld [vmem:[%s3666_s0 + $0xc8] sm:$0xff] }
  0x82   :  { %1112 = vmatprep.mubr.bf16.mxu0 %v828_v2  ;;  %1240 = vmatprep.mubr.bf16.mxu1 %v860_v15  ;;  %v830_v58 = vpack.c.bf16 %v724_v46, %v722_v44  ;;  %v519_v2 = vadd.f32 %v391_v61, %v199_v53  ;;  %v332_v12 = vunpack.c.h.bf16 %v244_v11  ;;  %v788_v60 = vmax.f32 %v660_v41, 0.0  ;;  %v245_v46 = vld [vmem:[%s3667_s1 + $0xc0] sm:$0xff] }
  0x83   :  { %v595_v49 = vadd.f32 %v2571_v28, %v455_v32  ;;  %v658_v63 = vadd.f32 %v2573_v29, %v518_v52  ;;  %v458_v54 = vadd.f32 %v330_v4, %v138_v37  ;;  %v137_v16 = vunpack.c.l.bf16 %v51_v23  ;;  %v86_v4 = vld [vmem:[%s3666_s0 + $0x1c8] sm:$0xff] }
  0x84   :  { %v659_v14 = vadd.f32 %v2571_v28, %v519_v2  ;;  %v460_v36 = vadd.f32 %v332_v12, %v140_v0  ;;  %v139_v42 = vunpack.c.l.bf16 %v52_v57  ;;  %v329_v3 = vunpack.c.l.bf16 %v243_v56  ;;  %v85_v0 = vld [vmem:[%s3666_s0 + $0x1c0] sm:$0xff] }
  0x85   :  { %v723_v62 = vmax.f32 %v595_v49, 0.0  ;;  %v786_v8 = vmax.f32 %v658_v63, 0.0  ;;  %v598_v27 = vadd.f32 %v2573_v29, %v458_v54  ;;  %v331_v30 = vunpack.c.l.bf16 %v244_v11  ;;  %v246_v49 = vld [vmem:[%s3667_s1 + $0xc8] sm:$0xff] }
  0x86   :  { %v787_v26 = vmax.f32 %v659_v14, 0.0  ;;  %v600_v33 = vadd.f32 %v2573_v29, %v460_v36  ;;  %v457_v9 = vadd.f32 %v329_v3, %v137_v16  ;;  %v202_v25 = vunpack.c.h.bf16 %v83_v19 }
  0x87   :  { %v829_v6 = vpack.c.bf16 %v723_v62, %v721_v59  ;;  %v862_v21 = vpack.c.bf16 %v788_v60, %v786_v8  ;;  %v204_v7 = vunpack.c.h.bf16 %v84_v17  ;;  %v726_v15 = vmax.f32 %v598_v27, 0.0  ;;  %v277_v60 = vld [vmem:[%s3667_s1 + $0x1c0] sm:$0xff] }
  0x88   :  { %v459_v24 = vadd.f32 %v331_v30, %v139_v42  ;;  %v394_v5 = vunpack.c.h.bf16 %v275_v20  ;;  %v728_v35 = vmax.f32 %v600_v33, 0.0  ;;  %v597_v51 = vadd.f32 %v2571_v28, %v457_v9 }
  0x89   :  { %1113 = vmatmul.mubr.bf16.gmra.mrb[36].mxu0 %v827_v18  ;;  %1241 = vmatmul.mubr.bf16.gmra.mrb[36].mxu1 %v859_v43  ;;  %v785_v18 = vmax.f32 %v657_v10, 0.0  ;;  %v396_v13 = vunpack.c.h.bf16 %v276_v31  ;;  %v201_v39 = vunpack.c.l.bf16 %v83_v19  ;;  %v203_v44 = vunpack.c.l.bf16 %v84_v17  ;;  %v278_v17 = vld [vmem:[%s3667_s1 + $0x1c8] sm:$0xff] }
  0x8a   :  { %1120 = vmatprep.mubr.bf16.mxu0 %v830_v58  ;;  %1248 = vmatprep.mubr.bf16.mxu1 %v862_v21  ;;  %v599_v38 = vadd.f32 %v2571_v28, %v459_v24  ;;  %v522_v43 = vadd.f32 %v394_v5, %v202_v25  ;;  %v393_v32 = vunpack.c.l.bf16 %v275_v20  ;;  %v832_v47 = vpack.c.bf16 %v728_v35, %v726_v15  ;;  %v55_v25 = vld [vmem:[%s3666_s0 + $0xd0] sm:$0xff]  ;;  %v56_v5 = vld [vmem:[%s3666_s0 + $0xd8] sm:$0xff] }
  0x8b   :  { %v861_v34 = vpack.c.bf16 %v787_v26, %v785_v18  ;;  %v725_v50 = vmax.f32 %v597_v51, 0.0  ;;  %v524_v48 = vadd.f32 %v396_v13, %v204_v7  ;;  %v395_v23 = vunpack.c.l.bf16 %v276_v31  ;;  %v247_v35 = vld [vmem:[%s3667_s1 + $0xd0] sm:$0xff] }
  0x8c   :  { %v727_v52 = vmax.f32 %v599_v38, 0.0  ;;  %v662_v53 = vadd.f32 %v2573_v29, %v522_v43  ;;  %v521_v55 = vadd.f32 %v393_v32, %v201_v39  ;;  %v142_v57 = vunpack.c.h.bf16 %v53_v40  ;;  %v248_v38 = vld [vmem:[%s3667_s1 + $0xd8] sm:$0xff] }
  0x8d   :  { %v664_v56 = vadd.f32 %v2573_v29, %v524_v48  ;;  %v523_v58 = vadd.f32 %v395_v23, %v203_v44  ;;  %v144_v59 = vunpack.c.h.bf16 %v54_v45  ;;  %v334_v22 = vunpack.c.h.bf16 %v245_v46 }
  0x8e   :  { %v831_v61 = vpack.c.bf16 %v727_v52, %v725_v50  ;;  %v790_v11 = vmax.f32 %v662_v53, 0.0  ;;  %v661_v62 = vadd.f32 %v2571_v28, %v521_v55  ;;  %v336_v63 = vunpack.c.h.bf16 %v246_v49 }
  0x8f   :  { %v792_v1 = vmax.f32 %v664_v56, 0.0  ;;  %v663_v37 = vadd.f32 %v2571_v28, %v523_v58  ;;  %v462_v41 = vadd.f32 %v334_v22, %v142_v57  ;;  %v141_v2 = vunpack.c.l.bf16 %v53_v40  ;;  %v88_v22 = vld [vmem:[%s3666_s0 + $0x1d8] sm:$0xff] }
  0x90   :  { %v464_v8 = vadd.f32 %v336_v63, %v144_v59  ;;  %v143_v10 = vunpack.c.l.bf16 %v54_v45  ;;  %v333_v12 = vunpack.c.l.bf16 %v245_v46  ;;  %v335_v19 = vunpack.c.l.bf16 %v246_v49  ;;  %v87_v59 = vld [vmem:[%s3666_s0 + $0x1d0] sm:$0xff] }
  0x91   :  { %1121 = vmatmul.mubr.bf16.gmra.mrb[40].mxu0 %v829_v6  ;;  %1249 = vmatmul.mubr.bf16.gmra.mrb[40].mxu1 %v861_v34  ;;  %v789_v6 = vmax.f32 %v661_v62, 0.0  ;;  %v864_v14 = vpack.c.bf16 %v792_v1, %v790_v11  ;;  %v791_v54 = vmax.f32 %v663_v37, 0.0  ;;  %v602_v16 = vadd.f32 %v2573_v29, %v462_v41  ;;  %v279_v1 = vld [vmem:[%s3667_s1 + $0x1d0] sm:$0xff] }
  0x92   :  { %1128 = vmatprep.mubr.bf16.mxu0 %v832_v47  ;;  %v604_v18 = vadd.f32 %v2573_v29, %v464_v8  ;;  %v461_v36 = vadd.f32 %v333_v12, %v141_v2  ;;  %v206_v42 = vunpack.c.h.bf16 %v85_v0  ;;  %v208_v3 = vunpack.c.h.bf16 %v86_v4 }
  0x93   :  { %1256 = vmatprep.mubr.bf16.mxu1 %v864_v14  ;;  %v863_v20 = vpack.c.bf16 %v791_v54, %v789_v6  ;;  %v730_v21 = vmax.f32 %v602_v16, 0.0  ;;  %v463_v26 = vadd.f32 %v335_v19, %v143_v10  ;;  %v398_v27 = vunpack.c.h.bf16 %v277_v60 }
  0x94   :  { %v732_v30 = vmax.f32 %v604_v18, 0.0  ;;  %v601_v31 = vadd.f32 %v2571_v28, %v461_v36  ;;  %v400_v33 = vunpack.c.h.bf16 %v278_v17  ;;  %v205_v9 = vunpack.c.l.bf16 %v85_v0 }
  0x95   :  { %v603_v7 = vadd.f32 %v2571_v28, %v463_v26  ;;  %v526_v34 = vadd.f32 %v398_v27, %v206_v42  ;;  %v207_v15 = vunpack.c.l.bf16 %v86_v4  ;;  %v397_v24 = vunpack.c.l.bf16 %v277_v60  ;;  %v280_v4 = vld [vmem:[%s3667_s1 + $0x1d8] sm:$0xff]  ;;  %v57_v42 = vld [vmem:[%s3666_s0 + $0xe0] sm:$0xff]  ;;  %v58_v27 = vld [vmem:[%s3666_s0 + $0xe8] sm:$0xff] }
  0x96   :  { %v834_v51 = vpack.c.bf16 %v732_v30, %v730_v21  ;;  %v729_v13 = vmax.f32 %v601_v31, 0.0  ;;  %v528_v39 = vadd.f32 %v400_v33, %v208_v3  ;;  %v399_v40 = vunpack.c.l.bf16 %v278_v17  ;;  %v249_v30 = vld [vmem:[%s3667_s1 + $0xe0] sm:$0xff] }
  0x97   :  { %v731_v43 = vmax.f32 %v603_v7, 0.0  ;;  %v666_v44 = vadd.f32 %v2573_v29, %v526_v34  ;;  %v525_v32 = vadd.f32 %v397_v24, %v205_v9  ;;  %v146_v45 = vunpack.c.h.bf16 %v55_v25  ;;  %v250_v7 = vld [vmem:[%s3667_s1 + $0xe8] sm:$0xff] }
  0x98   :  { %v668_v46 = vadd.f32 %v2573_v29, %v528_v39  ;;  %v527_v47 = vadd.f32 %v399_v40, %v207_v15  ;;  %v148_v50 = vunpack.c.h.bf16 %v56_v5  ;;  %v338_v48 = vunpack.c.h.bf16 %v247_v35 }
  0x99   :  { %1129 = vmatmul.mubr.bf16.gmra.mrb[44].mxu0 %v831_v61  ;;  %1257 = vmatmul.mubr.bf16.gmra.mrb[44].mxu1 %v863_v20  ;;  %v833_v23 = vpack.c.bf16 %v731_v43, %v729_v13  ;;  %v794_v49 = vmax.f32 %v666_v44, 0.0  ;;  %v665_v52 = vadd.f32 %v2571_v28, %v525_v32  ;;  %v340_v53 = vunpack.c.h.bf16 %v248_v38 }
  0x9a   :  { %1136 = vmatprep.mubr.bf16.mxu0 %v834_v51  ;;  %v796_v55 = vmax.f32 %v668_v46, 0.0  ;;  %v667_v57 = vadd.f32 %v2571_v28, %v527_v47  ;;  %v466_v56 = vadd.f32 %v338_v48, %v146_v45  ;;  %v145_v58 = vunpack.c.l.bf16 %v55_v25  ;;  %v90_v48 = vld [vmem:[%s3666_s0 + $0x1e8] sm:$0xff] }
  0x9b   :  { %v793_v61 = vmax.f32 %v665_v52, 0.0  ;;  %v468_v11 = vadd.f32 %v340_v53, %v148_v50  ;;  %v147_v62 = vunpack.c.l.bf16 %v56_v5  ;;  %v337_v63 = vunpack.c.l.bf16 %v247_v35  ;;  %v89_v50 = vld [vmem:[%s3666_s0 + $0x1e0] sm:$0xff] }
  0x9c   :  { %v866_v37 = vpack.c.bf16 %v796_v55, %v794_v49  ;;  %v795_v41 = vmax.f32 %v667_v57, 0.0  ;;  %v606_v2 = vadd.f32 %v2573_v29, %v466_v56  ;;  %v339_v0 = vunpack.c.l.bf16 %v248_v38  ;;  %v281_v55 = vld [vmem:[%s3667_s1 + $0x1e0] sm:$0xff] }
  0x9d   :  { %v608_v6 = vadd.f32 %v2573_v29, %v468_v11  ;;  %v465_v8 = vadd.f32 %v337_v63, %v145_v58  ;;  %v210_v10 = vunpack.c.h.bf16 %v87_v59  ;;  %v212_v12 = vunpack.c.h.bf16 %v88_v22 }
  0x9e   :  { %1264 = vmatprep.mubr.bf16.mxu1 %v866_v37  ;;  %v865_v60 = vpack.c.bf16 %v795_v41, %v793_v61  ;;  %v734_v14 = vmax.f32 %v606_v2, 0.0  ;;  %v467_v54 = vadd.f32 %v339_v0, %v147_v62  ;;  %v402_v16 = vunpack.c.h.bf16 %v279_v1 }
  0x9f   :  { %v736_v19 = vmax.f32 %v608_v6, 0.0  ;;  %v605_v17 = vadd.f32 %v2571_v28, %v465_v8  ;;  %v404_v18 = vunpack.c.h.bf16 %v280_v4  ;;  %v209_v36 = vunpack.c.l.bf16 %v87_v59 }
  0xa0   :  { %v607_v3 = vadd.f32 %v2571_v28, %v467_v54  ;;  %v530_v20 = vadd.f32 %v402_v16, %v210_v10  ;;  %v211_v21 = vunpack.c.l.bf16 %v88_v22  ;;  %v401_v26 = vunpack.c.l.bf16 %v279_v1  ;;  %v282_v22 = vld [vmem:[%s3667_s1 + $0x1e8] sm:$0xff]  ;;  %v59_v10 = vld [vmem:[%s3666_s0 + $0xf0] sm:$0xff]  ;;  %v60_v16 = vld [vmem:[%s3666_s0 + $0xf8] sm:$0xff] }
  0xa1   :  { %1137 = vmatmul.mubr.bf16.gmra.mrb[48].mxu0 %v833_v23  ;;  %1265 = vmatmul.mubr.bf16.gmra.mrb[48].mxu1 %v865_v60  ;;  %v836_v31 = vpack.c.bf16 %v736_v19, %v734_v14  ;;  %v733_v33 = vmax.f32 %v605_v17, 0.0  ;;  %v532_v9 = vadd.f32 %v404_v18, %v212_v12  ;;  %v403_v25 = vunpack.c.l.bf16 %v280_v4  ;;  %v251_v19 = vld [vmem:[%s3667_s1 + $0xf0] sm:$0xff] }
  0xa2   :  { %v735_v34 = vmax.f32 %v607_v3, 0.0  ;;  %v670_v15 = vadd.f32 %v2573_v29, %v530_v20  ;;  %v529_v24 = vadd.f32 %v401_v26, %v209_v36  ;;  %v150_v5 = vunpack.c.h.bf16 %v57_v42  ;;  %v252_v3 = vld [vmem:[%s3667_s1 + $0xf8] sm:$0xff] }
  0xa3   :  { %1144 = vmatprep.mubr.bf16.mxu0 %v836_v31  ;;  %v672_v35 = vadd.f32 %v2573_v29, %v532_v9  ;;  %v531_v51 = vadd.f32 %v403_v25, %v211_v21  ;;  %v152_v13 = vunpack.c.h.bf16 %v58_v27  ;;  %v342_v39 = vunpack.c.h.bf16 %v249_v30 }
  0xa4   :  { %v835_v40 = vpack.c.bf16 %v735_v34, %v733_v33  ;;  %v798_v38 = vmax.f32 %v670_v15, 0.0  ;;  %v669_v43 = vadd.f32 %v2571_v28, %v529_v24  ;;  %v344_v44 = vunpack.c.h.bf16 %v250_v7 }
  0xa5   :  { %v800_v32 = vmax.f32 %v672_v35, 0.0  ;;  %v671_v45 = vadd.f32 %v2571_v28, %v531_v51  ;;  %v470_v46 = vadd.f32 %v342_v39, %v150_v5  ;;  %v149_v47 = vunpack.c.l.bf16 %v57_v42  ;;  %v92_v39 = vld [vmem:[%s3666_s0 + $0x1f8] sm:$0xff] }
  0xa6   :  { %v797_v23 = vmax.f32 %v669_v43, 0.0  ;;  %v472_v49 = vadd.f32 %v344_v44, %v152_v13  ;;  %v151_v52 = vunpack.c.l.bf16 %v58_v27  ;;  %v341_v53 = vunpack.c.l.bf16 %v249_v30  ;;  %v91_v13 = vld [vmem:[%s3666_s0 + $0x1f0] sm:$0xff] }
  0xa7   :  { %v868_v57 = vpack.c.bf16 %v800_v32, %v798_v38  ;;  %v799_v56 = vmax.f32 %v671_v45, 0.0  ;;  %v610_v58 = vadd.f32 %v2573_v29, %v470_v46  ;;  %v343_v59 = vunpack.c.l.bf16 %v250_v7  ;;  %v283_v32 = vld [vmem:[%s3667_s1 + $0x1f0] sm:$0xff] }
  0xa8   :  { %v612_v61 = vadd.f32 %v2573_v29, %v472_v49  ;;  %v469_v11 = vadd.f32 %v341_v53, %v149_v47  ;;  %v214_v62 = vunpack.c.h.bf16 %v89_v50  ;;  %v216_v63 = vunpack.c.h.bf16 %v90_v48 }
  0xa9   :  { %1145 = vmatmul.mubr.bf16.gmra.mrb[52].mxu0 %v835_v40  ;;  %1272 = vmatprep.mubr.bf16.mxu1 %v868_v57  ;;  %v867_v1 = vpack.c.bf16 %v799_v56, %v797_v23  ;;  %v738_v37 = vmax.f32 %v610_v58, 0.0  ;;  %v471_v41 = vadd.f32 %v343_v59, %v151_v52  ;;  %v406_v2 = vunpack.c.h.bf16 %v281_v55 }
  0xaa   :  { %v740_v0 = vmax.f32 %v612_v61, 0.0  ;;  %v609_v4 = vadd.f32 %v2571_v28, %v469_v11  ;;  %v408_v6 = vunpack.c.h.bf16 %v282_v22  ;;  %v213_v8 = vunpack.c.l.bf16 %v89_v50 }
  0xab   :  { %1273 = vmatmul.mubr.bf16.gmra.mrb[52].mxu1 %v867_v1  ;;  %v611_v12 = vadd.f32 %v2571_v28, %v471_v41  ;;  %v534_v60 = vadd.f32 %v406_v2, %v214_v62  ;;  %v215_v14 = vunpack.c.l.bf16 %v90_v48  ;;  %v405_v54 = vunpack.c.l.bf16 %v281_v55  ;;  %v284_v48 = vld [vmem:[%s3667_s1 + $0x1f8] sm:$0xff] }
  0xac   :  { %v838_v17 = vpack.c.bf16 %v740_v0, %v738_v37  ;;  %v737_v18 = vmax.f32 %v609_v4, 0.0  ;;  %v536_v36 = vadd.f32 %v408_v6, %v216_v63  ;;  %v407_v42 = vunpack.c.l.bf16 %v282_v22 }
  0xad   :  { %v739_v20 = vmax.f32 %v611_v12, 0.0  ;;  %v674_v21 = vadd.f32 %v2573_v29, %v534_v60  ;;  %v533_v26 = vadd.f32 %v405_v54, %v213_v8  ;;  %v154_v27 = vunpack.c.h.bf16 %v59_v10 }
  0xae   :  { %1152 = vmatprep.mubr.bf16.mxu0 %v838_v17  ;;  %v676_v30 = vadd.f32 %v2573_v29, %v536_v36  ;;  %v535_v31 = vadd.f32 %v407_v42, %v215_v14  ;;  %v156_v33 = vunpack.c.h.bf16 %v60_v16  ;;  %v346_v9 = vunpack.c.h.bf16 %v251_v19 }
  0xaf   :  { %v837_v25 = vpack.c.bf16 %v739_v20, %v737_v18  ;;  %v802_v7 = vmax.f32 %v674_v21, 0.0  ;;  %v673_v34 = vadd.f32 %v2571_v28, %v533_v26  ;;  %v348_v15 = vunpack.c.h.bf16 %v252_v3  ;;  %v3208_v20 = vld [vmem:[%s3669_s4] ss:$0 sm:$0xff] }
  0xb0   :  { %v804_v24 = vmax.f32 %v676_v30, 0.0  ;;  %v675_v5 = vadd.f32 %v2571_v28, %v535_v31  ;;  %v474_v35 = vadd.f32 %v346_v9, %v154_v27  ;;  %v153_v51 = vunpack.c.l.bf16 %v59_v10  ;;  %v3215_v9 = vld [vmem:[%s3670_s5] ss:$0 sm:$0xff] }
  0xb1   :  { %1153 = vmatmul.mubr.bf16.gmra.mrb[56].mxu0 %v837_v25  ;;  %v801_v40 = vmax.f32 %v673_v34, 0.0  ;;  %v476_v38 = vadd.f32 %v348_v15, %v156_v33  ;;  %v155_v43 = vunpack.c.l.bf16 %v60_v16  ;;  %v345_v44 = vunpack.c.l.bf16 %v251_v19 }
  0xb2   :  { %v870_v45 = vpack.c.bf16 %v804_v24, %v802_v7  ;;  %v803_v46 = vmax.f32 %v675_v5, 0.0  ;;  %v614_v47 = vadd.f32 %v2573_v29, %v474_v35  ;;  %v347_v50 = vunpack.c.l.bf16 %v252_v3 }
  0xb3   :  { %v616_v23 = vadd.f32 %v2573_v29, %v476_v38  ;;  %v473_v49 = vadd.f32 %v345_v44, %v153_v51  ;;  %v218_v52 = vunpack.c.h.bf16 %v91_v13  ;;  %v220_v53 = vunpack.c.h.bf16 %v92_v39 }
  0xb4   :  { %1280 = vmatprep.mubr.bf16.mxu1 %v870_v45  ;;  %v869_v55 = vpack.c.bf16 %v803_v46, %v801_v40  ;;  %v742_v57 = vmax.f32 %v614_v47, 0.0  ;;  %v475_v56 = vadd.f32 %v347_v50, %v155_v43  ;;  %v410_v58 = vunpack.c.h.bf16 %v283_v32 }
  0xb5   :  { %v744_v59 = vmax.f32 %v616_v23, 0.0  ;;  %v613_v22 = vadd.f32 %v2571_v28, %v473_v49  ;;  %v412_v61 = vunpack.c.h.bf16 %v284_v48  ;;  %v217_v11 = vunpack.c.l.bf16 %v91_v13 }
  0xb6   :  { %1281 = vmatmul.mubr.bf16.gmra.mrb[56].mxu1 %v869_v55  ;;  %v615_v62 = vadd.f32 %v2571_v28, %v475_v56  ;;  %v538_v63 = vadd.f32 %v410_v58, %v218_v52  ;;  %v219_v1 = vunpack.c.l.bf16 %v92_v39  ;;  %v409_v37 = vunpack.c.l.bf16 %v283_v32 }
  0xb7   :  { %v840_v41 = vpack.c.bf16 %v744_v59, %v742_v57  ;;  %v741_v2 = vmax.f32 %v613_v22, 0.0  ;;  %v540_v0 = vadd.f32 %v412_v61, %v220_v53  ;;  %v411_v4 = vunpack.c.l.bf16 %v284_v48 }
  0xb8   :  { %v743_v6 = vmax.f32 %v615_v62, 0.0  ;;  %v678_v8 = vadd.f32 %v2573_v29, %v538_v63  ;;  %v537_v10 = vadd.f32 %v409_v37, %v217_v11  ;;  %v12_v11 = vstv %s3671_s6 }
  0xb9   :  { %1160 = vmatprep.mubr.bf16.mxu0 %v840_v41  ;;  %v680_v12 = vadd.f32 %v2573_v29, %v540_v0  ;;  %v539_v60 = vadd.f32 %v411_v4, %v219_v1  ;;  %13 = vst [vmem:[#allocation2] sm:$0x1] %v12_v11 }
  0xba   :  { %v839_v14 = vpack.c.bf16 %v743_v6, %v741_v2  ;;  %v806_v54 = vmax.f32 %v678_v8, 0.0  ;;  %v677_v16 = vadd.f32 %v2571_v28, %v537_v10 }
  0xbb   :  { %v808_v19 = vmax.f32 %v680_v12, 0.0  ;;  %v679_v17 = vadd.f32 %v2571_v28, %v539_v60 }
  0xbc   :  { %1161 = vmatmul.mubr.bf16.gmra.mrb[60].mxu0 %v839_v14  ;;  %v805_v18 = vmax.f32 %v677_v16, 0.0 }
  0xbd   :  { %v872_v36 = vpack.c.bf16 %v808_v19, %v806_v54  ;;  %v807_v42 = vmax.f32 %v679_v17, 0.0 }
  0xbf   :  { %1288 = vmatprep.mubr.bf16.mxu1 %v872_v36  ;;  %v871_v3 = vpack.c.bf16 %v807_v42, %v805_v18 }
  0xc1   :  { %1289 = vmatmul.mubr.bf16.gmra.mrb[60].mxu1 %v871_v3 }
 0x114   :  { %v1042_v29 = vpop.f32.mrb[0].mxu0  ;;  %v1170_v21 = vpop.f32.mrb[0].mxu1 }
 0x115   :  { %v1043_v26 = vadd.f32 %v3208_v20, %v1042_v29  ;;  %v1171_v27 = vadd.f32 %v3208_v20, %v1170_v21  ;;  %v1044_v30 = vpop.f32.mrb[1].mxu0  ;;  %v1172_v28 = vpop.f32.mrb[1].mxu1 }
 0x116   :  { %v1045_v31 = vpop.f32.mrb[2].mxu0  ;;  %v1173_v33 = vpop.f32.mrb[2].mxu1 }
 0x117   :  { %v1297_v25 = vmax.f32 %v1043_v26, 0.0  ;;  %v1174_v7 = vadd.f32 %v3208_v20, %v1173_v33  ;;  %v1047_v34 = vpop.f32.mrb[3].mxu0  ;;  %v1175_v15 = vpop.f32.mrb[3].mxu1  ;;  %v1329_v24 = vmax.f32 %v1171_v27, 0.0  ;;  %v1046_v5 = vadd.f32 %v3208_v20, %v1045_v31 }
 0x119   :  { %v1330_v35 = vmax.f32 %v1174_v7, 0.0  ;;  %v1368_v51 = vmul.f32 %v3215_v9, %v1297_v25  ;;  %v1298_v38 = vmax.f32 %v1046_v5, 0.0  ;;  %v1400_v45 = vmul.f32 %v3215_v9, %v1329_v24 }
 0x11b   :  { %1432 = vadd.xlane.f32.xlu0 %v1368_v51  ;;  %v1401_v13 = vmul.f32 %v3215_v9, %v1330_v35  ;;  %v1369_v58 = vmul.f32 %v3215_v9, %v1298_v38 }
 0x11c   :  { %v1050_v39 = vpop.f32.mrb[4].mxu0  ;;  %v1178_v40 = vpop.f32.mrb[4].mxu1 }
 0x11d   :  { %v1051_v43 = vadd.f32 %v3208_v20, %v1050_v39  ;;  %1498 = vadd.xlane.f32.xlu1 %v1401_v13  ;;  %v1052_v44 = vpop.f32.mrb[5].mxu0  ;;  %v1179_v32 = vadd.f32 %v3208_v20, %v1178_v40  ;;  %v1180_v46 = vpop.f32.mrb[5].mxu1 }
 0x11e   :  { %v1053_v47 = vpop.f32.mrb[6].mxu0  ;;  %v1181_v50 = vpop.f32.mrb[6].mxu1 }
 0x11f   :  { %v1299_v48 = vmax.f32 %v1051_v43, 0.0  ;;  %v1054_v23 = vadd.f32 %v3208_v20, %v1053_v47  ;;  %v1055_v49 = vpop.f32.mrb[7].mxu0  ;;  %v1331_v52 = vmax.f32 %v1179_v32, 0.0  ;;  %1496 = vadd.xlane.f32.xlu0 %v1400_v45  ;;  %v1183_v53 = vpop.f32.mrb[7].mxu1  ;;  %v1182_v57 = vadd.f32 %v3208_v20, %v1181_v50 }
 0x121   :  { %v1300_v55 = vmax.f32 %v1054_v23, 0.0  ;;  %v1370_v56 = vmul.f32 %v3215_v9, %v1299_v48  ;;  %v1402_v59 = vmul.f32 %v3215_v9, %v1331_v52  ;;  %v1332_v62 = vmax.f32 %v1182_v57, 0.0 }
 0x123   :  { %1436 = vadd.xlane.f32.xlu1 %v1370_v56  ;;  %1434 = vadd.xlane.f32.xlu0 %v1369_v58  ;;  %v1371_v41 = vmul.f32 %v3215_v9, %v1300_v55  ;;  %v1403_v16 = vmul.f32 %v3215_v9, %v1332_v62 }
 0x124   :  { %v1058_v22 = vpop.f32.mrb[8].mxu0  ;;  %v1186_v61 = vpop.f32.mrb[8].mxu1 }
 0x125   :  { %v1059_v63 = vadd.f32 %v3208_v20, %v1058_v22  ;;  %v1060_v1 = vpop.f32.mrb[9].mxu0  ;;  %v1187_v37 = vadd.f32 %v3208_v20, %v1186_v61  ;;  %v1188_v2 = vpop.f32.mrb[9].mxu1 }
 0x126   :  { %v1061_v0 = vpop.f32.mrb[10].mxu0  ;;  %v1189_v4 = vpop.f32.mrb[10].mxu1 }
 0x127   :  { %v1301_v6 = vmax.f32 %v1059_v63, 0.0  ;;  %v1062_v8 = vadd.f32 %v3208_v20, %v1061_v0  ;;  %v1063_v10 = vpop.f32.mrb[11].mxu0  ;;  %v1333_v12 = vmax.f32 %v1187_v37, 0.0  ;;  %1438 = vadd.xlane.f32.xlu1 %v1371_v41  ;;  %1500 = vadd.xlane.f32.xlu0 %v1402_v59  ;;  %v1191_v60 = vpop.f32.mrb[11].mxu1  ;;  %v1190_v54 = vadd.f32 %v3208_v20, %v1189_v4 }
 0x129   :  { %v1302_v14 = vmax.f32 %v1062_v8, 0.0  ;;  %v1372_v19 = vmul.f32 %v3215_v9, %v1301_v6  ;;  %v1404_v17 = vmul.f32 %v3215_v9, %v1333_v12  ;;  %v1334_v42 = vmax.f32 %v1190_v54, 0.0 }
 0x12b   :  { %1502 = vadd.xlane.f32.xlu1 %v1403_v16  ;;  %1440 = vadd.xlane.f32.xlu0 %v1372_v19  ;;  %v1373_v26 = vmul.f32 %v3215_v9, %v1302_v14  ;;  %v1405_v5 = vmul.f32 %v3215_v9, %v1334_v42 }
 0x12c   :  { %v1066_v18 = vpop.f32.mrb[12].mxu0  ;;  %v1194_v36 = vpop.f32.mrb[12].mxu1 }
 0x12d   :  { %v1067_v3 = vadd.f32 %v3208_v20, %v1066_v18  ;;  %v1068_v29 = vpop.f32.mrb[13].mxu0  ;;  %v1195_v21 = vadd.f32 %v3208_v20, %v1194_v36  ;;  %v1196_v27 = vpop.f32.mrb[13].mxu1 }
 0x12e   :  { %v1069_v30 = vpop.f32.mrb[14].mxu0  ;;  %v1197_v28 = vpop.f32.mrb[14].mxu1 }
 0x12f   :  { %v1303_v31 = vmax.f32 %v1067_v3, 0.0  ;;  %v1070_v33 = vadd.f32 %v3208_v20, %v1069_v30  ;;  %v1071_v25 = vpop.f32.mrb[15].mxu0  ;;  %v1335_v7 = vmax.f32 %v1195_v21, 0.0  ;;  %1442 = vadd.xlane.f32.xlu1 %v1373_v26  ;;  %1504 = vadd.xlane.f32.xlu0 %v1404_v17  ;;  %v1199_v34 = vpop.f32.mrb[15].mxu1  ;;  %v1198_v24 = vadd.f32 %v3208_v20, %v1197_v28 }
 0x131   :  { %v1304_v15 = vmax.f32 %v1070_v33, 0.0  ;;  %v1374_v35 = vmul.f32 %v3215_v9, %v1303_v31  ;;  %v1406_v51 = vmul.f32 %v3215_v9, %v1335_v7  ;;  %v1336_v40 = vmax.f32 %v1198_v24, 0.0 }
 0x133   :  { %1506 = vadd.xlane.f32.xlu1 %v1405_v5  ;;  %1444 = vadd.xlane.f32.xlu0 %v1374_v35  ;;  %v1375_v32 = vmul.f32 %v3215_v9, %v1304_v15  ;;  %v1407_v57 = vmul.f32 %v3215_v9, %v1336_v40 }
 0x134   :  { %v1074_v13 = vpop.f32.mrb[16].mxu0  ;;  %v1202_v39 = vpop.f32.mrb[16].mxu1 }
 0x135   :  { %v1075_v38 = vadd.f32 %v3208_v20, %v1074_v13  ;;  %v1076_v43 = vpop.f32.mrb[17].mxu0  ;;  %v1203_v44 = vadd.f32 %v3208_v20, %v1202_v39  ;;  %v1204_v45 = vpop.f32.mrb[17].mxu1 }
 0x136   :  { %v1077_v46 = vpop.f32.mrb[18].mxu0  ;;  %v1205_v47 = vpop.f32.mrb[18].mxu1 }
 0x137   :  { %v1305_v50 = vmax.f32 %v1075_v38, 0.0  ;;  %v1078_v48 = vadd.f32 %v3208_v20, %v1077_v46  ;;  %v1079_v23 = vpop.f32.mrb[19].mxu0  ;;  %v1337_v49 = vmax.f32 %v1203_v44, 0.0  ;;  %1446 = vadd.xlane.f32.xlu1 %v1375_v32  ;;  %1508 = vadd.xlane.f32.xlu0 %v1406_v51  ;;  %v1207_v52 = vpop.f32.mrb[19].mxu1  ;;  %v1206_v55 = vadd.f32 %v3208_v20, %v1205_v47 }
 0x139   :  { %v1306_v53 = vmax.f32 %v1078_v48, 0.0  ;;  %v1376_v56 = vmul.f32 %v3215_v9, %v1305_v50  ;;  %v1408_v58 = vmul.f32 %v3215_v9, %v1337_v49  ;;  %v1338_v61 = vmax.f32 %v1206_v55, 0.0 }
 0x13b   :  { %1510 = vadd.xlane.f32.xlu1 %v1407_v57  ;;  %1448 = vadd.xlane.f32.xlu0 %v1376_v56  ;;  %v1377_v1 = vmul.f32 %v3215_v9, %v1306_v53  ;;  %v1409_v14 = vmul.f32 %v3215_v9, %v1338_v61 }
 0x13c   :  { %v1082_v59 = vpop.f32.mrb[20].mxu0  ;;  %v1210_v22 = vpop.f32.mrb[20].mxu1 }
 0x13d   :  { %v1083_v11 = vadd.f32 %v3208_v20, %v1082_v59  ;;  %v1084_v62 = vpop.f32.mrb[21].mxu0  ;;  %v1211_v63 = vadd.f32 %v3208_v20, %v1210_v22  ;;  %v1212_v37 = vpop.f32.mrb[21].mxu1 }
 0x13e   :  { %v1085_v41 = vpop.f32.mrb[22].mxu0  ;;  %v1213_v2 = vpop.f32.mrb[22].mxu1 }
 0x13f   :  { %v1307_v0 = vmax.f32 %v1083_v11, 0.0  ;;  %v1086_v4 = vadd.f32 %v3208_v20, %v1085_v41  ;;  %v1087_v6 = vpop.f32.mrb[23].mxu0  ;;  %v1339_v8 = vmax.f32 %v1211_v63, 0.0  ;;  %1450 = vadd.xlane.f32.xlu1 %v1377_v1  ;;  %1512 = vadd.xlane.f32.xlu0 %v1408_v58  ;;  %v1215_v10 = vpop.f32.mrb[23].mxu1  ;;  %v1214_v60 = vadd.f32 %v3208_v20, %v1213_v2 }
 0x141   :  { %v1308_v12 = vmax.f32 %v1086_v4, 0.0  ;;  %v1378_v54 = vmul.f32 %v3215_v9, %v1307_v0  ;;  %v1410_v16 = vmul.f32 %v3215_v9, %v1339_v8  ;;  %v1340_v18 = vmax.f32 %v1214_v60, 0.0 }
 0x143   :  { %1514 = vadd.xlane.f32.xlu1 %v1409_v14  ;;  %1452 = vadd.xlane.f32.xlu0 %v1378_v54  ;;  %v1379_v29 = vmul.f32 %v3215_v9, %v1308_v12  ;;  %v1411_v15 = vmul.f32 %v3215_v9, %v1340_v18 }
 0x144   :  { %v1090_v19 = vpop.f32.mrb[24].mxu0  ;;  %v1218_v17 = vpop.f32.mrb[24].mxu1 }
 0x145   :  { %v1091_v36 = vadd.f32 %v3208_v20, %v1090_v19  ;;  %v1092_v42 = vpop.f32.mrb[25].mxu0  ;;  %v1219_v3 = vadd.f32 %v3208_v20, %v1218_v17  ;;  %v1220_v21 = vpop.f32.mrb[25].mxu1 }
 0x146   :  { %v1093_v26 = vpop.f32.mrb[26].mxu0  ;;  %v1221_v27 = vpop.f32.mrb[26].mxu1 }
 0x147   :  { %v1309_v30 = vmax.f32 %v1091_v36, 0.0  ;;  %v1094_v28 = vadd.f32 %v3208_v20, %v1093_v26  ;;  %v1095_v31 = vpop.f32.mrb[27].mxu0  ;;  %v1341_v33 = vmax.f32 %v1219_v3, 0.0  ;;  %1454 = vadd.xlane.f32.xlu1 %v1379_v29  ;;  %1516 = vadd.xlane.f32.xlu0 %v1410_v16  ;;  %v1223_v25 = vpop.f32.mrb[27].mxu1  ;;  %v1222_v34 = vadd.f32 %v3208_v20, %v1221_v27 }
 0x149   :  { %v1310_v7 = vmax.f32 %v1094_v28, 0.0  ;;  %v1380_v24 = vmul.f32 %v3215_v9, %v1309_v30  ;;  %v1412_v5 = vmul.f32 %v3215_v9, %v1341_v33  ;;  %v1342_v13 = vmax.f32 %v1222_v34, 0.0 }
 0x14b   :  { %1518 = vadd.xlane.f32.xlu1 %v1411_v15  ;;  %1456 = vadd.xlane.f32.xlu0 %v1380_v24  ;;  %v1381_v43 = vmul.f32 %v3215_v9, %v1310_v7  ;;  %v1413_v53 = vmul.f32 %v3215_v9, %v1342_v13 }
 0x14c   :  { %v1098_v35 = vpop.f32.mrb[28].mxu0  ;;  %v1226_v51 = vpop.f32.mrb[28].mxu1 }
 0x14d   :  { %v1099_v39 = vadd.f32 %v3208_v20, %v1098_v35  ;;  %v1100_v40 = vpop.f32.mrb[29].mxu0  ;;  %v1227_v38 = vadd.f32 %v3208_v20, %v1226_v51  ;;  %v1228_v44 = vpop.f32.mrb[29].mxu1 }
 0x14e   :  { %v1101_v32 = vpop.f32.mrb[30].mxu0  ;;  %v1229_v45 = vpop.f32.mrb[30].mxu1 }
 0x14f   :  { %v1311_v46 = vmax.f32 %v1099_v39, 0.0  ;;  %v1102_v47 = vadd.f32 %v3208_v20, %v1101_v32  ;;  %v1103_v50 = vpop.f32.mrb[31].mxu0  ;;  %v1343_v48 = vmax.f32 %v1227_v38, 0.0  ;;  %1458 = vadd.xlane.f32.xlu1 %v1381_v43  ;;  %1520 = vadd.xlane.f32.xlu0 %v1412_v5  ;;  %v1231_v23 = vpop.f32.mrb[31].mxu1  ;;  %v1230_v52 = vadd.f32 %v3208_v20, %v1229_v45 }
 0x151   :  { %v1312_v49 = vmax.f32 %v1102_v47, 0.0  ;;  %v1382_v55 = vmul.f32 %v3215_v9, %v1311_v46  ;;  %v1414_v57 = vmul.f32 %v3215_v9, %v1343_v48  ;;  %v1344_v59 = vmax.f32 %v1230_v52, 0.0 }
 0x153   :  { %1522 = vadd.xlane.f32.xlu1 %v1413_v53  ;;  %1460 = vadd.xlane.f32.xlu0 %v1382_v55  ;;  %v1383_v62 = vmul.f32 %v3215_v9, %v1312_v49  ;;  %v1415_v12 = vmul.f32 %v3215_v9, %v1344_v59 }
 0x154   :  { %v1106_v56 = vpop.f32.mrb[32].mxu0  ;;  %v1234_v58 = vpop.f32.mrb[32].mxu1 }
 0x155   :  { %v1107_v22 = vadd.f32 %v3208_v20, %v1106_v56  ;;  %v1108_v61 = vpop.f32.mrb[33].mxu0  ;;  %v1235_v11 = vadd.f32 %v3208_v20, %v1234_v58  ;;  %v1236_v63 = vpop.f32.mrb[33].mxu1 }
 0x156   :  { %v1109_v1 = vpop.f32.mrb[34].mxu0  ;;  %v1237_v37 = vpop.f32.mrb[34].mxu1 }
 0x157   :  { %v1313_v41 = vmax.f32 %v1107_v22, 0.0  ;;  %v1110_v2 = vadd.f32 %v3208_v20, %v1109_v1  ;;  %v1111_v0 = vpop.f32.mrb[35].mxu0  ;;  %v1345_v4 = vmax.f32 %v1235_v11, 0.0  ;;  %1462 = vadd.xlane.f32.xlu1 %v1383_v62  ;;  %1524 = vadd.xlane.f32.xlu0 %v1414_v57  ;;  %v1239_v6 = vpop.f32.mrb[35].mxu1  ;;  %v1238_v10 = vadd.f32 %v3208_v20, %v1237_v37 }
 0x159   :  { %v1314_v8 = vmax.f32 %v1110_v2, 0.0  ;;  %v1384_v60 = vmul.f32 %v3215_v9, %v1313_v41  ;;  %v1416_v14 = vmul.f32 %v3215_v9, %v1345_v4  ;;  %v1346_v19 = vmax.f32 %v1238_v10, 0.0 }
 0x15b   :  { %1526 = vadd.xlane.f32.xlu1 %v1415_v12  ;;  %1464 = vadd.xlane.f32.xlu0 %v1384_v60  ;;  %v1385_v42 = vmul.f32 %v3215_v9, %v1314_v8  ;;  %v1417_v7 = vmul.f32 %v3215_v9, %v1346_v19 }
 0x15c   :  { %v1114_v54 = vpop.f32.mrb[36].mxu0  ;;  %v1242_v16 = vpop.f32.mrb[36].mxu1 }
 0x15d   :  { %v1115_v17 = vadd.f32 %v3208_v20, %v1114_v54  ;;  %v1116_v18 = vpop.f32.mrb[37].mxu0  ;;  %v1243_v36 = vadd.f32 %v3208_v20, %v1242_v16  ;;  %v1244_v3 = vpop.f32.mrb[37].mxu1 }
 0x15e   :  { %v1117_v29 = vpop.f32.mrb[38].mxu0  ;;  %v1245_v21 = vpop.f32.mrb[38].mxu1 }
 0x15f   :  { %v1315_v26 = vmax.f32 %v1115_v17, 0.0  ;;  %v1118_v27 = vadd.f32 %v3208_v20, %v1117_v29  ;;  %v1119_v30 = vpop.f32.mrb[39].mxu0  ;;  %v1347_v28 = vmax.f32 %v1243_v36, 0.0  ;;  %1466 = vadd.xlane.f32.xlu1 %v1385_v42  ;;  %1528 = vadd.xlane.f32.xlu0 %v1416_v14  ;;  %v1247_v31 = vpop.f32.mrb[39].mxu1  ;;  %v1246_v25 = vadd.f32 %v3208_v20, %v1245_v21 }
 0x161   :  { %v1316_v33 = vmax.f32 %v1118_v27, 0.0  ;;  %v1386_v34 = vmul.f32 %v3215_v9, %v1315_v26  ;;  %v1418_v15 = vmul.f32 %v3215_v9, %v1347_v28  ;;  %v1348_v35 = vmax.f32 %v1246_v25, 0.0 }
 0x163   :  { %1530 = vadd.xlane.f32.xlu1 %v1417_v7  ;;  %1468 = vadd.xlane.f32.xlu0 %v1386_v34  ;;  %v1387_v40 = vmul.f32 %v3215_v9, %v1316_v33  ;;  %v1419_v49 = vmul.f32 %v3215_v9, %v1348_v35 }
 0x164   :  { %v1122_v24 = vpop.f32.mrb[40].mxu0  ;;  %v1250_v5 = vpop.f32.mrb[40].mxu1 }
 0x165   :  { %v1123_v51 = vadd.f32 %v3208_v20, %v1122_v24  ;;  %v1124_v13 = vpop.f32.mrb[41].mxu0  ;;  %v1251_v39 = vadd.f32 %v3208_v20, %v1250_v5  ;;  %v1252_v38 = vpop.f32.mrb[41].mxu1 }
 0x166   :  { %v1125_v43 = vpop.f32.mrb[42].mxu0  ;;  %v1253_v44 = vpop.f32.mrb[42].mxu1 }
 0x167   :  { %v1317_v32 = vmax.f32 %v1123_v51, 0.0  ;;  %v1126_v45 = vadd.f32 %v3208_v20, %v1125_v43  ;;  %v1127_v46 = vpop.f32.mrb[43].mxu0  ;;  %v1349_v47 = vmax.f32 %v1251_v39, 0.0  ;;  %1470 = vadd.xlane.f32.xlu1 %v1387_v40  ;;  %1532 = vadd.xlane.f32.xlu0 %v1418_v15  ;;  %v1255_v50 = vpop.f32.mrb[43].mxu1  ;;  %v1254_v48 = vadd.f32 %v3208_v20, %v1253_v44 }
 0x169   :  { %v1318_v23 = vmax.f32 %v1126_v45, 0.0  ;;  %v1388_v52 = vmul.f32 %v3215_v9, %v1317_v32  ;;  %v1420_v53 = vmul.f32 %v3215_v9, %v1349_v47  ;;  %v1350_v55 = vmax.f32 %v1254_v48, 0.0 }
 0x16b   :  { %1534 = vadd.xlane.f32.xlu1 %v1419_v49  ;;  %1472 = vadd.xlane.f32.xlu0 %v1388_v52  ;;  %v1389_v59 = vmul.f32 %v3215_v9, %v1318_v23  ;;  %v1421_v2 = vmul.f32 %v3215_v9, %v1350_v55 }
 0x16c   :  { %v1130_v57 = vpop.f32.mrb[44].mxu0  ;;  %v1258_v61 = vpop.f32.mrb[44].mxu1 }
 0x16d   :  { %v1131_v56 = vadd.f32 %v3208_v20, %v1130_v57  ;;  %v1132_v58 = vpop.f32.mrb[45].mxu0  ;;  %v1259_v1 = vadd.f32 %v3208_v20, %v1258_v61  ;;  %v1260_v37 = vpop.f32.mrb[45].mxu1 }
 0x16e   :  { %v1133_v22 = vpop.f32.mrb[46].mxu0  ;;  %v1261_v41 = vpop.f32.mrb[46].mxu1 }
 0x16f   :  { %v1319_v11 = vmax.f32 %v1131_v56, 0.0  ;;  %v1134_v62 = vadd.f32 %v3208_v20, %v1133_v22  ;;  %v1135_v63 = vpop.f32.mrb[47].mxu0  ;;  %1474 = vadd.xlane.f32.xlu1 %v1389_v59  ;;  %1536 = vadd.xlane.f32.xlu0 %v1420_v53  ;;  %v1351_v4 = vmax.f32 %v1259_v1, 0.0  ;;  %v1262_v6 = vadd.f32 %v3208_v20, %v1261_v41  ;;  %v1263_v8 = vpop.f32.mrb[47].mxu1 }
 0x171   :  { %v1320_v0 = vmax.f32 %v1134_v62, 0.0  ;;  %v1390_v10 = vmul.f32 %v3215_v9, %v1319_v11  ;;  %v1422_v12 = vmul.f32 %v3215_v9, %v1351_v4  ;;  %v1352_v14 = vmax.f32 %v1262_v6, 0.0 }
 0x173   :  { %1538 = vadd.xlane.f32.xlu1 %v1421_v2  ;;  %1476 = vadd.xlane.f32.xlu0 %v1390_v10  ;;  %v1391_v19 = vmul.f32 %v3215_v9, %v1320_v0  ;;  %v1423_v21 = vmul.f32 %v3215_v9, %v1352_v14 }
 0x174   :  { %v1138_v60 = vpop.f32.mrb[48].mxu0  ;;  %v1266_v29 = vpop.f32.mrb[48].mxu1 }
 0x175   :  { %v1139_v54 = vadd.f32 %v3208_v20, %v1138_v60  ;;  %v1140_v16 = vpop.f32.mrb[49].mxu0  ;;  %v1267_v27 = vadd.f32 %v3208_v20, %v1266_v29  ;;  %v1268_v30 = vpop.f32.mrb[49].mxu1 }
 0x176   :  { %v1141_v17 = vpop.f32.mrb[50].mxu0  ;;  %v1269_v28 = vpop.f32.mrb[50].mxu1 }
 0x177   :  { %v1321_v18 = vmax.f32 %v1139_v54, 0.0  ;;  %v1142_v36 = vadd.f32 %v3208_v20, %v1141_v17  ;;  %v1143_v42 = vpop.f32.mrb[51].mxu0  ;;  %1478 = vadd.xlane.f32.xlu1 %v1391_v19  ;;  %1540 = vadd.xlane.f32.xlu0 %v1422_v12  ;;  %v1353_v31 = vmax.f32 %v1267_v27, 0.0  ;;  %v1270_v33 = vadd.f32 %v3208_v20, %v1269_v28  ;;  %v1271_v25 = vpop.f32.mrb[51].mxu1 }
 0x179   :  { %v1322_v3 = vmax.f32 %v1142_v36, 0.0  ;;  %v1392_v26 = vmul.f32 %v3215_v9, %v1321_v18  ;;  %v1354_v34 = vmax.f32 %v1270_v33, 0.0  ;;  %v1424_v15 = vmul.f32 %v3215_v9, %v1353_v31 }
 0x17b   :  { %1542 = vadd.xlane.f32.xlu1 %v1423_v21  ;;  %1480 = vadd.xlane.f32.xlu0 %v1392_v26  ;;  %v1393_v7 = vmul.f32 %v3215_v9, %v1322_v3  ;;  %v1425_v13 = vmul.f32 %v3215_v9, %v1354_v34 }
 0x17c   :  { %v1146_v24 = vpop.f32.mrb[52].mxu0 }
 0x17d   :  { %v1147_v5 = vadd.f32 %v3208_v20, %v1146_v24  ;;  %v1148_v35 = vpop.f32.mrb[53].mxu0 }
 0x17e   :  { %v1149_v51 = vpop.f32.mrb[54].mxu0  ;;  %v1274_v44 = vpop.f32.mrb[52].mxu1 }
 0x17f   :  { %1482 = vadd.xlane.f32.xlu1 %v1393_v7  ;;  %1544 = vadd.xlane.f32.xlu0 %v1424_v15  ;;  %v1323_v39 = vmax.f32 %v1147_v5, 0.0  ;;  %v1150_v40 = vadd.f32 %v3208_v20, %v1149_v51  ;;  %v1151_v38 = vpop.f32.mrb[55].mxu0  ;;  %v1275_v45 = vadd.f32 %v3208_v20, %v1274_v44  ;;  %v1276_v46 = vpop.f32.mrb[53].mxu1  ;;  %v3346_v15 = vld [vmem:[#allocation2] ss:$0 sm:$0xff] }
 0x180   :  { %v1277_v47 = vpop.f32.mrb[54].mxu1 }
 0x181   :  { %v1324_v43 = vmax.f32 %v1150_v40, 0.0  ;;  %v1394_v32 = vmul.f32 %v3215_v9, %v1323_v39  ;;  %v1355_v48 = vmax.f32 %v1275_v45, 0.0  ;;  %v1278_v23 = vadd.f32 %v3208_v20, %v1277_v47  ;;  %v1279_v49 = vpop.f32.mrb[55].mxu1 }
 0x183   :  { %1546 = vadd.xlane.f32.xlu1 %v1425_v13  ;;  %1484 = vadd.xlane.f32.xlu0 %v1394_v32  ;;  %v1395_v50 = vmul.f32 %v3215_v9, %v1324_v43  ;;  %v1356_v52 = vmax.f32 %v1278_v23, 0.0  ;;  %v1426_v53 = vmul.f32 %v3215_v9, %v1355_v48 }
 0x184   :  { %v1154_v55 = vpop.f32.mrb[56].mxu0 }
 0x185   :  { %v1155_v57 = vadd.f32 %v3208_v20, %v1154_v55  ;;  %v1156_v56 = vpop.f32.mrb[57].mxu0  ;;  %v1427_v58 = vmul.f32 %v3215_v9, %v1356_v52 }
 0x186   :  { %v1157_v59 = vpop.f32.mrb[58].mxu0 }
 0x187   :  { %1486 = vadd.xlane.f32.xlu1 %v1395_v50  ;;  %1548 = vadd.xlane.f32.xlu0 %v1426_v53  ;;  %v1325_v22 = vmax.f32 %v1155_v57, 0.0  ;;  %v1158_v61 = vadd.f32 %v3208_v20, %v1157_v59  ;;  %v1159_v11 = vpop.f32.mrb[59].mxu0 }
 0x189   :  { %v1326_v62 = vmax.f32 %v1158_v61, 0.0  ;;  %v1282_v63 = vpop.f32.mrb[56].mxu1  ;;  %v1396_v1 = vmul.f32 %v3215_v9, %v1325_v22 }
 0x18a   :  { %v1283_v37 = vadd.f32 %v3208_v20, %v1282_v63  ;;  %v1284_v41 = vpop.f32.mrb[57].mxu1 }
 0x18b   :  { %1550 = vadd.xlane.f32.xlu1 %v1427_v58  ;;  %v1285_v2 = vpop.f32.mrb[58].mxu1  ;;  %1488 = vadd.xlane.f32.xlu0 %v1396_v1  ;;  %v1397_v0 = vmul.f32 %v3215_v9, %v1326_v62 }
 0x18c   :  { %v1357_v4 = vmax.f32 %v1283_v37, 0.0  ;;  %v1286_v6 = vadd.f32 %v3208_v20, %v1285_v2  ;;  %v1287_v8 = vpop.f32.mrb[59].mxu1 }
 0x18e   :  { %v1358_v10 = vmax.f32 %v1286_v6, 0.0  ;;  %v1428_v12 = vmul.f32 %v3215_v9, %v1357_v4 }
 0x18f   :  { %1490 = vadd.xlane.f32.xlu1 %v1397_v0  ;;  %v1162_v60 = vpop.f32.mrb[60].mxu0 }
 0x190   :  { %v1163_v14 = vadd.f32 %v3208_v20, %v1162_v60  ;;  %v1164_v54 = vpop.f32.mrb[61].mxu0  ;;  %1552 = vadd.xlane.f32.xlu0 %v1428_v12  ;;  %v1429_v16 = vmul.f32 %v3215_v9, %v1358_v10 }
 0x191   :  { %v1165_v19 = vpop.f32.mrb[62].mxu0 }
 0x192   :  { %v1327_v17 = vmax.f32 %v1163_v14, 0.0  ;;  %v1166_v18 = vadd.f32 %v3208_v20, %v1165_v19  ;;  %v1167_v36 = vpop.f32.mrb[63].mxu0 }
 0x193   :  { %1554 = vadd.xlane.f32.xlu1 %v1429_v16 }
 0x194   :  { %v1328_v42 = vmax.f32 %v1166_v18, 0.0  ;;  %v1290_v3 = vpop.f32.mrb[60].mxu1  ;;  %v1398_v29 = vmul.f32 %v3215_v9, %v1327_v17 }
 0x195   :  { %v1291_v21 = vadd.f32 %v3208_v20, %v1290_v3  ;;  %v1292_v26 = vpop.f32.mrb[61].mxu1 }
 0x196   :  { %v1293_v27 = vpop.f32.mrb[62].mxu1  ;;  %1492 = vadd.xlane.f32.xlu0 %v1398_v29  ;;  %v1399_v30 = vmul.f32 %v3215_v9, %v1328_v42 }
 0x197   :  { %v1359_v28 = vmax.f32 %v1291_v21, 0.0  ;;  %v1294_v31 = vadd.f32 %v3208_v20, %v1293_v27  ;;  %v1295_v33 = vpop.f32.mrb[63].mxu1 }
 0x198   :  { %1494 = vadd.xlane.f32.xlu1 %v1399_v30 }
 0x199   :  { %v1360_v25 = vmax.f32 %v1294_v31, 0.0  ;;  %v1430_v7 = vmul.f32 %v3215_v9, %v1359_v28 }
 0x19b   :  { %1556 = vadd.xlane.f32.xlu0 %v1430_v7  ;;  %v1431_v34 = vmul.f32 %v3215_v9, %v1360_v25 }
 0x19d   :  { %1558 = vadd.xlane.f32.xlu1 %v1431_v34 }
 0x1a8   :  { %v1433_v24 = vpop.xlane.xlu0 %1432 }
 0x1a9   :  { %v1567_v5 = vadd.f32 %v3346_v15, %v1433_v24 }
 0x1aa   :  { %v1499_v35 = vpop.xlane.xlu1 %1498 }
 0x1ab   :  { %v2103_v51 = vmul.f32 -1.442695, %v1567_v5  ;;  %v1600_v13 = vadd.f32 %v3346_v15, %v1499_v35 }
 0x1ac   :  { %v1497_v39 = vpop.xlane.xlu0 %1496 }
 0x1ad   :  { %2216 = vpow2.f32 %v2103_v51  ;;  %v2136_v20 = vmul.f32 -1.442695, %v1600_v13  ;;  %v1599_v40 = vadd.f32 %v3346_v15, %v1497_v39 }
 0x1af   :  { %2218 = vpow2.f32 %v2136_v20  ;;  %v2135_v38 = vmul.f32 -1.442695, %v1599_v40 }
 0x1b0   :  { %v1437_v43 = vpop.xlane.xlu1 %1436  ;;  %v1435_v44 = vpop.xlane.xlu0 %1434 }
 0x1b1   :  { %2220 = vpow2.f32 %v2135_v38  ;;  %v1569_v9 = vadd.f32 %v3346_v15, %v1437_v43  ;;  %v1568_v32 = vadd.f32 %v3346_v15, %v1435_v44 }
 0x1b3   :  { %v2105_v45 = vmul.f32 -1.442695, %v1569_v9  ;;  %v2104_v46 = vmul.f32 -1.442695, %v1568_v32 }
 0x1b4   :  { %v1439_v47 = vpop.xlane.xlu1 %1438  ;;  %v1501_v50 = vpop.xlane.xlu0 %1500 }
 0x1b5   :  { %2222 = vpow2.f32 %v2105_v45  ;;  %v1570_v48 = vadd.f32 %v3346_v15, %v1439_v47  ;;  %v1601_v23 = vadd.f32 %v3346_v15, %v1501_v50 }
 0x1b6   :  { %2224 = vpow2.f32 %v2104_v46 }
 0x1b7   :  { %v2217_v49 = vpop.eup %2216  ;;  %v2106_v52 = vmul.f32 -1.442695, %v1570_v48  ;;  %v2137_v53 = vmul.f32 -1.442695, %v1601_v23 }
 0x1b8   :  { %v1823_v55 = vadd.f32 1.0, %v2217_v49  ;;  %v1503_v57 = vpop.xlane.xlu1 %1502  ;;  %v1441_v56 = vpop.xlane.xlu0 %1440 }
 0x1b9   :  { %v2219_v58 = vpop.eup %2218  ;;  %2226 = vpow2.f32 %v2106_v52  ;;  %v1602_v59 = vadd.f32 %v3346_v15, %v1503_v57  ;;  %v1571_v22 = vadd.f32 %v3346_v15, %v1441_v56 }
 0x1ba   :  { %2228 = vrcp.f32 %v1823_v55  ;;  %v1856_v61 = vadd.f32 1.0, %v2219_v58 }
 0x1bb   :  { %v2221_v11 = vpop.eup %2220  ;;  %2230 = vpow2.f32 %v2137_v53  ;;  %v2138_v62 = vmul.f32 -1.442695, %v1602_v59  ;;  %v2107_v63 = vmul.f32 -1.442695, %v1571_v22 }
 0x1bc   :  { %2232 = vrcp.f32 %v1856_v61  ;;  %v1855_v1 = vadd.f32 1.0, %v2221_v11  ;;  %v1443_v37 = vpop.xlane.xlu1 %1442  ;;  %v1505_v41 = vpop.xlane.xlu0 %1504 }
 0x1bd   :  { %2234 = vpow2.f32 %v2138_v62  ;;  %v1572_v2 = vadd.f32 %v3346_v15, %v1443_v37  ;;  %v1603_v0 = vadd.f32 %v3346_v15, %v1505_v41 }
 0x1be   :  { %2236 = vrcp.f32 %v1855_v1 }
 0x1bf   :  { %v2223_v4 = vpop.eup %2222  ;;  %2238 = vpow2.f32 %v2107_v63  ;;  %v2108_v6 = vmul.f32 -1.442695, %v1572_v2  ;;  %v2139_v12 = vmul.f32 -1.442695, %v1603_v0 }
 0x1c0   :  { %v2225_v8 = vpop.eup %2224  ;;  %v1825_v10 = vadd.f32 1.0, %v2223_v4  ;;  %v1507_v60 = vpop.xlane.xlu1 %1506 }
 0x1c1   :  { %v1445_v14 = vpop.xlane.xlu0 %1444  ;;  %v1824_v54 = vadd.f32 1.0, %v2225_v8  ;;  %2240 = vpow2.f32 %v2108_v6  ;;  %v1604_v16 = vadd.f32 %v3346_v15, %v1507_v60 }
 0x1c2   :  { %v1573_v19 = vadd.f32 %v3346_v15, %v1445_v14  ;;  %2242 = vrcp.f32 %v1825_v10 }
 0x1c3   :  { %v2227_v17 = vpop.eup %2226  ;;  %2244 = vrcp.f32 %v1824_v54  ;;  %v2140_v18 = vmul.f32 -1.442695, %v1604_v16 }
 0x1c4   :  { %v2109_v36 = vmul.f32 -1.442695, %v1573_v19  ;;  %v2229_v42 = vpop.eup %2228  ;;  %v1826_v3 = vadd.f32 1.0, %v2227_v17  ;;  %2246 = vpow2.f32 %v2139_v12  ;;  %v1447_v29 = vpop.xlane.xlu1 %1446 }
 0x1c5   :  { %v1509_v21 = vpop.xlane.xlu0 %1508  ;;  %v2231_v26 = vpop.eup %2230  ;;  %2016 = vst.msk [vmem:[%s3672_s7] sm:$0xff] %vm2015_vm0, %v2229_v42  ;;  %2248 = vpow2.f32 %v2140_v18  ;;  %v1574_v27 = vadd.f32 %v3346_v15, %v1447_v29 }
 0x1c6   :  { %v1605_v30 = vadd.f32 %v3346_v15, %v1509_v21  ;;  %v2233_v28 = vpop.eup %2232  ;;  %2250 = vrcp.f32 %v1826_v3  ;;  %v1857_v31 = vadd.f32 1.0, %v2231_v26 }
 0x1c7   :  { %v2235_v33 = vpop.eup %2234  ;;  %2049 = vst.msk [vmem:[%s3672_s7 + $0x108] sm:$0xff] %vm2015_vm0, %v2233_v28  ;;  %2252 = vpow2.f32 %v2109_v36  ;;  %v2110_v25 = vmul.f32 -1.442695, %v1574_v27 }
 0x1c8   :  { %v2141_v7 = vmul.f32 -1.442695, %v1605_v30  ;;  %v2237_v34 = vpop.eup %2236  ;;  %2254 = vrcp.f32 %v1857_v31  ;;  %v1858_v24 = vadd.f32 1.0, %v2235_v33  ;;  %v1511_v5 = vpop.xlane.xlu1 %1510 }
 0x1c9   :  { %v1449_v35 = vpop.xlane.xlu0 %1448  ;;  %v2239_v51 = vpop.eup %2238  ;;  %2048 = vst.msk [vmem:[%s3672_s7 + $0x100] sm:$0xff] %vm2015_vm0, %v2237_v34  ;;  %2256 = vpow2.f32 %v2110_v25  ;;  %v1606_v13 = vadd.f32 %v3346_v15, %v1511_v5 }
 0x1ca   :  { %v1575_v39 = vadd.f32 %v3346_v15, %v1449_v35  ;;  %2258 = vrcp.f32 %v1858_v24  ;;  %v1827_v20 = vadd.f32 1.0, %v2239_v51 }
 0x1cb   :  { %v2241_v40 = vpop.eup %2240  ;;  %2260 = vpow2.f32 %v2141_v7  ;;  %v2142_v38 = vmul.f32 -1.442695, %v1606_v13 }
 0x1cc   :  { %v2111_v43 = vmul.f32 -1.442695, %v1575_v39  ;;  %v2243_v44 = vpop.eup %2242  ;;  %2262 = vrcp.f32 %v1827_v20  ;;  %v1828_v9 = vadd.f32 1.0, %v2241_v40  ;;  %v1451_v32 = vpop.xlane.xlu1 %1450 }
 0x1cd   :  { %v1513_v45 = vpop.xlane.xlu0 %1512  ;;  %v2245_v46 = vpop.eup %2244  ;;  %2018 = vst.msk [vmem:[%s3672_s7 + $0x10] sm:$0xff] %vm2015_vm0, %v2243_v44  ;;  %2264 = vpow2.f32 %v2142_v38  ;;  %v1576_v47 = vadd.f32 %v3346_v15, %v1451_v32 }
 0x1ce   :  { %v1607_v50 = vadd.f32 %v3346_v15, %v1513_v45  ;;  %v2247_v48 = vpop.eup %2246  ;;  %2017 = vst.msk [vmem:[%s3672_s7 + $0x8] sm:$0xff] %vm2015_vm0, %v2245_v46  ;;  %2266 = vrcp.f32 %v1828_v9 }
 0x1cf   :  { %v2249_v23 = vpop.eup %2248  ;;  %v1859_v49 = vadd.f32 1.0, %v2247_v48  ;;  %2268 = vpow2.f32 %v2111_v43  ;;  %v2112_v52 = vmul.f32 -1.442695, %v1576_v47 }
 0x1d0   :  { %v2251_v53 = vpop.eup %2250  ;;  %v1860_v55 = vadd.f32 1.0, %v2249_v23  ;;  %v1515_v57 = vpop.xlane.xlu1 %1514  ;;  %v2143_v59 = vmul.f32 -1.442695, %v1607_v50 }
 0x1d1   :  { %v1453_v56 = vpop.xlane.xlu0 %1452  ;;  %v2253_v58 = vpop.eup %2252  ;;  %2019 = vst.msk [vmem:[%s3672_s7 + $0x18] sm:$0xff] %vm2015_vm0, %v2251_v53  ;;  %2270 = vrcp.f32 %v1859_v49  ;;  %v1608_v22 = vadd.f32 %v3346_v15, %v1515_v57 }
 0x1d2   :  { %v1577_v61 = vadd.f32 %v3346_v15, %v1453_v56  ;;  %v2255_v11 = vpop.eup %2254  ;;  %2272 = vrcp.f32 %v1860_v55  ;;  %v1829_v62 = vadd.f32 1.0, %v2253_v58 }
 0x1d3   :  { %v2257_v63 = vpop.eup %2256  ;;  %2050 = vst.msk [vmem:[%s3672_s7 + $0x110] sm:$0xff] %vm2015_vm0, %v2255_v11  ;;  %2274 = vpow2.f32 %v2112_v52  ;;  %v2144_v1 = vmul.f32 -1.442695, %v1608_v22 }
 0x1d4   :  { %v2259_v37 = vpop.eup %2258  ;;  %2276 = vrcp.f32 %v1829_v62  ;;  %v1830_v41 = vadd.f32 1.0, %v2257_v63  ;;  %v1455_v2 = vpop.xlane.xlu1 %1454  ;;  %v2113_v6 = vmul.f32 -1.442695, %v1577_v61 }
 0x1d5   :  { %v1517_v0 = vpop.xlane.xlu0 %1516  ;;  %v2261_v4 = vpop.eup %2260  ;;  %2051 = vst.msk [vmem:[%s3672_s7 + $0x118] sm:$0xff] %vm2015_vm0, %v2259_v37  ;;  %2278 = vpow2.f32 %v2143_v59  ;;  %v1578_v8 = vadd.f32 %v3346_v15, %v1455_v2 }
 0x1d6   :  { %v1609_v10 = vadd.f32 %v3346_v15, %v1517_v0  ;;  %v2263_v12 = vpop.eup %2262  ;;  %2280 = vrcp.f32 %v1830_v41  ;;  %v1861_v60 = vadd.f32 1.0, %v2261_v4 }
 0x1d7   :  { %v2265_v14 = vpop.eup %2264  ;;  %2020 = vst.msk [vmem:[%s3672_s7 + $0x20] sm:$0xff] %vm2015_vm0, %v2263_v12  ;;  %2282 = vpow2.f32 %v2144_v1  ;;  %v2114_v54 = vmul.f32 -1.442695, %v1578_v8 }
 0x1d8   :  { %v2267_v16 = vpop.eup %2266  ;;  %2284 = vrcp.f32 %v1861_v60  ;;  %v1862_v19 = vadd.f32 1.0, %v2265_v14  ;;  %v1519_v17 = vpop.xlane.xlu1 %1518  ;;  %v2145_v42 = vmul.f32 -1.442695, %v1609_v10 }
 0x1d9   :  { %v1457_v18 = vpop.xlane.xlu0 %1456  ;;  %v2269_v36 = vpop.eup %2268  ;;  %2021 = vst.msk [vmem:[%s3672_s7 + $0x28] sm:$0xff] %vm2015_vm0, %v2267_v16  ;;  %2286 = vpow2.f32 %v2113_v6  ;;  %v1610_v3 = vadd.f32 %v3346_v15, %v1519_v17 }
 0x1da   :  { %v1579_v29 = vadd.f32 %v3346_v15, %v1457_v18  ;;  %2288 = vrcp.f32 %v1862_v19  ;;  %v1831_v21 = vadd.f32 1.0, %v2269_v36 }
 0x1db   :  { %v2271_v26 = vpop.eup %2270  ;;  %2290 = vpow2.f32 %v2114_v54  ;;  %v2146_v27 = vmul.f32 -1.442695, %v1610_v3 }
 0x1dc   :  { %v2115_v30 = vmul.f32 -1.442695, %v1579_v29  ;;  %v2273_v28 = vpop.eup %2272  ;;  %2052 = vst.msk [vmem:[%s3672_s7 + $0x120] sm:$0xff] %vm2015_vm0, %v2271_v26  ;;  %2292 = vrcp.f32 %v1831_v21  ;;  %v1459_v31 = vpop.xlane.xlu1 %1458 }
 0x1dd   :  { %v1521_v33 = vpop.xlane.xlu0 %1520  ;;  %v2275_v25 = vpop.eup %2274  ;;  %2053 = vst.msk [vmem:[%s3672_s7 + $0x128] sm:$0xff] %vm2015_vm0, %v2273_v28  ;;  %2294 = vpow2.f32 %v2145_v42  ;;  %v1580_v7 = vadd.f32 %v3346_v15, %v1459_v31 }
 0x1de   :  { %v1611_v34 = vadd.f32 %v3346_v15, %v1521_v33  ;;  %v2277_v24 = vpop.eup %2276  ;;  %v1832_v5 = vadd.f32 1.0, %v2275_v25  ;;  %2296 = vpow2.f32 %v2146_v27 }
 0x1df   :  { %v2279_v35 = vpop.eup %2278  ;;  %2022 = vst.msk [vmem:[%s3672_s7 + $0x30] sm:$0xff] %vm2015_vm0, %v2277_v24  ;;  %2298 = vpow2.f32 %v2115_v30  ;;  %v2116_v51 = vmul.f32 -1.442695, %v1580_v7 }
 0x1e0   :  { %v2147_v13 = vmul.f32 -1.442695, %v1611_v34  ;;  %v2281_v39 = vpop.eup %2280  ;;  %2300 = vrcp.f32 %v1832_v5  ;;  %v1863_v20 = vadd.f32 1.0, %v2279_v35  ;;  %v1523_v40 = vpop.xlane.xlu1 %1522 }
 0x1e1   :  { %v1461_v38 = vpop.xlane.xlu0 %1460  ;;  %v2283_v43 = vpop.eup %2282  ;;  %2023 = vst.msk [vmem:[%s3672_s7 + $0x38] sm:$0xff] %vm2015_vm0, %v2281_v39  ;;  %2302 = vpow2.f32 %v2116_v51  ;;  %v1612_v44 = vadd.f32 %v3346_v15, %v1523_v40 }
 0x1e2   :  { %v1581_v9 = vadd.f32 %v3346_v15, %v1461_v38  ;;  %v2285_v32 = vpop.eup %2284  ;;  %2304 = vrcp.f32 %v1863_v20  ;;  %v1864_v45 = vadd.f32 1.0, %v2283_v43 }
 0x1e3   :  { %v2287_v46 = vpop.eup %2286  ;;  %2054 = vst.msk [vmem:[%s3672_s7 + $0x130] sm:$0xff] %vm2015_vm0, %v2285_v32  ;;  %2306 = vpow2.f32 %v2147_v13  ;;  %v2148_v47 = vmul.f32 -1.442695, %v1612_v44 }
 0x1e4   :  { %v2117_v50 = vmul.f32 -1.442695, %v1581_v9  ;;  %v2289_v48 = vpop.eup %2288  ;;  %2308 = vrcp.f32 %v1864_v45  ;;  %v1833_v23 = vadd.f32 1.0, %v2287_v46  ;;  %v1463_v49 = vpop.xlane.xlu1 %1462 }
 0x1e5   :  { %v1525_v52 = vpop.xlane.xlu0 %1524  ;;  %v2291_v53 = vpop.eup %2290  ;;  %2055 = vst.msk [vmem:[%s3672_s7 + $0x138] sm:$0xff] %vm2015_vm0, %v2289_v48  ;;  %2310 = vpow2.f32 %v2148_v47  ;;  %v1582_v55 = vadd.f32 %v3346_v15, %v1463_v49 }
 0x1e6   :  { %v1613_v57 = vadd.f32 %v3346_v15, %v1525_v52  ;;  %v2293_v56 = vpop.eup %2292  ;;  %2312 = vrcp.f32 %v1833_v23  ;;  %v1834_v58 = vadd.f32 1.0, %v2291_v53 }
 0x1e7   :  { %v2295_v59 = vpop.eup %2294  ;;  %2024 = vst.msk [vmem:[%s3672_s7 + $0x40] sm:$0xff] %vm2015_vm0, %v2293_v56  ;;  %2314 = vpow2.f32 %v2117_v50  ;;  %v2118_v22 = vmul.f32 -1.442695, %v1582_v55 }
 0x1e8   :  { %v2297_v61 = vpop.eup %2296  ;;  %2316 = vrcp.f32 %v1834_v58  ;;  %v1865_v11 = vadd.f32 1.0, %v2295_v59  ;;  %v2149_v62 = vmul.f32 -1.442695, %v1613_v57  ;;  %v1527_v63 = vpop.xlane.xlu1 %1526 }
 0x1e9   :  { %v1465_v1 = vpop.xlane.xlu0 %1464  ;;  %v2299_v37 = vpop.eup %2298  ;;  %v1866_v41 = vadd.f32 1.0, %v2297_v61  ;;  %2318 = vpow2.f32 %v2118_v22  ;;  %v1614_v2 = vadd.f32 %v3346_v15, %v1527_v63 }
 0x1ea   :  { %v1583_v0 = vadd.f32 %v3346_v15, %v1465_v1  ;;  %v2301_v4 = vpop.eup %2300  ;;  %2320 = vrcp.f32 %v1865_v11  ;;  %v1835_v6 = vadd.f32 1.0, %v2299_v37 }
 0x1eb   :  { %v2303_v8 = vpop.eup %2302  ;;  %2025 = vst.msk [vmem:[%s3672_s7 + $0x48] sm:$0xff] %vm2015_vm0, %v2301_v4  ;;  %2322 = vrcp.f32 %v1866_v41  ;;  %v2150_v10 = vmul.f32 -1.442695, %v1614_v2 }
 0x1ec   :  { %v2305_v12 = vpop.eup %2304  ;;  %2324 = vrcp.f32 %v1835_v6  ;;  %v1836_v60 = vadd.f32 1.0, %v2303_v8  ;;  %v1467_v14 = vpop.xlane.xlu1 %1466  ;;  %v2119_v19 = vmul.f32 -1.442695, %v1583_v0 }
 0x1ed   :  { %v1529_v54 = vpop.xlane.xlu0 %1528  ;;  %v2307_v16 = vpop.eup %2306  ;;  %2056 = vst.msk [vmem:[%s3672_s7 + $0x140] sm:$0xff] %vm2015_vm0, %v2305_v12  ;;  %2326 = vpow2.f32 %v2149_v62  ;;  %v1584_v17 = vadd.f32 %v3346_v15, %v1467_v14 }
 0x1ee   :  { %v1615_v18 = vadd.f32 %v3346_v15, %v1529_v54  ;;  %v2309_v36 = vpop.eup %2308  ;;  %2328 = vrcp.f32 %v1836_v60  ;;  %v1867_v42 = vadd.f32 1.0, %v2307_v16 }
 0x1ef   :  { %v2311_v3 = vpop.eup %2310  ;;  %2057 = vst.msk [vmem:[%s3672_s7 + $0x148] sm:$0xff] %vm2015_vm0, %v2309_v36  ;;  %2330 = vpow2.f32 %v2150_v10  ;;  %v2120_v29 = vmul.f32 -1.442695, %v1584_v17 }
 0x1f0   :  { %v2313_v21 = vpop.eup %2312  ;;  %2332 = vrcp.f32 %v1867_v42  ;;  %v1868_v26 = vadd.f32 1.0, %v2311_v3  ;;  %v1531_v27 = vpop.xlane.xlu1 %1530  ;;  %v2151_v31 = vmul.f32 -1.442695, %v1615_v18 }
 0x1f1   :  { %v1469_v30 = vpop.xlane.xlu0 %1468  ;;  %v2315_v28 = vpop.eup %2314  ;;  %2026 = vst.msk [vmem:[%s3672_s7 + $0x50] sm:$0xff] %vm2015_vm0, %v2313_v21  ;;  %2334 = vpow2.f32 %v2119_v19  ;;  %v1616_v33 = vadd.f32 %v3346_v15, %v1531_v27 }
 0x1f2   :  { %v1585_v25 = vadd.f32 %v3346_v15, %v1469_v30  ;;  %v2317_v7 = vpop.eup %2316  ;;  %2336 = vrcp.f32 %v1868_v26  ;;  %v1837_v34 = vadd.f32 1.0, %v2315_v28 }
 0x1f3   :  { %v2319_v24 = vpop.eup %2318  ;;  %2027 = vst.msk [vmem:[%s3672_s7 + $0x58] sm:$0xff] %vm2015_vm0, %v2317_v7  ;;  %2338 = vpow2.f32 %v2120_v29  ;;  %v2152_v5 = vmul.f32 -1.442695, %v1616_v33 }
 0x1f4   :  { %v2321_v35 = vpop.eup %2320  ;;  %2340 = vrcp.f32 %v1837_v34  ;;  %v1838_v51 = vadd.f32 1.0, %v2319_v24  ;;  %v2121_v13 = vmul.f32 -1.442695, %v1585_v25  ;;  %v1471_v39 = vpop.xlane.xlu1 %1470 }
 0x1f5   :  { %v1533_v20 = vpop.xlane.xlu0 %1532  ;;  %v2323_v40 = vpop.eup %2322  ;;  %2058 = vst.msk [vmem:[%s3672_s7 + $0x150] sm:$0xff] %vm2015_vm0, %v2321_v35  ;;  %2342 = vpow2.f32 %v2151_v31  ;;  %v1586_v38 = vadd.f32 %v3346_v15, %v1471_v39 }
 0x1f6   :  { %v1617_v43 = vadd.f32 %v3346_v15, %v1533_v20  ;;  %v2325_v44 = vpop.eup %2324  ;;  %2059 = vst.msk [vmem:[%s3672_s7 + $0x158] sm:$0xff] %vm2015_vm0, %v2323_v40  ;;  %2344 = vrcp.f32 %v1838_v51 }
 0x1f7   :  { %v2327_v9 = vpop.eup %2326  ;;  %2028 = vst.msk [vmem:[%s3672_s7 + $0x60] sm:$0xff] %vm2015_vm0, %v2325_v44  ;;  %2346 = vpow2.f32 %v2152_v5  ;;  %v2122_v32 = vmul.f32 -1.442695, %v1586_v38 }
 0x1f8   :  { %v2153_v45 = vmul.f32 -1.442695, %v1617_v43  ;;  %v2329_v46 = vpop.eup %2328  ;;  %v1869_v47 = vadd.f32 1.0, %v2327_v9  ;;  %2348 = vpow2.f32 %v2121_v13  ;;  %v1535_v50 = vpop.xlane.xlu1 %1534 }
 0x1f9   :  { %v1473_v48 = vpop.xlane.xlu0 %1472  ;;  %v2331_v23 = vpop.eup %2330  ;;  %2029 = vst.msk [vmem:[%s3672_s7 + $0x68] sm:$0xff] %vm2015_vm0, %v2329_v46  ;;  %2350 = vpow2.f32 %v2122_v32  ;;  %v1618_v49 = vadd.f32 %v3346_v15, %v1535_v50 }
 0x1fa   :  { %v1587_v52 = vadd.f32 %v3346_v15, %v1473_v48  ;;  %v2333_v53 = vpop.eup %2332  ;;  %2352 = vrcp.f32 %v1869_v47  ;;  %v1870_v55 = vadd.f32 1.0, %v2331_v23 }
 0x1fb   :  { %v2335_v57 = vpop.eup %2334  ;;  %2060 = vst.msk [vmem:[%s3672_s7 + $0x160] sm:$0xff] %vm2015_vm0, %v2333_v53  ;;  %2354 = vpow2.f32 %v2153_v45  ;;  %v2154_v56 = vmul.f32 -1.442695, %v1618_v49 }
 0x1fc   :  { %v2123_v58 = vmul.f32 -1.442695, %v1587_v52  ;;  %v2337_v59 = vpop.eup %2336  ;;  %2356 = vrcp.f32 %v1870_v55  ;;  %v1839_v22 = vadd.f32 1.0, %v2335_v57  ;;  %v1475_v61 = vpop.xlane.xlu1 %1474 }
 0x1fd   :  { %v1537_v11 = vpop.xlane.xlu0 %1536  ;;  %v2339_v62 = vpop.eup %2338  ;;  %2061 = vst.msk [vmem:[%s3672_s7 + $0x168] sm:$0xff] %vm2015_vm0, %v2337_v59  ;;  %2358 = vpow2.f32 %v2154_v56  ;;  %v1588_v63 = vadd.f32 %v3346_v15, %v1475_v61 }
 0x1fe   :  { %v1619_v1 = vadd.f32 %v3346_v15, %v1537_v11  ;;  %v2341_v37 = vpop.eup %2340  ;;  %2360 = vrcp.f32 %v1839_v22  ;;  %v1840_v41 = vadd.f32 1.0, %v2339_v62 }
 0x1ff   :  { %v2343_v2 = vpop.eup %2342  ;;  %2030 = vst.msk [vmem:[%s3672_s7 + $0x70] sm:$0xff] %vm2015_vm0, %v2341_v37  ;;  %2362 = vpow2.f32 %v2123_v58  ;;  %v2124_v0 = vmul.f32 -1.442695, %v1588_v63 }
 0x200   :  { %v2155_v4 = vmul.f32 -1.442695, %v1619_v1  ;;  %v2345_v6 = vpop.eup %2344  ;;  %2364 = vrcp.f32 %v1840_v41  ;;  %v1871_v8 = vadd.f32 1.0, %v2343_v2  ;;  %v1539_v10 = vpop.xlane.xlu1 %1538 }
 0x201   :  { %v1477_v12 = vpop.xlane.xlu0 %1476  ;;  %v2347_v60 = vpop.eup %2346  ;;  %2031 = vst.msk [vmem:[%s3672_s7 + $0x78] sm:$0xff] %vm2015_vm0, %v2345_v6  ;;  %2366 = vpow2.f32 %v2124_v0  ;;  %v1620_v14 = vadd.f32 %v3346_v15, %v1539_v10 }
 0x202   :  { %v1589_v54 = vadd.f32 %v3346_v15, %v1477_v12  ;;  %v2349_v16 = vpop.eup %2348  ;;  %2368 = vrcp.f32 %v1871_v8  ;;  %v1872_v19 = vadd.f32 1.0, %v2347_v60 }
 0x203   :  { %v2351_v17 = vpop.eup %2350  ;;  %v1841_v18 = vadd.f32 1.0, %v2349_v16  ;;  %2370 = vpow2.f32 %v2155_v4  ;;  %v2156_v36 = vmul.f32 -1.442695, %v1620_v14 }
 0x204   :  { %v2353_v42 = vpop.eup %2352  ;;  %2372 = vrcp.f32 %v1872_v19  ;;  %v1842_v3 = vadd.f32 1.0, %v2351_v17  ;;  %v1479_v29 = vpop.xlane.xlu1 %1478  ;;  %v2125_v27 = vmul.f32 -1.442695, %v1589_v54 }
 0x205   :  { %v1541_v21 = vpop.xlane.xlu0 %1540  ;;  %v2355_v26 = vpop.eup %2354  ;;  %2062 = vst.msk [vmem:[%s3672_s7 + $0x170] sm:$0xff] %vm2015_vm0, %v2353_v42  ;;  %2374 = vrcp.f32 %v1841_v18  ;;  %v1590_v30 = vadd.f32 %v3346_v15, %v1479_v29 }
 0x206   :  { %v1621_v28 = vadd.f32 %v3346_v15, %v1541_v21  ;;  %v2357_v31 = vpop.eup %2356  ;;  %2376 = vrcp.f32 %v1842_v3  ;;  %v1873_v33 = vadd.f32 1.0, %v2355_v26 }
 0x207   :  { %v2359_v25 = vpop.eup %2358  ;;  %2063 = vst.msk [vmem:[%s3672_s7 + $0x178] sm:$0xff] %vm2015_vm0, %v2357_v31  ;;  %2378 = vpow2.f32 %v2156_v36  ;;  %v2126_v7 = vmul.f32 -1.442695, %v1590_v30 }
 0x208   :  { %v2361_v34 = vpop.eup %2360  ;;  %2380 = vrcp.f32 %v1873_v33  ;;  %v1874_v24 = vadd.f32 1.0, %v2359_v25  ;;  %v1543_v5 = vpop.xlane.xlu1 %1542  ;;  %v2157_v13 = vmul.f32 -1.442695, %v1621_v28 }
 0x209   :  { %v1481_v35 = vpop.xlane.xlu0 %1480  ;;  %v2363_v51 = vpop.eup %2362  ;;  %2032 = vst.msk [vmem:[%s3672_s7 + $0x80] sm:$0xff] %vm2015_vm0, %v2361_v34  ;;  %2382 = vpow2.f32 %v2125_v27  ;;  %v1622_v39 = vadd.f32 %v3346_v15, %v1543_v5 }
 0x20a   :  { %v1591_v20 = vadd.f32 %v3346_v15, %v1481_v35  ;;  %v2365_v40 = vpop.eup %2364  ;;  %2384 = vrcp.f32 %v1874_v24  ;;  %v1843_v38 = vadd.f32 1.0, %v2363_v51 }
 0x20b   :  { %v2367_v43 = vpop.eup %2366  ;;  %2033 = vst.msk [vmem:[%s3672_s7 + $0x88] sm:$0xff] %vm2015_vm0, %v2365_v40  ;;  %2386 = vpow2.f32 %v2126_v7  ;;  %v2158_v44 = vmul.f32 -1.442695, %v1622_v39 }
 0x20c   :  { %v2369_v9 = vpop.eup %2368  ;;  %2388 = vrcp.f32 %v1843_v38  ;;  %v1844_v32 = vadd.f32 1.0, %v2367_v43  ;;  %v1483_v45 = vpop.xlane.xlu1 %1482  ;;  %v2127_v47 = vmul.f32 -1.442695, %v1591_v20 }
 0x20d   :  { %v2371_v46 = vpop.eup %2370  ;;  %2064 = vst.msk [vmem:[%s3672_s7 + $0x180] sm:$0xff] %vm2015_vm0, %v2369_v9  ;;  %2390 = vpow2.f32 %v2157_v13  ;;  %v1592_v50 = vadd.f32 %v3346_v15, %v1483_v45  ;;  %v1545_v48 = vpop.xlane.xlu0 %1544 }
 0x20e   :  { %v2373_v23 = vpop.eup %2372  ;;  %2392 = vrcp.f32 %v1844_v32  ;;  %v1875_v49 = vadd.f32 1.0, %v2371_v46  ;;  %v1623_v52 = vadd.f32 %v3346_v15, %v1545_v48 }
 0x20f   :  { %v2375_v53 = vpop.eup %2374  ;;  %2065 = vst.msk [vmem:[%s3672_s7 + $0x188] sm:$0xff] %vm2015_vm0, %v2373_v23  ;;  %2394 = vpow2.f32 %v2158_v44  ;;  %v2128_v55 = vmul.f32 -1.442695, %v1592_v50 }
 0x210   :  { %v2377_v57 = vpop.eup %2376  ;;  %2034 = vst.msk [vmem:[%s3672_s7 + $0x90] sm:$0xff] %vm2015_vm0, %v2375_v53  ;;  %2396 = vrcp.f32 %v1875_v49  ;;  %v2159_v56 = vmul.f32 -1.442695, %v1623_v52  ;;  %v1547_v58 = vpop.xlane.xlu1 %1546 }
 0x211   :  { %v2379_v59 = vpop.eup %2378  ;;  %2035 = vst.msk [vmem:[%s3672_s7 + $0x98] sm:$0xff] %vm2015_vm0, %v2377_v57  ;;  %2398 = vpow2.f32 %v2127_v47  ;;  %v1624_v22 = vadd.f32 %v3346_v15, %v1547_v58  ;;  %v1485_v1 = vpop.xlane.xlu0 %1484 }
 0x212   :  { %v2381_v61 = vpop.eup %2380  ;;  %v1876_v11 = vadd.f32 1.0, %v2379_v59  ;;  %2400 = vpow2.f32 %v2128_v55  ;;  %v1593_v2 = vadd.f32 %v3346_v15, %v1485_v1 }
 0x213   :  { %v2383_v62 = vpop.eup %2382  ;;  %2066 = vst.msk [vmem:[%s3672_s7 + $0x190] sm:$0xff] %vm2015_vm0, %v2381_v61  ;;  %2402 = vpow2.f32 %v2159_v56  ;;  %v2160_v63 = vmul.f32 -1.442695, %v1624_v22 }
 0x214   :  { %v2385_v37 = vpop.eup %2384  ;;  %2404 = vrcp.f32 %v1876_v11  ;;  %v1845_v41 = vadd.f32 1.0, %v2383_v62  ;;  %v1487_v4 = vpop.xlane.xlu1 %1486  ;;  %v2129_v10 = vmul.f32 -1.442695, %v1593_v2 }
 0x215   :  { %v2387_v0 = vpop.eup %2386  ;;  %2067 = vst.msk [vmem:[%s3672_s7 + $0x198] sm:$0xff] %vm2015_vm0, %v2385_v37  ;;  %2406 = vpow2.f32 %v2160_v63  ;;  %v1594_v12 = vadd.f32 %v3346_v15, %v1487_v4  ;;  %v1549_v19 = vpop.xlane.xlu0 %1548  ;;  %v2472_v37 = vld [vmem:[#allocation2] ss:$0 sm:$0xff] }
 0x216   :  { %v2389_v6 = vpop.eup %2388  ;;  %2408 = vrcp.f32 %v1845_v41  ;;  %v1846_v8 = vadd.f32 1.0, %v2387_v0  ;;  %v1625_v18 = vadd.f32 %v3346_v15, %v1549_v19 }
 0x217   :  { %v2391_v60 = vpop.eup %2390  ;;  %2036 = vst.msk [vmem:[%s3672_s7 + $0xa0] sm:$0xff] %vm2015_vm0, %v2389_v6  ;;  %v2130_v16 = vmul.f32 -1.442695, %v1594_v12 }
 0x218   :  { %v2393_v14 = vpop.eup %2392  ;;  %2410 = vrcp.f32 %v1846_v8  ;;  %v1877_v54 = vadd.f32 1.0, %v2391_v60  ;;  %v1551_v3 = vpop.xlane.xlu1 %1550  ;;  %v2161_v21 = vmul.f32 -1.442695, %v1625_v18 }
 0x219   :  { %v2395_v17 = vpop.eup %2394  ;;  %2037 = vst.msk [vmem:[%s3672_s7 + $0xa8] sm:$0xff] %vm2015_vm0, %v2393_v14  ;;  %2412 = vpow2.f32 %v2129_v10  ;;  %v1626_v26 = vadd.f32 %v3346_v15, %v1551_v3  ;;  %v1489_v34 = vpop.xlane.xlu0 %1488 }
 0x21a   :  { %v2397_v36 = vpop.eup %2396  ;;  %2414 = vrcp.f32 %v1877_v54  ;;  %v1878_v42 = vadd.f32 1.0, %v2395_v17  ;;  %v1595_v5 = vadd.f32 %v3346_v15, %v1489_v34 }
 0x21b   :  { %v2399_v29 = vpop.eup %2398  ;;  %2068 = vst.msk [vmem:[%s3672_s7 + $0x1a0] sm:$0xff] %vm2015_vm0, %v2397_v36  ;;  %2416 = vpow2.f32 %v2130_v16  ;;  %v2162_v33 = vmul.f32 -1.442695, %v1626_v26 }
 0x21c   :  { %v2401_v27 = vpop.eup %2400  ;;  %2418 = vrcp.f32 %v1878_v42  ;;  %v1847_v30 = vadd.f32 1.0, %v2399_v29  ;;  %v1491_v13 = vpop.xlane.xlu1 %1490  ;;  %v2131_v39 = vmul.f32 -1.442695, %v1595_v5 }
 0x21d   :  { %v2403_v28 = vpop.eup %2402  ;;  %v1848_v31 = vadd.f32 1.0, %v2401_v27  ;;  %2420 = vpow2.f32 %v2161_v21  ;;  %v1596_v20 = vadd.f32 %v3346_v15, %v1491_v13  ;;  %v1553_v44 = vpop.xlane.xlu0 %1552 }
 0x21e   :  { %v2405_v25 = vpop.eup %2404  ;;  %2422 = vrcp.f32 %v1847_v30  ;;  %v1879_v7 = vadd.f32 1.0, %v2403_v28  ;;  %v1627_v45 = vadd.f32 %v3346_v15, %v1553_v44 }
 0x21f   :  { %v2407_v24 = vpop.eup %2406  ;;  %2069 = vst.msk [vmem:[%s3672_s7 + $0x1a8] sm:$0xff] %vm2015_vm0, %v2405_v25  ;;  %2424 = vrcp.f32 %v1848_v31  ;;  %v2132_v43 = vmul.f32 -1.442695, %v1596_v20 }
 0x220   :  { %v2409_v35 = vpop.eup %2408  ;;  %2426 = vrcp.f32 %v1879_v7  ;;  %v1880_v51 = vadd.f32 1.0, %v2407_v24  ;;  %v1555_v47 = vpop.xlane.xlu1 %1554  ;;  %v2163_v23 = vmul.f32 -1.442695, %v1627_v45 }
 0x221   :  { %2038 = vst.msk [vmem:[%s3672_s7 + $0xb0] sm:$0xff] %vm2015_vm0, %v2409_v35  ;;  %2428 = vpow2.f32 %v2162_v33  ;;  %v1628_v49 = vadd.f32 %v3346_v15, %v1555_v47 }
 0x222   :  { %v2411_v40 = vpop.eup %2410  ;;  %2430 = vrcp.f32 %v1880_v51 }
 0x223   :  { %v2413_v38 = vpop.eup %2412  ;;  %2039 = vst.msk [vmem:[%s3672_s7 + $0xb8] sm:$0xff] %vm2015_vm0, %v2411_v40  ;;  %2432 = vpow2.f32 %v2131_v39  ;;  %v2164_v57 = vmul.f32 -1.442695, %v1628_v49  ;;  %v1493_v58 = vpop.xlane.xlu0 %1492 }
 0x224   :  { %v2415_v9 = vpop.eup %2414  ;;  %v1849_v32 = vadd.f32 1.0, %v2413_v38  ;;  %2434 = vpow2.f32 %v2132_v43  ;;  %v1597_v22 = vadd.f32 %v3346_v15, %v1493_v58 }
 0x225   :  { %v2417_v46 = vpop.eup %2416  ;;  %2070 = vst.msk [vmem:[%s3672_s7 + $0x1b0] sm:$0xff] %vm2015_vm0, %v2415_v9  ;;  %v1495_v11 = vpop.xlane.xlu1 %1494 }
 0x226   :  { %v2419_v50 = vpop.eup %2418  ;;  %2436 = vrcp.f32 %v1849_v32  ;;  %v1850_v48 = vadd.f32 1.0, %v2417_v46  ;;  %v2133_v1 = vmul.f32 -1.442695, %v1597_v22  ;;  %v1598_v41 = vadd.f32 %v2472_v37, %v1495_v11 }
 0x227   :  { %v2421_v52 = vpop.eup %2420  ;;  %2071 = vst.msk [vmem:[%s3672_s7 + $0x1b8] sm:$0xff] %vm2015_vm0, %v2419_v50 }
 0x228   :  { %v2423_v53 = vpop.eup %2422  ;;  %2438 = vrcp.f32 %v1850_v48  ;;  %v1881_v55 = vadd.f32 1.0, %v2421_v52  ;;  %v2134_v0 = vmul.f32 -1.442695, %v1598_v41  ;;  %v1557_v4 = vpop.xlane.xlu0 %1556 }
 0x229   :  { %v2425_v56 = vpop.eup %2424  ;;  %2040 = vst.msk [vmem:[%s3672_s7 + $0xc0] sm:$0xff] %vm2015_vm0, %v2423_v53  ;;  %2440 = vpow2.f32 %v2163_v23  ;;  %v1629_v8 = vadd.f32 %v2472_v37, %v1557_v4 }
 0x22a   :  { %v2427_v59 = vpop.eup %2426  ;;  %2041 = vst.msk [vmem:[%s3672_s7 + $0xc8] sm:$0xff] %vm2015_vm0, %v2425_v56  ;;  %2442 = vrcp.f32 %v1881_v55  ;;  %v1559_v60 = vpop.xlane.xlu1 %1558 }
 0x22b   :  { %v2429_v61 = vpop.eup %2428  ;;  %2072 = vst.msk [vmem:[%s3672_s7 + $0x1c0] sm:$0xff] %vm2015_vm0, %v2427_v59  ;;  %2444 = vpow2.f32 %v2164_v57  ;;  %v2165_v14 = vmul.f32 -1.442695, %v1629_v8  ;;  %v1630_v54 = vadd.f32 %v2472_v37, %v1559_v60 }
 0x22c   :  { %v2431_v62 = vpop.eup %2430  ;;  %v1882_v63 = vadd.f32 1.0, %v2429_v61 }
 0x22d   :  { %v2433_v2 = vpop.eup %2432  ;;  %2073 = vst.msk [vmem:[%s3672_s7 + $0x1c8] sm:$0xff] %vm2015_vm0, %v2431_v62  ;;  %v2166_v17 = vmul.f32 -1.442695, %v1630_v54 }
 0x22e   :  { %2446 = vrcp.f32 %v1882_v63  ;;  %v1851_v15 = vadd.f32 1.0, %v2433_v2  ;;  %v2435_v6 = vpop.eup %2434 }
 0x22f   :  { %2448 = vpow2.f32 %v2133_v1  ;;  %v1852_v12 = vadd.f32 1.0, %v2435_v6 }
 0x230   :  { %v2437_v10 = vpop.eup %2436  ;;  %2450 = vrcp.f32 %v1851_v15 }
 0x231   :  { %2042 = vst.msk [vmem:[%s3672_s7 + $0xd0] sm:$0xff] %vm2015_vm0, %v2437_v10  ;;  %2452 = vpow2.f32 %v2134_v0 }
 0x232   :  { %v2439_v16 = vpop.eup %2438  ;;  %2454 = vrcp.f32 %v1852_v12 }
 0x233   :  { %v2441_v19 = vpop.eup %2440  ;;  %2043 = vst.msk [vmem:[%s3672_s7 + $0xd8] sm:$0xff] %vm2015_vm0, %v2439_v16  ;;  %2456 = vpow2.f32 %v2165_v14 }
 0x234   :  { %v2443_v18 = vpop.eup %2442  ;;  %v1883_v36 = vadd.f32 1.0, %v2441_v19  ;;  %2458 = vpow2.f32 %v2166_v17 }
 0x235   :  { %v2445_v42 = vpop.eup %2444  ;;  %2074 = vst.msk [vmem:[%s3672_s7 + $0x1d0] sm:$0xff] %vm2015_vm0, %v2443_v18 }
 0x236   :  { %2460 = vrcp.f32 %v1883_v36  ;;  %v1884_v3 = vadd.f32 1.0, %v2445_v42 }
 0x238   :  { %v2447_v29 = vpop.eup %2446  ;;  %2462 = vrcp.f32 %v1884_v3 }
 0x239   :  { %v2449_v21 = vpop.eup %2448  ;;  %2075 = vst.msk [vmem:[%s3672_s7 + $0x1d8] sm:$0xff] %vm2015_vm0, %v2447_v29 }
 0x23a   :  { %v2451_v26 = vpop.eup %2450  ;;  %v1853_v27 = vadd.f32 1.0, %v2449_v21 }
 0x23b   :  { %v2453_v30 = vpop.eup %2452  ;;  %2044 = vst.msk [vmem:[%s3672_s7 + $0xe0] sm:$0xff] %vm2015_vm0, %v2451_v26 }
 0x23c   :  { %v2455_v28 = vpop.eup %2454  ;;  %2464 = vrcp.f32 %v1853_v27  ;;  %v1854_v31 = vadd.f32 1.0, %v2453_v30 }
 0x23d   :  { %v2457_v33 = vpop.eup %2456  ;;  %2045 = vst.msk [vmem:[%s3672_s7 + $0xe8] sm:$0xff] %vm2015_vm0, %v2455_v28 }
 0x23e   :  { %2466 = vrcp.f32 %v1854_v31  ;;  %v1885_v25 = vadd.f32 1.0, %v2457_v33  ;;  %v2459_v7 = vpop.eup %2458 }
 0x23f   :  { %v1886_v24 = vadd.f32 1.0, %v2459_v7 }
 0x240   :  { %v2461_v34 = vpop.eup %2460  ;;  %2468 = vrcp.f32 %v1885_v25 }
 0x241   :  { %2076 = vst.msk [vmem:[%s3672_s7 + $0x1e0] sm:$0xff] %vm2015_vm0, %v2461_v34  ;;  %2470 = vrcp.f32 %v1886_v24 }
 0x242   :  { %v2463_v5 = vpop.eup %2462 }
 0x243   :  { %2077 = vst.msk [vmem:[%s3672_s7 + $0x1e8] sm:$0xff] %vm2015_vm0, %v2463_v5 }
 0x246   :  { %v2465_v35 = vpop.eup %2464 }
 0x247   :  { %2046 = vst.msk [vmem:[%s3672_s7 + $0xf0] sm:$0xff] %vm2015_vm0, %v2465_v35 }
 0x248   :  { %v2467_v51 = vpop.eup %2466 }
 0x249   :  { %2047 = vst.msk [vmem:[%s3672_s7 + $0xf8] sm:$0xff] %vm2015_vm0, %v2467_v51 }
 0x24a   :  { %v2469_v13 = vpop.eup %2468 }
 0x24b   :  { %2078 = vst.msk [vmem:[%s3672_s7 + $0x1f0] sm:$0xff] %vm2015_vm0, %v2469_v13  ;;  %v2471_v39 = vpop.eup %2470 }
 0x24c   :  { %2079 = vst.msk [vmem:[%s3672_s7 + $0x1f8] sm:$0xff] %vm2015_vm0, %v2471_v39 }

</bundles_post_ra>
